<compile_context>
chip_gen: v5e
topology: v5e:2x2
jax: 0.10.0
libtpu: 0.0.40
codegen_flags: <defaults>
</compile_context>

<pallas_src>
import functools
import math

import jax
import jax.numpy as jnp
from jax.experimental import pallas as pl
from jax.experimental.pallas import tpu as pltpu


@functools.lru_cache(maxsize=None)
def _vmem_limit_bytes():
    try:
        cap = int(pltpu.get_tpu_info().vmem_capacity_bytes)
    except Exception:  # pragma: no cover - conservative fallback
        cap = 64 * 1024 * 1024
    return int(min(cap * 3 // 4, 96 * 1024 * 1024))


# -----------------------------------------------------------------------------
# Fully fused GhostModuleV2 kernel (one image per grid step).
# Layouts (all free HBM reshapes done in the wrapper):
#   x  : (B, H, Wh, 2*Cin)      lane dim packs [even-W cols | odd-W cols]
#   y  : (B, H, Wh, 2*Cf)       lane dim packs [even-W cols | odd-W cols]
# -----------------------------------------------------------------------------
def _ghost_kernel(x_ref, wp_ref, bp_ref, wc_ref, bc_ref,
                  ws1_ref, bs1_ref, ws2_ref, bs2_ref, ws3_ref, bs3_ref,
                  o_ref,
                  xpe_ref, xpo_ref, wpad_ref, hpad_ref,
                  *, H, Hh, Wh, Cin, Cinit, Cf):
    f32 = jnp.float32
    xv = x_ref[0]                           # (H, Wh, 2*Cin)
    x_e = xv[:, :, :Cin]                    # even W columns
    x_o = xv[:, :, Cin:]                    # odd  W columns

    # ---------------- primary 1x1 conv (+folded BN) + ReLU : MXU ------------
    wp = wp_ref[...]                        # (Cin, Cinit)
    bp = bp_ref[...]                        # (1, Cinit)

    def pconv(xp):
        r = jnp.dot(xp.reshape(H * Wh, Cin), wp,
                    preferred_element_type=f32) + bp
        return jnp.maximum(r, 0.0).reshape(H, Wh, Cinit)

    x1_e = pconv(x_e)
    x1_o = pconv(x_o)

    # stash x1 parities in halo scratches; zero only the halo strips.
    z_row = jnp.zeros((1, Wh + 2, Cinit), f32)
    z_col = jnp.zeros((H + 2, 1, Cinit), f32)
    for ref in (xpe_ref, xpo_ref):
        ref[0:1, :, :] = z_row
        ref[H + 1:H + 2, :, :] = z_row
        ref[:, 0:1, :] = z_col
        ref[:, Wh + 1:Wh + 2, :] = z_col
    xpe_ref[1:1 + H, 1:1 + Wh, :] = x1_e
    xpo_ref[1:1 + H, 1:1 + Wh, :] = x1_o

    # ---------------- cheap 3x3 depthwise (+folded BN) + ReLU ---------------
    wc = wc_ref[...]                        # (3, 3, Cinit)
    bc = bc_ref[...]                        # (1, Cinit)

    def dw3x3(parity):
        acc = jnp.zeros((H, Wh, Cinit), f32)
        for dh in range(3):
            for dc in range(3):
                e = parity + dc - 1         # column offset in full resolution
                src = xpe_ref if (e % 2) == 0 else xpo_ref
                q = e // 2                  # column offset in half resolution
                acc = acc + src[dh:dh + H, 1 + q:1 + q + Wh, :] * wc[dh, dc]
        return jnp.maximum(acc + bc[0], 0.0)

    x2_e = dw3x3(0)
    x2_o = dw3x3(1)

    # ---------------- short path (half resolution) --------------------------
    # 2x2 avg pool: parity sums are free here (0.25 folded into ws1).
    s = (x_e + x_o).reshape(Hh, 2, Wh, Cin)
    pooled4 = s[:, 0] + s[:, 1]             # (Hh, Wh, Cin) == 4 * avg_pool

    r1 = jnp.dot(pooled4.reshape(Hh * Wh, Cin), ws1_ref[...],
                 preferred_element_type=f32) + bs1_ref[...]
    r1 = r1.reshape(Hh, Wh, Cf)

    # (1,5) depthwise + BN (pad W by 2; halo strips only)
    z_w = jnp.zeros((Hh, 2, Cf), f32)
    wpad_ref[:, 0:2, :] = z_w
    wpad_ref[:, Wh + 2:Wh + 4, :] = z_w
    wpad_ref[:, 2:2 + Wh, :] = r1
    ws2 = ws2_ref[...]
    acc = jnp.zeros((Hh, Wh, Cf), f32)
    for t in range(5):
        acc = acc + wpad_ref[:, t:t + Wh, :] * ws2[t]
    r2 = acc + bs2_ref[0]

    # (5,1) depthwise + BN (pad H by 2; halo strips only)
    z_h = jnp.zeros((2, Wh, Cf), f32)
    hpad_ref[0:2, :, :] = z_h
    hpad_ref[Hh + 2:Hh + 4, :, :] = z_h
    hpad_ref[2:2 + Hh, :, :] = r2
    ws3 = ws3_ref[...]
    acc = jnp.zeros((Hh, Wh, Cf), f32)
    for t in range(5):
        acc = acc + hpad_ref[t:t + Hh, :, :] * ws3[t]
    r3 = acc + bs3_ref[0]

    # gate at half resolution; exact sigmoid (exp on the EUP).
    g = 1.0 / (1.0 + jnp.exp(-r3))          # (Hh, Wh, Cf)
    gb = g[:, None, :, :]                   # broadcast over the H-parity axis

    # ---------------- gated channel concat + lane-packed store --------------
    keep2 = Cf - Cinit                      # channels of x2 kept by out[:, :Cf]

    def gate(x1p, x2p):
        if keep2 == Cinit:
            cat = jnp.concatenate([x1p, x2p], axis=-1)
        elif keep2 > 0:
            cat = jnp.concatenate([x1p, x2p[:, :, :keep2]], axis=-1)
        else:
            cat = x1p[:, :, :Cf]
        # nearest-2x upsample of g == broadcast over (H-parity, W-parity);
        # H-parity via a free (Hh,2,...) view, W-parity because this whole
        # function runs once per W-parity.
        y = cat.reshape(Hh, 2, Wh, Cf) * gb
        return y.reshape(H, Wh, Cf)

    y_e = gate(x1_e, x2_e)
    y_o = gate(x1_o, x2_o)
    o_ref[0] = jnp.concatenate([y_e, y_o], axis=-1)   # (H, Wh, 2*Cf)


def ghost_fused(x_nhwc, params, out_chs):
    B, H, W, Cin = x_nhwc.shape
    assert H % 2 == 0 and W % 2 == 0, \
        "even spatial dims required (2x2 avg-pool + exact nearest-2x upsample)"
    Cinit = params["p_w"].shape[1]
    assert params["c_w"].shape[0] == 3, "dw_size=3 (module default) assumed"
    Cf = out_chs
    Hh, Wh = H // 2, W // 2

    xv = x_nhwc.reshape(B, H, Wh, 2 * Cin)            # free HBM view

    kern = functools.partial(_ghost_kernel, H=H, Hh=Hh, Wh=Wh,
                             Cin=Cin, Cinit=Cinit, Cf=Cf)

    out_v = pl.pallas_call(
        kern,
        out_shape=jax.ShapeDtypeStruct((B, H, Wh, 2 * Cf), jnp.float32),
        grid_spec=pltpu.PrefetchScalarGridSpec(
            num_scalar_prefetch=0,
            grid=(B,),
            in_specs=[
                pl.BlockSpec((1, H, Wh, 2 * Cin), lambda b: (b, 0, 0, 0)),
                pl.BlockSpec((Cin, Cinit), lambda b: (0, 0)),
                pl.BlockSpec((1, Cinit), lambda b: (0, 0)),
                pl.BlockSpec((3, 3, Cinit), lambda b: (0, 0, 0)),
                pl.BlockSpec((1, Cinit), lambda b: (0, 0)),
                pl.BlockSpec((Cin, Cf), lambda b: (0, 0)),
                pl.BlockSpec((1, Cf), lambda b: (0, 0)),
                pl.BlockSpec((5, Cf), lambda b: (0, 0)),
                pl.BlockSpec((1, Cf), lambda b: (0, 0)),
                pl.BlockSpec((5, Cf), lambda b: (0, 0)),
                pl.BlockSpec((1, Cf), lambda b: (0, 0)),
            ],
            out_specs=pl.BlockSpec((1, H, Wh, 2 * Cf), lambda b: (b, 0, 0, 0)),
            scratch_shapes=[
                pltpu.VMEM((H + 2, Wh + 2, Cinit), jnp.float32),   # x1 even
                pltpu.VMEM((H + 2, Wh + 2, Cinit), jnp.float32),   # x1 odd
                pltpu.VMEM((Hh, Wh + 4, Cf), jnp.float32),         # (1,5) dw pad
                pltpu.VMEM((Hh + 4, Wh, Cf), jnp.float32),         # (5,1) dw pad
            ],
        ),
        compiler_params=pltpu.CompilerParams(
            dimension_semantics=("parallel",),
            vmem_limit_bytes=_vmem_limit_bytes()),
    )(xv, params["p_w"], params["p_b"], params["c_w"], params["c_b"],
      params["s1_w"], params["s1_b"], params["s2_w"], params["s2_b"],
      params["s3_w"], params["s3_b"])

    return out_v.reshape(B, H, W, Cf)                  # free HBM view back


# -----------------------------------------------------------------------------
# Parameter construction (BN folded into conv weights, inference mode).
# -----------------------------------------------------------------------------
def _bn_params(key, c, eps=1e-5):
    k1, k2, k3, k4 = jax.random.split(key, 4)
    gamma = 1.0 + 0.1 * jax.random.normal(k1, (c,), jnp.float32)
    beta = 0.1 * jax.random.normal(k2, (c,), jnp.float32)
    mean = 0.1 * jax.random.normal(k3, (c,), jnp.float32)
    var = 0.5 + jax.random.uniform(k4, (c,), jnp.float32)
    scale = gamma / jnp.sqrt(var + eps)
    bias = beta - mean * scale
    return scale, bias


def init_params(key, in_chs, out_chs, ratio=2, dw_size=3):
    # Module defaults only: kernel_size=1, ratio=2, stride=1, use_act=True.
    assert ratio == 2
    init_chs = math.ceil(out_chs / ratio)
    new_chs = init_chs * (ratio - 1)
    assert new_chs == init_chs
    ks = jax.random.split(key, 10)

    w_p = 0.1 * jax.random.normal(ks[0], (in_chs, init_chs), jnp.float32)
    s_p, b_p = _bn_params(ks[1], init_chs)
    w_c = 0.1 * jax.random.normal(ks[2], (dw_size, dw_size, new_chs), jnp.float32)
    s_c, b_c = _bn_params(ks[3], new_chs)
    w_s1 = 0.1 * jax.random.normal(ks[4], (in_chs, out_chs), jnp.float32)
    s_s1, b_s1 = _bn_params(ks[5], out_chs)
    w_s2 = 0.1 * jax.random.normal(ks[6], (5, out_chs), jnp.float32)   # (1,5) dw
    s_s2, b_s2 = _bn_params(ks[7], out_chs)
    w_s3 = 0.1 * jax.random.normal(ks[8], (5, out_chs), jnp.float32)   # (5,1) dw
    s_s3, b_s3 = _bn_params(ks[9], out_chs)

    return {
        "p_w": w_p * s_p[None, :],
        "p_b": b_p.reshape(1, init_chs),
        "c_w": w_c * s_c[None, None, :],
        "c_b": b_c.reshape(1, new_chs),
        # 0.25 of the 2x2 avg-pool is folded into the short-path 1x1 weights.
        "s1_w": 0.25 * w_s1 * s_s1[None, :],
        "s1_b": b_s1.reshape(1, out_chs),
        "s2_w": w_s2 * s_s2[None, :],
        "s2_b": b_s2.reshape(1, out_chs),
        "s3_w": w_s3 * s_s3[None, :],
        "s3_b": b_s3.reshape(1, out_chs),
    }


# -----------------------------------------------------------------------------
# GhostModuleV2 forward (NCHW in / NCHW out, like PyTorch).
# -----------------------------------------------------------------------------
def ghost_module_v2(x_nchw, params, out_chs):
    x = jnp.transpose(x_nchw, (0, 2, 3, 1)).astype(jnp.float32)   # NHWC
    y = ghost_fused(x, params, out_chs)
    return jnp.transpose(y, (0, 3, 1, 2))                         # NCHW


# -----------------------------------------------------------------------------
# Pure-JAX reference (same folded params) for a correctness check.
# -----------------------------------------------------------------------------
def ghost_reference(x_nchw, p, out_chs):
    x = jnp.transpose(x_nchw, (0, 2, 3, 1)).astype(jnp.float32)
    B, H, W, _ = x.shape
    Hh, Wh = H // 2, W // 2
    x1 = jax.nn.relu(jnp.einsum("bhwc,cd->bhwd", x, p["p_w"]) + p["p_b"][0])
    xp = jnp.pad(x1, ((0, 0), (1, 1), (1, 1), (0, 0)))
    x2 = sum(xp[:, dh:dh + H, dc:dc + W, :] * p["c_w"][dh, dc]
             for dh in range(3) for dc in range(3))
    x2 = jax.nn.relu(x2 + p["c_b"][0])
    cat = jnp.concatenate([x1, x2], axis=-1)[..., :out_chs]

    pooled4 = (x[:, 0::2, 0::2] + x[:, 0::2, 1::2] +
               x[:, 1::2, 0::2] + x[:, 1::2, 1::2])
    r1 = jnp.einsum("bhwc,cd->bhwd", pooled4, p["s1_w"]) + p["s1_b"][0]
    r1p = jnp.pad(r1, ((0, 0), (0, 0), (2, 2), (0, 0)))
    r2 = sum(r1p[:, :, t:t + Wh, :] * p["s2_w"][t] for t in range(5)) + p["s2_b"][0]
    r2p = jnp.pad(r2, ((0, 0), (2, 2), (0, 0), (0, 0)))
    r3 = sum(r2p[:, t:t + Hh, :, :] * p["s3_w"][t] for t in range(5)) + p["s3_b"][0]
    g = jax.nn.sigmoid(r3)
    gup = jnp.repeat(jnp.repeat(g, 2, axis=1), 2, axis=2)
    y = cat * gup
    return jnp.transpose(y, (0, 3, 1, 2))


if __name__ == "__main__":
    key = jax.random.PRNGKey(0)
    kx, kp = jax.random.split(key)

    B, in_chs, H, W = 2, 8, 16, 16
    out_chs = 16

    x = jax.random.normal(kx, (B, in_chs, H, W), jnp.float32)
    params = init_params(kp, in_chs, out_chs)

    fwd = jax.jit(functools.partial(ghost_module_v2, out_chs=out_chs))
    y = fwd(x, params)
    jax.block_until_ready(y)

    assert y.shape == (B, out_chs, H, W), y.shape
    assert bool(jnp.all(jnp.isfinite(y)))

    y_ref = ghost_reference(x, params, out_chs)
    err = float(jnp.max(jnp.abs(y - y_ref)))
    assert err < 5e-2, f"max abs error vs reference: {err}"

    print("KERNEL_OK")
</pallas_src>

<mosaic_0001>
module attributes {stable_mosaic.version = 11 : i64} {
  func.func @_ghost_kernel(%arg0: i32, %arg1: memref<1x16x8x16xf32, #tpu.memory_space<vmem>>, %arg2: memref<8x8xf32, #tpu.memory_space<vmem>>, %arg3: memref<1x8xf32, #tpu.memory_space<vmem>>, %arg4: memref<3x3x8xf32, #tpu.memory_space<vmem>>, %arg5: memref<1x8xf32, #tpu.memory_space<vmem>>, %arg6: memref<8x16xf32, #tpu.memory_space<vmem>>, %arg7: memref<1x16xf32, #tpu.memory_space<vmem>>, %arg8: memref<5x16xf32, #tpu.memory_space<vmem>>, %arg9: memref<1x16xf32, #tpu.memory_space<vmem>>, %arg10: memref<5x16xf32, #tpu.memory_space<vmem>>, %arg11: memref<1x16xf32, #tpu.memory_space<vmem>>, %arg12: memref<1x16x8x32xf32, #tpu.memory_space<vmem>>, %arg13: memref<18x10x8xf32, #tpu.memory_space<vmem>>, %arg14: memref<18x10x8xf32, #tpu.memory_space<vmem>>, %arg15: memref<8x12x16xf32, #tpu.memory_space<vmem>>, %arg16: memref<12x8x16xf32, #tpu.memory_space<vmem>>) attributes {dimension_semantics = [#tpu.dimension_semantics<parallel>], iteration_bounds = array<i64: 2>, scalar_prefetch = 0 : i64, scratch_operands = 4 : i64, tpu.core_type = #tpu.core_type<tc>, window_params = [{transform_indices = @transform_0, window_bounds = array<i64: 1, 16, 8, 16>}, {pipeline_mode = #tpu.pipeline_mode<synchronous>, transform_indices = @transform_1, window_bounds = array<i64: 8, 8>}, {pipeline_mode = #tpu.pipeline_mode<synchronous>, transform_indices = @transform_2, window_bounds = array<i64: 1, 8>}, {pipeline_mode = #tpu.pipeline_mode<synchronous>, transform_indices = @transform_3, window_bounds = array<i64: 3, 3, 8>}, {pipeline_mode = #tpu.pipeline_mode<synchronous>, transform_indices = @transform_4, window_bounds = array<i64: 1, 8>}, {pipeline_mode = #tpu.pipeline_mode<synchronous>, transform_indices = @transform_5, window_bounds = array<i64: 8, 16>}, {pipeline_mode = #tpu.pipeline_mode<synchronous>, transform_indices = @transform_6, window_bounds = array<i64: 1, 16>}, {pipeline_mode = #tpu.pipeline_mode<synchronous>, transform_indices = @transform_7, window_bounds = array<i64: 5, 16>}, {pipeline_mode = #tpu.pipeline_mode<synchronous>, transform_indices = @transform_8, window_bounds = array<i64: 1, 16>}, {pipeline_mode = #tpu.pipeline_mode<synchronous>, transform_indices = @transform_9, window_bounds = array<i64: 5, 16>}, {pipeline_mode = #tpu.pipeline_mode<synchronous>, transform_indices = @transform_10, window_bounds = array<i64: 1, 16>}, {transform_indices = @transform_11, window_bounds = array<i64: 1, 16, 8, 32>}]} {
    %c0 = arith.constant 0 : index
    %c0_0 = arith.constant 0 : index
    %c0_1 = arith.constant 0 : index
    %c0_2 = arith.constant 0 : index
    %0 = vector.load %arg1[%c0, %c0_0, %c0_1, %c0_2] : memref<1x16x8x16xf32, #tpu.memory_space<vmem>>, vector<1x16x8x16xf32>
    %1 = vector.shape_cast %0 : vector<1x16x8x16xf32> to vector<16x8x16xf32>
    %2 = vector.extract_strided_slice %1 {offsets = [0, 0, 0], sizes = [16, 8, 8], strides = [1, 1, 1]} : vector<16x8x16xf32> to vector<16x8x8xf32>
    %3 = vector.extract_strided_slice %1 {offsets = [0, 0, 8], sizes = [16, 8, 8], strides = [1, 1, 1]} : vector<16x8x16xf32> to vector<16x8x8xf32>
    %c0_3 = arith.constant 0 : index
    %c0_4 = arith.constant 0 : index
    %4 = vector.load %arg2[%c0_3, %c0_4] : memref<8x8xf32, #tpu.memory_space<vmem>>, vector<8x8xf32>
    %c0_5 = arith.constant 0 : index
    %c0_6 = arith.constant 0 : index
    %5 = vector.load %arg3[%c0_5, %c0_6] : memref<1x8xf32, #tpu.memory_space<vmem>>, vector<1x8xf32>
    %6 = vector.shape_cast %2 : vector<16x8x8xf32> to vector<128x8xf32>
    %cst = arith.constant dense<0.000000e+00> : vector<128x8xf32>
    %7 = tpu.matmul %6, %4, %cst {dimension_numbers = #tpu.dot_dimension_numbers<[1], [0], [0], [1], [0, 0, 1, 1], [], []>} : vector<128x8xf32>, vector<8x8xf32>, vector<128x8xf32> -> vector<128x8xf32>
    %8 = vector.broadcast %5 : vector<1x8xf32> to vector<128x8xf32>
    %9 = arith.addf %7, %8 : vector<128x8xf32>
    %cst_7 = arith.constant 0.000000e+00 : f32
    %10 = vector.broadcast %cst_7 : f32 to vector<128x8xf32>
    %11 = arith.maximumf %9, %10 : vector<128x8xf32>
    %12 = vector.shape_cast %11 : vector<128x8xf32> to vector<16x8x8xf32>
    %13 = vector.shape_cast %3 : vector<16x8x8xf32> to vector<128x8xf32>
    %cst_8 = arith.constant dense<0.000000e+00> : vector<128x8xf32>
    %14 = tpu.matmul %13, %4, %cst_8 {dimension_numbers = #tpu.dot_dimension_numbers<[1], [0], [0], [1], [0, 0, 1, 1], [], []>} : vector<128x8xf32>, vector<8x8xf32>, vector<128x8xf32> -> vector<128x8xf32>
    %15 = vector.broadcast %5 : vector<1x8xf32> to vector<128x8xf32>
    %16 = arith.addf %14, %15 : vector<128x8xf32>
    %cst_9 = arith.constant 0.000000e+00 : f32
    %17 = vector.broadcast %cst_9 : f32 to vector<128x8xf32>
    %18 = arith.maximumf %16, %17 : vector<128x8xf32>
    %19 = vector.shape_cast %18 : vector<128x8xf32> to vector<16x8x8xf32>
    %cst_10 = arith.constant 0.000000e+00 : f32
    %20 = vector.broadcast %cst_10 : f32 to vector<1x10x8xf32>
    %cst_11 = arith.constant 0.000000e+00 : f32
    %21 = vector.broadcast %cst_11 : f32 to vector<18x1x8xf32>
    %c0_12 = arith.constant 0 : index
    %c0_13 = arith.constant 0 : index
    %c0_14 = arith.constant 0 : index
    %22 = vector.load %arg13[%c0_12, %c0_13, %c0_14] : memref<18x10x8xf32, #tpu.memory_space<vmem>>, vector<1x10x8xf32>
    tpu.vector_store %arg13[%c0_12, %c0_13, %c0_14], %20 {strides = array<i32>} : memref<18x10x8xf32, #tpu.memory_space<vmem>>, vector<1x10x8xf32>,
    %c17 = arith.constant 17 : index
    %c0_15 = arith.constant 0 : index
    %c0_16 = arith.constant 0 : index
    %23 = vector.load %arg13[%c17, %c0_15, %c0_16] : memref<18x10x8xf32, #tpu.memory_space<vmem>>, vector<1x10x8xf32>
    tpu.vector_store %arg13[%c17, %c0_15, %c0_16], %20 {strides = array<i32>} : memref<18x10x8xf32, #tpu.memory_space<vmem>>, vector<1x10x8xf32>,
    %c0_17 = arith.constant 0 : index
    %c0_18 = arith.constant 0 : index
    %c0_19 = arith.constant 0 : index
    %24 = vector.load %arg13[%c0_17, %c0_18, %c0_19] : memref<18x10x8xf32, #tpu.memory_space<vmem>>, vector<18x1x8xf32>
    tpu.vector_store %arg13[%c0_17, %c0_18, %c0_19], %21 {strides = array<i32>} : memref<18x10x8xf32, #tpu.memory_space<vmem>>, vector<18x1x8xf32>,
    %c0_20 = arith.constant 0 : index
    %c9 = arith.constant 9 : index
    %c0_21 = arith.constant 0 : index
    %25 = vector.load %arg13[%c0_20, %c9, %c0_21] : memref<18x10x8xf32, #tpu.memory_space<vmem>>, vector<18x1x8xf32>
    tpu.vector_store %arg13[%c0_20, %c9, %c0_21], %21 {strides = array<i32>} : memref<18x10x8xf32, #tpu.memory_space<vmem>>, vector<18x1x8xf32>,
    %c0_22 = arith.constant 0 : index
    %c0_23 = arith.constant 0 : index
    %c0_24 = arith.constant 0 : index
    %26 = vector.load %arg14[%c0_22, %c0_23, %c0_24] : memref<18x10x8xf32, #tpu.memory_space<vmem>>, vector<1x10x8xf32>
    tpu.vector_store %arg14[%c0_22, %c0_23, %c0_24], %20 {strides = array<i32>} : memref<18x10x8xf32, #tpu.memory_space<vmem>>, vector<1x10x8xf32>,
    %c17_25 = arith.constant 17 : index
    %c0_26 = arith.constant 0 : index
    %c0_27 = arith.constant 0 : index
    %27 = vector.load %arg14[%c17_25, %c0_26, %c0_27] : memref<18x10x8xf32, #tpu.memory_space<vmem>>, vector<1x10x8xf32>
    tpu.vector_store %arg14[%c17_25, %c0_26, %c0_27], %20 {strides = array<i32>} : memref<18x10x8xf32, #tpu.memory_space<vmem>>, vector<1x10x8xf32>,
    %c0_28 = arith.constant 0 : index
    %c0_29 = arith.constant 0 : index
    %c0_30 = arith.constant 0 : index
    %28 = vector.load %arg14[%c0_28, %c0_29, %c0_30] : memref<18x10x8xf32, #tpu.memory_space<vmem>>, vector<18x1x8xf32>
    tpu.vector_store %arg14[%c0_28, %c0_29, %c0_30], %21 {strides = array<i32>} : memref<18x10x8xf32, #tpu.memory_space<vmem>>, vector<18x1x8xf32>,
    %c0_31 = arith.constant 0 : index
    %c9_32 = arith.constant 9 : index
    %c0_33 = arith.constant 0 : index
    %29 = vector.load %arg14[%c0_31, %c9_32, %c0_33] : memref<18x10x8xf32, #tpu.memory_space<vmem>>, vector<18x1x8xf32>
    tpu.vector_store %arg14[%c0_31, %c9_32, %c0_33], %21 {strides = array<i32>} : memref<18x10x8xf32, #tpu.memory_space<vmem>>, vector<18x1x8xf32>,
    %c1 = arith.constant 1 : index
    %c1_34 = arith.constant 1 : index
    %c0_35 = arith.constant 0 : index
    %30 = vector.load %arg13[%c1, %c1_34, %c0_35] : memref<18x10x8xf32, #tpu.memory_space<vmem>>, vector<16x8x8xf32>
    tpu.vector_store %arg13[%c1, %c1_34, %c0_35], %12 {strides = array<i32>} : memref<18x10x8xf32, #tpu.memory_space<vmem>>, vector<16x8x8xf32>,
    %c1_36 = arith.constant 1 : index
    %c1_37 = arith.constant 1 : index
    %c0_38 = arith.constant 0 : index
    %31 = vector.load %arg14[%c1_36, %c1_37, %c0_38] : memref<18x10x8xf32, #tpu.memory_space<vmem>>, vector<16x8x8xf32>
    tpu.vector_store %arg14[%c1_36, %c1_37, %c0_38], %19 {strides = array<i32>} : memref<18x10x8xf32, #tpu.memory_space<vmem>>, vector<16x8x8xf32>,
    %c0_39 = arith.constant 0 : index
    %c0_40 = arith.constant 0 : index
    %c0_41 = arith.constant 0 : index
    %32 = vector.load %arg4[%c0_39, %c0_40, %c0_41] : memref<3x3x8xf32, #tpu.memory_space<vmem>>, vector<3x3x8xf32>
    %c0_42 = arith.constant 0 : index
    %c0_43 = arith.constant 0 : index
    %33 = vector.load %arg5[%c0_42, %c0_43] : memref<1x8xf32, #tpu.memory_space<vmem>>, vector<1x8xf32>
    %cst_44 = arith.constant 0.000000e+00 : f32
    %34 = vector.broadcast %cst_44 : f32 to vector<16x8x8xf32>
    %c0_45 = arith.constant 0 : index
    %c0_46 = arith.constant 0 : index
    %c0_47 = arith.constant 0 : index
    %35 = vector.load %arg14[%c0_45, %c0_46, %c0_47] : memref<18x10x8xf32, #tpu.memory_space<vmem>>, vector<16x8x8xf32>
    %36 = vector.extract_strided_slice %32 {offsets = [0, 0, 0], sizes = [1, 1, 8], strides = [1, 1, 1]} : vector<3x3x8xf32> to vector<1x1x8xf32>
    %37 = vector.shape_cast %36 : vector<1x1x8xf32> to vector<8xf32>
    %38 = vector.shape_cast %37 : vector<8xf32> to vector<1x1x8xf32>
    %39 = vector.broadcast %38 : vector<1x1x8xf32> to vector<16x8x8xf32>
    %40 = arith.mulf %35, %39 : vector<16x8x8xf32>
    %41 = arith.addf %34, %40 : vector<16x8x8xf32>
    %c0_48 = arith.constant 0 : index
    %c1_49 = arith.constant 1 : index
    %c0_50 = arith.constant 0 : index
    %42 = vector.load %arg13[%c0_48, %c1_49, %c0_50] : memref<18x10x8xf32, #tpu.memory_space<vmem>>, vector<16x8x8xf32>
    %43 = vector.extract_strided_slice %32 {offsets = [0, 1, 0], sizes = [1, 1, 8], strides = [1, 1, 1]} : vector<3x3x8xf32> to vector<1x1x8xf32>
    %44 = vector.shape_cast %43 : vector<1x1x8xf32> to vector<8xf32>
    %45 = vector.shape_cast %44 : vector<8xf32> to vector<1x1x8xf32>
    %46 = vector.broadcast %45 : vector<1x1x8xf32> to vector<16x8x8xf32>
    %47 = arith.mulf %42, %46 : vector<16x8x8xf32>
    %48 = arith.addf %41, %47 : vector<16x8x8xf32>
    %c0_51 = arith.constant 0 : index
    %c1_52 = arith.constant 1 : index
    %c0_53 = arith.constant 0 : index
    %49 = vector.load %arg14[%c0_51, %c1_52, %c0_53] : memref<18x10x8xf32, #tpu.memory_space<vmem>>, vector<16x8x8xf32>
    %50 = vector.extract_strided_slice %32 {offsets = [0, 2, 0], sizes = [1, 1, 8], strides = [1, 1, 1]} : vector<3x3x8xf32> to vector<1x1x8xf32>
    %51 = vector.shape_cast %50 : vector<1x1x8xf32> to vector<8xf32>
    %52 = vector.shape_cast %51 : vector<8xf32> to vector<1x1x8xf32>
    %53 = vector.broadcast %52 : vector<1x1x8xf32> to vector<16x8x8xf32>
    %54 = arith.mulf %49, %53 : vector<16x8x8xf32>
    %55 = arith.addf %48, %54 : vector<16x8x8xf32>
    %c1_54 = arith.constant 1 : index
    %c0_55 = arith.constant 0 : index
    %c0_56 = arith.constant 0 : index
    %56 = vector.load %arg14[%c1_54, %c0_55, %c0_56] : memref<18x10x8xf32, #tpu.memory_space<vmem>>, vector<16x8x8xf32>
    %57 = vector.extract_strided_slice %32 {offsets = [1, 0, 0], sizes = [1, 1, 8], strides = [1, 1, 1]} : vector<3x3x8xf32> to vector<1x1x8xf32>
    %58 = vector.shape_cast %57 : vector<1x1x8xf32> to vector<8xf32>
    %59 = vector.shape_cast %58 : vector<8xf32> to vector<1x1x8xf32>
    %60 = vector.broadcast %59 : vector<1x1x8xf32> to vector<16x8x8xf32>
    %61 = arith.mulf %56, %60 : vector<16x8x8xf32>
    %62 = arith.addf %55, %61 : vector<16x8x8xf32>
    %c1_57 = arith.constant 1 : index
    %c1_58 = arith.constant 1 : index
    %c0_59 = arith.constant 0 : index
    %63 = vector.load %arg13[%c1_57, %c1_58, %c0_59] : memref<18x10x8xf32, #tpu.memory_space<vmem>>, vector<16x8x8xf32>
    %64 = vector.extract_strided_slice %32 {offsets = [1, 1, 0], sizes = [1, 1, 8], strides = [1, 1, 1]} : vector<3x3x8xf32> to vector<1x1x8xf32>
    %65 = vector.shape_cast %64 : vector<1x1x8xf32> to vector<8xf32>
    %66 = vector.shape_cast %65 : vector<8xf32> to vector<1x1x8xf32>
    %67 = vector.broadcast %66 : vector<1x1x8xf32> to vector<16x8x8xf32>
    %68 = arith.mulf %63, %67 : vector<16x8x8xf32>
    %69 = arith.addf %62, %68 : vector<16x8x8xf32>
    %c1_60 = arith.constant 1 : index
    %c1_61 = arith.constant 1 : index
    %c0_62 = arith.constant 0 : index
    %70 = vector.load %arg14[%c1_60, %c1_61, %c0_62] : memref<18x10x8xf32, #tpu.memory_space<vmem>>, vector<16x8x8xf32>
    %71 = vector.extract_strided_slice %32 {offsets = [1, 2, 0], sizes = [1, 1, 8], strides = [1, 1, 1]} : vector<3x3x8xf32> to vector<1x1x8xf32>
    %72 = vector.shape_cast %71 : vector<1x1x8xf32> to vector<8xf32>
    %73 = vector.shape_cast %72 : vector<8xf32> to vector<1x1x8xf32>
    %74 = vector.broadcast %73 : vector<1x1x8xf32> to vector<16x8x8xf32>
    %75 = arith.mulf %70, %74 : vector<16x8x8xf32>
    %76 = arith.addf %69, %75 : vector<16x8x8xf32>
    %c2 = arith.constant 2 : index
    %c0_63 = arith.constant 0 : index
    %c0_64 = arith.constant 0 : index
    %77 = vector.load %arg14[%c2, %c0_63, %c0_64] : memref<18x10x8xf32, #tpu.memory_space<vmem>>, vector<16x8x8xf32>
    %78 = vector.extract_strided_slice %32 {offsets = [2, 0, 0], sizes = [1, 1, 8], strides = [1, 1, 1]} : vector<3x3x8xf32> to vector<1x1x8xf32>
    %79 = vector.shape_cast %78 : vector<1x1x8xf32> to vector<8xf32>
    %80 = vector.shape_cast %79 : vector<8xf32> to vector<1x1x8xf32>
    %81 = vector.broadcast %80 : vector<1x1x8xf32> to vector<16x8x8xf32>
    %82 = arith.mulf %77, %81 : vector<16x8x8xf32>
    %83 = arith.addf %76, %82 : vector<16x8x8xf32>
    %c2_65 = arith.constant 2 : index
    %c1_66 = arith.constant 1 : index
    %c0_67 = arith.constant 0 : index
    %84 = vector.load %arg13[%c2_65, %c1_66, %c0_67] : memref<18x10x8xf32, #tpu.memory_space<vmem>>, vector<16x8x8xf32>
    %85 = vector.extract_strided_slice %32 {offsets = [2, 1, 0], sizes = [1, 1, 8], strides = [1, 1, 1]} : vector<3x3x8xf32> to vector<1x1x8xf32>
    %86 = vector.shape_cast %85 : vector<1x1x8xf32> to vector<8xf32>
    %87 = vector.shape_cast %86 : vector<8xf32> to vector<1x1x8xf32>
    %88 = vector.broadcast %87 : vector<1x1x8xf32> to vector<16x8x8xf32>
    %89 = arith.mulf %84, %88 : vector<16x8x8xf32>
    %90 = arith.addf %83, %89 : vector<16x8x8xf32>
    %c2_68 = arith.constant 2 : index
    %c1_69 = arith.constant 1 : index
    %c0_70 = arith.constant 0 : index
    %91 = vector.load %arg14[%c2_68, %c1_69, %c0_70] : memref<18x10x8xf32, #tpu.memory_space<vmem>>, vector<16x8x8xf32>
    %92 = vector.extract_strided_slice %32 {offsets = [2, 2, 0], sizes = [1, 1, 8], strides = [1, 1, 1]} : vector<3x3x8xf32> to vector<1x1x8xf32>
    %93 = vector.shape_cast %92 : vector<1x1x8xf32> to vector<8xf32>
    %94 = vector.shape_cast %93 : vector<8xf32> to vector<1x1x8xf32>
    %95 = vector.broadcast %94 : vector<1x1x8xf32> to vector<16x8x8xf32>
    %96 = arith.mulf %91, %95 : vector<16x8x8xf32>
    %97 = arith.addf %90, %96 : vector<16x8x8xf32>
    %98 = vector.shape_cast %33 : vector<1x8xf32> to vector<8xf32>
    %99 = vector.shape_cast %98 : vector<8xf32> to vector<1x1x8xf32>
    %100 = vector.broadcast %99 : vector<1x1x8xf32> to vector<16x8x8xf32>
    %101 = arith.addf %97, %100 : vector<16x8x8xf32>
    %cst_71 = arith.constant 0.000000e+00 : f32
    %102 = vector.broadcast %cst_71 : f32 to vector<16x8x8xf32>
    %103 = arith.maximumf %101, %102 : vector<16x8x8xf32>
    %cst_72 = arith.constant 0.000000e+00 : f32
    %104 = vector.broadcast %cst_72 : f32 to vector<16x8x8xf32>
    %c0_73 = arith.constant 0 : index
    %c1_74 = arith.constant 1 : index
    %c0_75 = arith.constant 0 : index
    %105 = vector.load %arg13[%c0_73, %c1_74, %c0_75] : memref<18x10x8xf32, #tpu.memory_space<vmem>>, vector<16x8x8xf32>
    %106 = vector.extract_strided_slice %32 {offsets = [0, 0, 0], sizes = [1, 1, 8], strides = [1, 1, 1]} : vector<3x3x8xf32> to vector<1x1x8xf32>
    %107 = vector.shape_cast %106 : vector<1x1x8xf32> to vector<8xf32>
    %108 = vector.shape_cast %107 : vector<8xf32> to vector<1x1x8xf32>
    %109 = vector.broadcast %108 : vector<1x1x8xf32> to vector<16x8x8xf32>
    %110 = arith.mulf %105, %109 : vector<16x8x8xf32>
    %111 = arith.addf %104, %110 : vector<16x8x8xf32>
    %c0_76 = arith.constant 0 : index
    %c1_77 = arith.constant 1 : index
    %c0_78 = arith.constant 0 : index
    %112 = vector.load %arg14[%c0_76, %c1_77, %c0_78] : memref<18x10x8xf32, #tpu.memory_space<vmem>>, vector<16x8x8xf32>
    %113 = vector.extract_strided_slice %32 {offsets = [0, 1, 0], sizes = [1, 1, 8], strides = [1, 1, 1]} : vector<3x3x8xf32> to vector<1x1x8xf32>
    %114 = vector.shape_cast %113 : vector<1x1x8xf32> to vector<8xf32>
    %115 = vector.shape_cast %114 : vector<8xf32> to vector<1x1x8xf32>
    %116 = vector.broadcast %115 : vector<1x1x8xf32> to vector<16x8x8xf32>
    %117 = arith.mulf %112, %116 : vector<16x8x8xf32>
    %118 = arith.addf %111, %117 : vector<16x8x8xf32>
    %c0_79 = arith.constant 0 : index
    %c2_80 = arith.constant 2 : index
    %c0_81 = arith.constant 0 : index
    %119 = vector.load %arg13[%c0_79, %c2_80, %c0_81] : memref<18x10x8xf32, #tpu.memory_space<vmem>>, vector<16x8x8xf32>
    %120 = vector.extract_strided_slice %32 {offsets = [0, 2, 0], sizes = [1, 1, 8], strides = [1, 1, 1]} : vector<3x3x8xf32> to vector<1x1x8xf32>
    %121 = vector.shape_cast %120 : vector<1x1x8xf32> to vector<8xf32>
    %122 = vector.shape_cast %121 : vector<8xf32> to vector<1x1x8xf32>
    %123 = vector.broadcast %122 : vector<1x1x8xf32> to vector<16x8x8xf32>
    %124 = arith.mulf %119, %123 : vector<16x8x8xf32>
    %125 = arith.addf %118, %124 : vector<16x8x8xf32>
    %c1_82 = arith.constant 1 : index
    %c1_83 = arith.constant 1 : index
    %c0_84 = arith.constant 0 : index
    %126 = vector.load %arg13[%c1_82, %c1_83, %c0_84] : memref<18x10x8xf32, #tpu.memory_space<vmem>>, vector<16x8x8xf32>
    %127 = vector.extract_strided_slice %32 {offsets = [1, 0, 0], sizes = [1, 1, 8], strides = [1, 1, 1]} : vector<3x3x8xf32> to vector<1x1x8xf32>
    %128 = vector.shape_cast %127 : vector<1x1x8xf32> to vector<8xf32>
    %129 = vector.shape_cast %128 : vector<8xf32> to vector<1x1x8xf32>
    %130 = vector.broadcast %129 : vector<1x1x8xf32> to vector<16x8x8xf32>
    %131 = arith.mulf %126, %130 : vector<16x8x8xf32>
    %132 = arith.addf %125, %131 : vector<16x8x8xf32>
    %c1_85 = arith.constant 1 : index
    %c1_86 = arith.constant 1 : index
    %c0_87 = arith.constant 0 : index
    %133 = vector.load %arg14[%c1_85, %c1_86, %c0_87] : memref<18x10x8xf32, #tpu.memory_space<vmem>>, vector<16x8x8xf32>
    %134 = vector.extract_strided_slice %32 {offsets = [1, 1, 0], sizes = [1, 1, 8], strides = [1, 1, 1]} : vector<3x3x8xf32> to vector<1x1x8xf32>
    %135 = vector.shape_cast %134 : vector<1x1x8xf32> to vector<8xf32>
    %136 = vector.shape_cast %135 : vector<8xf32> to vector<1x1x8xf32>
    %137 = vector.broadcast %136 : vector<1x1x8xf32> to vector<16x8x8xf32>
    %138 = arith.mulf %133, %137 : vector<16x8x8xf32>
    %139 = arith.addf %132, %138 : vector<16x8x8xf32>
    %c1_88 = arith.constant 1 : index
    %c2_89 = arith.constant 2 : index
    %c0_90 = arith.constant 0 : index
    %140 = vector.load %arg13[%c1_88, %c2_89, %c0_90] : memref<18x10x8xf32, #tpu.memory_space<vmem>>, vector<16x8x8xf32>
    %141 = vector.extract_strided_slice %32 {offsets = [1, 2, 0], sizes = [1, 1, 8], strides = [1, 1, 1]} : vector<3x3x8xf32> to vector<1x1x8xf32>
    %142 = vector.shape_cast %141 : vector<1x1x8xf32> to vector<8xf32>
    %143 = vector.shape_cast %142 : vector<8xf32> to vector<1x1x8xf32>
    %144 = vector.broadcast %143 : vector<1x1x8xf32> to vector<16x8x8xf32>
    %145 = arith.mulf %140, %144 : vector<16x8x8xf32>
    %146 = arith.addf %139, %145 : vector<16x8x8xf32>
    %c2_91 = arith.constant 2 : index
    %c1_92 = arith.constant 1 : index
    %c0_93 = arith.constant 0 : index
    %147 = vector.load %arg13[%c2_91, %c1_92, %c0_93] : memref<18x10x8xf32, #tpu.memory_space<vmem>>, vector<16x8x8xf32>
    %148 = vector.extract_strided_slice %32 {offsets = [2, 0, 0], sizes = [1, 1, 8], strides = [1, 1, 1]} : vector<3x3x8xf32> to vector<1x1x8xf32>
    %149 = vector.shape_cast %148 : vector<1x1x8xf32> to vector<8xf32>
    %150 = vector.shape_cast %149 : vector<8xf32> to vector<1x1x8xf32>
    %151 = vector.broadcast %150 : vector<1x1x8xf32> to vector<16x8x8xf32>
    %152 = arith.mulf %147, %151 : vector<16x8x8xf32>
    %153 = arith.addf %146, %152 : vector<16x8x8xf32>
    %c2_94 = arith.constant 2 : index
    %c1_95 = arith.constant 1 : index
    %c0_96 = arith.constant 0 : index
    %154 = vector.load %arg14[%c2_94, %c1_95, %c0_96] : memref<18x10x8xf32, #tpu.memory_space<vmem>>, vector<16x8x8xf32>
    %155 = vector.extract_strided_slice %32 {offsets = [2, 1, 0], sizes = [1, 1, 8], strides = [1, 1, 1]} : vector<3x3x8xf32> to vector<1x1x8xf32>
    %156 = vector.shape_cast %155 : vector<1x1x8xf32> to vector<8xf32>
    %157 = vector.shape_cast %156 : vector<8xf32> to vector<1x1x8xf32>
    %158 = vector.broadcast %157 : vector<1x1x8xf32> to vector<16x8x8xf32>
    %159 = arith.mulf %154, %158 : vector<16x8x8xf32>
    %160 = arith.addf %153, %159 : vector<16x8x8xf32>
    %c2_97 = arith.constant 2 : index
    %c2_98 = arith.constant 2 : index
    %c0_99 = arith.constant 0 : index
    %161 = vector.load %arg13[%c2_97, %c2_98, %c0_99] : memref<18x10x8xf32, #tpu.memory_space<vmem>>, vector<16x8x8xf32>
    %162 = vector.extract_strided_slice %32 {offsets = [2, 2, 0], sizes = [1, 1, 8], strides = [1, 1, 1]} : vector<3x3x8xf32> to vector<1x1x8xf32>
    %163 = vector.shape_cast %162 : vector<1x1x8xf32> to vector<8xf32>
    %164 = vector.shape_cast %163 : vector<8xf32> to vector<1x1x8xf32>
    %165 = vector.broadcast %164 : vector<1x1x8xf32> to vector<16x8x8xf32>
    %166 = arith.mulf %161, %165 : vector<16x8x8xf32>
    %167 = arith.addf %160, %166 : vector<16x8x8xf32>
    %168 = vector.shape_cast %33 : vector<1x8xf32> to vector<8xf32>
    %169 = vector.shape_cast %168 : vector<8xf32> to vector<1x1x8xf32>
    %170 = vector.broadcast %169 : vector<1x1x8xf32> to vector<16x8x8xf32>
    %171 = arith.addf %167, %170 : vector<16x8x8xf32>
    %cst_100 = arith.constant 0.000000e+00 : f32
    %172 = vector.broadcast %cst_100 : f32 to vector<16x8x8xf32>
    %173 = arith.maximumf %171, %172 : vector<16x8x8xf32>
    %174 = arith.addf %2, %3 : vector<16x8x8xf32>
    %175 = vector.shape_cast %174 : vector<16x8x8xf32> to vector<8x2x8x8xf32>
    %176 = vector.extract_strided_slice %175 {offsets = [0, 0, 0, 0], sizes = [8, 1, 8, 8], strides = [1, 1, 1, 1]} : vector<8x2x8x8xf32> to vector<8x1x8x8xf32>
    %177 = vector.shape_cast %176 : vector<8x1x8x8xf32> to vector<8x8x8xf32>
    %178 = vector.extract_strided_slice %175 {offsets = [0, 1, 0, 0], sizes = [8, 1, 8, 8], strides = [1, 1, 1, 1]} : vector<8x2x8x8xf32> to vector<8x1x8x8xf32>
    %179 = vector.shape_cast %178 : vector<8x1x8x8xf32> to vector<8x8x8xf32>
    %180 = arith.addf %177, %179 : vector<8x8x8xf32>
    %181 = vector.shape_cast %180 : vector<8x8x8xf32> to vector<64x8xf32>
    %c0_101 = arith.constant 0 : index
    %c0_102 = arith.constant 0 : index
    %182 = vector.load %arg6[%c0_101, %c0_102] : memref<8x16xf32, #tpu.memory_space<vmem>>, vector<8x16xf32>
    %cst_103 = arith.constant dense<0.000000e+00> : vector<64x16xf32>
    %183 = tpu.matmul %181, %182, %cst_103 {dimension_numbers = #tpu.dot_dimension_numbers<[1], [0], [0], [1], [0, 0, 1, 1], [], []>} : vector<64x8xf32>, vector<8x16xf32>, vector<64x16xf32> -> vector<64x16xf32>
    %c0_104 = arith.constant 0 : index
    %c0_105 = arith.constant 0 : index
    %184 = vector.load %arg7[%c0_104, %c0_105] : memref<1x16xf32, #tpu.memory_space<vmem>>, vector<1x16xf32>
    %185 = vector.broadcast %184 : vector<1x16xf32> to vector<64x16xf32>
    %186 = arith.addf %183, %185 : vector<64x16xf32>
    %187 = vector.shape_cast %186 : vector<64x16xf32> to vector<8x8x16xf32>
    %cst_106 = arith.constant 0.000000e+00 : f32
    %188 = vector.broadcast %cst_106 : f32 to vector<8x2x16xf32>
    %c0_107 = arith.constant 0 : index
    %c0_108 = arith.constant 0 : index
    %c0_109 = arith.constant 0 : index
    %189 = vector.load %arg15[%c0_107, %c0_108, %c0_109] : memref<8x12x16xf32, #tpu.memory_space<vmem>>, vector<8x2x16xf32>
    tpu.vector_store %arg15[%c0_107, %c0_108, %c0_109], %188 {strides = array<i32>} : memref<8x12x16xf32, #tpu.memory_space<vmem>>, vector<8x2x16xf32>,
    %c0_110 = arith.constant 0 : index
    %c10 = arith.constant 10 : index
    %c0_111 = arith.constant 0 : index
    %190 = vector.load %arg15[%c0_110, %c10, %c0_111] : memref<8x12x16xf32, #tpu.memory_space<vmem>>, vector<8x2x16xf32>
    tpu.vector_store %arg15[%c0_110, %c10, %c0_111], %188 {strides = array<i32>} : memref<8x12x16xf32, #tpu.memory_space<vmem>>, vector<8x2x16xf32>,
    %c0_112 = arith.constant 0 : index
    %c2_113 = arith.constant 2 : index
    %c0_114 = arith.constant 0 : index
    %191 = vector.load %arg15[%c0_112, %c2_113, %c0_114] : memref<8x12x16xf32, #tpu.memory_space<vmem>>, vector<8x8x16xf32>
    tpu.vector_store %arg15[%c0_112, %c2_113, %c0_114], %187 {strides = array<i32>} : memref<8x12x16xf32, #tpu.memory_space<vmem>>, vector<8x8x16xf32>,
    %c0_115 = arith.constant 0 : index
    %c0_116 = arith.constant 0 : index
    %192 = vector.load %arg8[%c0_115, %c0_116] : memref<5x16xf32, #tpu.memory_space<vmem>>, vector<5x16xf32>
    %cst_117 = arith.constant 0.000000e+00 : f32
    %193 = vector.broadcast %cst_117 : f32 to vector<8x8x16xf32>
    %c0_118 = arith.constant 0 : index
    %c0_119 = arith.constant 0 : index
    %c0_120 = arith.constant 0 : index
    %194 = vector.load %arg15[%c0_118, %c0_119, %c0_120] : memref<8x12x16xf32, #tpu.memory_space<vmem>>, vector<8x8x16xf32>
    %195 = vector.extract_strided_slice %192 {offsets = [0, 0], sizes = [1, 16], strides = [1, 1]} : vector<5x16xf32> to vector<1x16xf32>
    %196 = vector.shape_cast %195 : vector<1x16xf32> to vector<16xf32>
    %197 = vector.shape_cast %196 : vector<16xf32> to vector<1x1x16xf32>
    %198 = vector.broadcast %197 : vector<1x1x16xf32> to vector<8x8x16xf32>
    %199 = arith.mulf %194, %198 : vector<8x8x16xf32>
    %200 = arith.addf %193, %199 : vector<8x8x16xf32>
    %c0_121 = arith.constant 0 : index
    %c1_122 = arith.constant 1 : index
    %c0_123 = arith.constant 0 : index
    %201 = vector.load %arg15[%c0_121, %c1_122, %c0_123] : memref<8x12x16xf32, #tpu.memory_space<vmem>>, vector<8x8x16xf32>
    %202 = vector.extract_strided_slice %192 {offsets = [1, 0], sizes = [1, 16], strides = [1, 1]} : vector<5x16xf32> to vector<1x16xf32>
    %203 = vector.shape_cast %202 : vector<1x16xf32> to vector<16xf32>
    %204 = vector.shape_cast %203 : vector<16xf32> to vector<1x1x16xf32>
    %205 = vector.broadcast %204 : vector<1x1x16xf32> to vector<8x8x16xf32>
    %206 = arith.mulf %201, %205 : vector<8x8x16xf32>
    %207 = arith.addf %200, %206 : vector<8x8x16xf32>
    %c0_124 = arith.constant 0 : index
    %c2_125 = arith.constant 2 : index
    %c0_126 = arith.constant 0 : index
    %208 = vector.load %arg15[%c0_124, %c2_125, %c0_126] : memref<8x12x16xf32, #tpu.memory_space<vmem>>, vector<8x8x16xf32>
    %209 = vector.extract_strided_slice %192 {offsets = [2, 0], sizes = [1, 16], strides = [1, 1]} : vector<5x16xf32> to vector<1x16xf32>
    %210 = vector.shape_cast %209 : vector<1x16xf32> to vector<16xf32>
    %211 = vector.shape_cast %210 : vector<16xf32> to vector<1x1x16xf32>
    %212 = vector.broadcast %211 : vector<1x1x16xf32> to vector<8x8x16xf32>
    %213 = arith.mulf %208, %212 : vector<8x8x16xf32>
    %214 = arith.addf %207, %213 : vector<8x8x16xf32>
    %c0_127 = arith.constant 0 : index
    %c3 = arith.constant 3 : index
    %c0_128 = arith.constant 0 : index
    %215 = vector.load %arg15[%c0_127, %c3, %c0_128] : memref<8x12x16xf32, #tpu.memory_space<vmem>>, vector<8x8x16xf32>
    %216 = vector.extract_strided_slice %192 {offsets = [3, 0], sizes = [1, 16], strides = [1, 1]} : vector<5x16xf32> to vector<1x16xf32>
    %217 = vector.shape_cast %216 : vector<1x16xf32> to vector<16xf32>
    %218 = vector.shape_cast %217 : vector<16xf32> to vector<1x1x16xf32>
    %219 = vector.broadcast %218 : vector<1x1x16xf32> to vector<8x8x16xf32>
    %220 = arith.mulf %215, %219 : vector<8x8x16xf32>
    %221 = arith.addf %214, %220 : vector<8x8x16xf32>
    %c0_129 = arith.constant 0 : index
    %c4 = arith.constant 4 : index
    %c0_130 = arith.constant 0 : index
    %222 = vector.load %arg15[%c0_129, %c4, %c0_130] : memref<8x12x16xf32, #tpu.memory_space<vmem>>, vector<8x8x16xf32>
    %223 = vector.extract_strided_slice %192 {offsets = [4, 0], sizes = [1, 16], strides = [1, 1]} : vector<5x16xf32> to vector<1x16xf32>
    %224 = vector.shape_cast %223 : vector<1x16xf32> to vector<16xf32>
    %225 = vector.shape_cast %224 : vector<16xf32> to vector<1x1x16xf32>
    %226 = vector.broadcast %225 : vector<1x1x16xf32> to vector<8x8x16xf32>
    %227 = arith.mulf %222, %226 : vector<8x8x16xf32>
    %228 = arith.addf %221, %227 : vector<8x8x16xf32>
    %c0_131 = arith.constant 0 : index
    %c0_132 = arith.constant 0 : index
    %229 = vector.load %arg9[%c0_131, %c0_132] : memref<1x16xf32, #tpu.memory_space<vmem>>, vector<1x16xf32>
    %230 = vector.shape_cast %229 : vector<1x16xf32> to vector<16xf32>
    %231 = vector.shape_cast %230 : vector<16xf32> to vector<1x1x16xf32>
    %232 = vector.broadcast %231 : vector<1x1x16xf32> to vector<8x8x16xf32>
    %233 = arith.addf %228, %232 : vector<8x8x16xf32>
    %cst_133 = arith.constant 0.000000e+00 : f32
    %234 = vector.broadcast %cst_133 : f32 to vector<2x8x16xf32>
    %c0_134 = arith.constant 0 : index
    %c0_135 = arith.constant 0 : index
    %c0_136 = arith.constant 0 : index
    %235 = vector.load %arg16[%c0_134, %c0_135, %c0_136] : memref<12x8x16xf32, #tpu.memory_space<vmem>>, vector<2x8x16xf32>
    tpu.vector_store %arg16[%c0_134, %c0_135, %c0_136], %234 {strides = array<i32>} : memref<12x8x16xf32, #tpu.memory_space<vmem>>, vector<2x8x16xf32>,
    %c10_137 = arith.constant 10 : index
    %c0_138 = arith.constant 0 : index
    %c0_139 = arith.constant 0 : index
    %236 = vector.load %arg16[%c10_137, %c0_138, %c0_139] : memref<12x8x16xf32, #tpu.memory_space<vmem>>, vector<2x8x16xf32>
    tpu.vector_store %arg16[%c10_137, %c0_138, %c0_139], %234 {strides = array<i32>} : memref<12x8x16xf32, #tpu.memory_space<vmem>>, vector<2x8x16xf32>,
    %c2_140 = arith.constant 2 : index
    %c0_141 = arith.constant 0 : index
    %c0_142 = arith.constant 0 : index
    %237 = vector.load %arg16[%c2_140, %c0_141, %c0_142] : memref<12x8x16xf32, #tpu.memory_space<vmem>>, vector<8x8x16xf32>
    tpu.vector_store %arg16[%c2_140, %c0_141, %c0_142], %233 {strides = array<i32>} : memref<12x8x16xf32, #tpu.memory_space<vmem>>, vector<8x8x16xf32>,
    %c0_143 = arith.constant 0 : index
    %c0_144 = arith.constant 0 : index
    %238 = vector.load %arg10[%c0_143, %c0_144] : memref<5x16xf32, #tpu.memory_space<vmem>>, vector<5x16xf32>
    %cst_145 = arith.constant 0.000000e+00 : f32
    %239 = vector.broadcast %cst_145 : f32 to vector<8x8x16xf32>
    %c0_146 = arith.constant 0 : index
    %c0_147 = arith.constant 0 : index
    %c0_148 = arith.constant 0 : index
    %240 = vector.load %arg16[%c0_146, %c0_147, %c0_148] : memref<12x8x16xf32, #tpu.memory_space<vmem>>, vector<8x8x16xf32>
    %241 = vector.extract_strided_slice %238 {offsets = [0, 0], sizes = [1, 16], strides = [1, 1]} : vector<5x16xf32> to vector<1x16xf32>
    %242 = vector.shape_cast %241 : vector<1x16xf32> to vector<16xf32>
    %243 = vector.shape_cast %242 : vector<16xf32> to vector<1x1x16xf32>
    %244 = vector.broadcast %243 : vector<1x1x16xf32> to vector<8x8x16xf32>
    %245 = arith.mulf %240, %244 : vector<8x8x16xf32>
    %246 = arith.addf %239, %245 : vector<8x8x16xf32>
    %c1_149 = arith.constant 1 : index
    %c0_150 = arith.constant 0 : index
    %c0_151 = arith.constant 0 : index
    %247 = vector.load %arg16[%c1_149, %c0_150, %c0_151] : memref<12x8x16xf32, #tpu.memory_space<vmem>>, vector<8x8x16xf32>
    %248 = vector.extract_strided_slice %238 {offsets = [1, 0], sizes = [1, 16], strides = [1, 1]} : vector<5x16xf32> to vector<1x16xf32>
    %249 = vector.shape_cast %248 : vector<1x16xf32> to vector<16xf32>
    %250 = vector.shape_cast %249 : vector<16xf32> to vector<1x1x16xf32>
    %251 = vector.broadcast %250 : vector<1x1x16xf32> to vector<8x8x16xf32>
    %252 = arith.mulf %247, %251 : vector<8x8x16xf32>
    %253 = arith.addf %246, %252 : vector<8x8x16xf32>
    %c2_152 = arith.constant 2 : index
    %c0_153 = arith.constant 0 : index
    %c0_154 = arith.constant 0 : index
    %254 = vector.load %arg16[%c2_152, %c0_153, %c0_154] : memref<12x8x16xf32, #tpu.memory_space<vmem>>, vector<8x8x16xf32>
    %255 = vector.extract_strided_slice %238 {offsets = [2, 0], sizes = [1, 16], strides = [1, 1]} : vector<5x16xf32> to vector<1x16xf32>
    %256 = vector.shape_cast %255 : vector<1x16xf32> to vector<16xf32>
    %257 = vector.shape_cast %256 : vector<16xf32> to vector<1x1x16xf32>
    %258 = vector.broadcast %257 : vector<1x1x16xf32> to vector<8x8x16xf32>
    %259 = arith.mulf %254, %258 : vector<8x8x16xf32>
    %260 = arith.addf %253, %259 : vector<8x8x16xf32>
    %c3_155 = arith.constant 3 : index
    %c0_156 = arith.constant 0 : index
    %c0_157 = arith.constant 0 : index
    %261 = vector.load %arg16[%c3_155, %c0_156, %c0_157] : memref<12x8x16xf32, #tpu.memory_space<vmem>>, vector<8x8x16xf32>
    %262 = vector.extract_strided_slice %238 {offsets = [3, 0], sizes = [1, 16], strides = [1, 1]} : vector<5x16xf32> to vector<1x16xf32>
    %263 = vector.shape_cast %262 : vector<1x16xf32> to vector<16xf32>
    %264 = vector.shape_cast %263 : vector<16xf32> to vector<1x1x16xf32>
    %265 = vector.broadcast %264 : vector<1x1x16xf32> to vector<8x8x16xf32>
    %266 = arith.mulf %261, %265 : vector<8x8x16xf32>
    %267 = arith.addf %260, %266 : vector<8x8x16xf32>
    %c4_158 = arith.constant 4 : index
    %c0_159 = arith.constant 0 : index
    %c0_160 = arith.constant 0 : index
    %268 = vector.load %arg16[%c4_158, %c0_159, %c0_160] : memref<12x8x16xf32, #tpu.memory_space<vmem>>, vector<8x8x16xf32>
    %269 = vector.extract_strided_slice %238 {offsets = [4, 0], sizes = [1, 16], strides = [1, 1]} : vector<5x16xf32> to vector<1x16xf32>
    %270 = vector.shape_cast %269 : vector<1x16xf32> to vector<16xf32>
    %271 = vector.shape_cast %270 : vector<16xf32> to vector<1x1x16xf32>
    %272 = vector.broadcast %271 : vector<1x1x16xf32> to vector<8x8x16xf32>
    %273 = arith.mulf %268, %272 : vector<8x8x16xf32>
    %274 = arith.addf %267, %273 : vector<8x8x16xf32>
    %c0_161 = arith.constant 0 : index
    %c0_162 = arith.constant 0 : index
    %275 = vector.load %arg11[%c0_161, %c0_162] : memref<1x16xf32, #tpu.memory_space<vmem>>, vector<1x16xf32>
    %276 = vector.shape_cast %275 : vector<1x16xf32> to vector<16xf32>
    %277 = vector.shape_cast %276 : vector<16xf32> to vector<1x1x16xf32>
    %278 = vector.broadcast %277 : vector<1x1x16xf32> to vector<8x8x16xf32>
    %279 = arith.addf %274, %278 : vector<8x8x16xf32>
    %cst_163 = arith.constant 0.000000e+00 : f32
    %280 = vector.broadcast %cst_163 : f32 to vector<8x8x16xf32>
    %281 = arith.subf %280, %279 : vector<8x8x16xf32>
    %282 = math.exp %281 : vector<8x8x16xf32>
    %cst_164 = arith.constant 1.000000e+00 : f32
    %283 = vector.broadcast %cst_164 : f32 to vector<8x8x16xf32>
    %284 = arith.addf %283, %282 : vector<8x8x16xf32>
    %cst_165 = arith.constant 1.000000e+00 : f32
    %285 = vector.broadcast %cst_165 : f32 to vector<8x8x16xf32>
    %286 = arith.divf %285, %284 : vector<8x8x16xf32>
    %287 = vector.shape_cast %286 : vector<8x8x16xf32> to vector<8x1x8x16xf32>
    %288 = tpu.concatenate %12, %103 in 2 : vector<16x8x8xf32>, vector<16x8x8xf32> -> vector<16x8x16xf32>
    %289 = vector.shape_cast %288 : vector<16x8x16xf32> to vector<8x2x8x16xf32>
    %290 = vector.broadcast %287 : vector<8x1x8x16xf32> to vector<8x2x8x16xf32>
    %291 = arith.mulf %289, %290 : vector<8x2x8x16xf32>
    %292 = vector.shape_cast %291 : vector<8x2x8x16xf32> to vector<16x8x16xf32>
    %293 = tpu.concatenate %19, %173 in 2 : vector<16x8x8xf32>, vector<16x8x8xf32> -> vector<16x8x16xf32>
    %294 = vector.shape_cast %293 : vector<16x8x16xf32> to vector<8x2x8x16xf32>
    %295 = vector.broadcast %287 : vector<8x1x8x16xf32> to vector<8x2x8x16xf32>
    %296 = arith.mulf %294, %295 : vector<8x2x8x16xf32>
    %297 = vector.shape_cast %296 : vector<8x2x8x16xf32> to vector<16x8x16xf32>
    %298 = tpu.concatenate %292, %297 in 2 : vector<16x8x16xf32>, vector<16x8x16xf32> -> vector<16x8x32xf32>
    %c0_166 = arith.constant 0 : index
    %c0_167 = arith.constant 0 : index
    %c0_168 = arith.constant 0 : index
    %c0_169 = arith.constant 0 : index
    %299 = vector.load %arg12[%c0_166, %c0_167, %c0_168, %c0_169] : memref<1x16x8x32xf32, #tpu.memory_space<vmem>>, vector<1x16x8x32xf32>
    %300 = vector.shape_cast %299 : vector<1x16x8x32xf32> to vector<16x8x32xf32>
    %301 = vector.shape_cast %298 : vector<16x8x32xf32> to vector<1x16x8x32xf32>
    tpu.vector_store %arg12[%c0_166, %c0_167, %c0_168, %c0_169], %301 {strides = array<i32>} : memref<1x16x8x32xf32, #tpu.memory_space<vmem>>, vector<1x16x8x32xf32>,
    return
  }
  func.func @transform_0(%arg0: i32) -> (i32, i32, i32, i32) {
    %c0_i32 = arith.constant 0 : i32
    %c0_i32_0 = arith.constant 0 : i32
    %c0_i32_1 = arith.constant 0 : i32
    %c0_i32_2 = arith.constant 0 : i32
    return %arg0, %c0_i32, %c0_i32_0, %c0_i32_1 : i32, i32, i32, i32
  }
  func.func @transform_1(%arg0: i32) -> (i32, i32) {
    %c0_i32 = arith.constant 0 : i32
    %c0_i32_0 = arith.constant 0 : i32
    %c0_i32_1 = arith.constant 0 : i32
    return %c0_i32, %c0_i32_0 : i32, i32
  }
  func.func @transform_2(%arg0: i32) -> (i32, i32) {
    %c0_i32 = arith.constant 0 : i32
    %c0_i32_0 = arith.constant 0 : i32
    %c0_i32_1 = arith.constant 0 : i32
    return %c0_i32, %c0_i32_0 : i32, i32
  }
  func.func @transform_3(%arg0: i32) -> (i32, i32, i32) {
    %c0_i32 = arith.constant 0 : i32
    %c0_i32_0 = arith.constant 0 : i32
    %c0_i32_1 = arith.constant 0 : i32
    %c0_i32_2 = arith.constant 0 : i32
    return %c0_i32, %c0_i32_0, %c0_i32_1 : i32, i32, i32
  }
  func.func @transform_4(%arg0: i32) -> (i32, i32) {
    %c0_i32 = arith.constant 0 : i32
    %c0_i32_0 = arith.constant 0 : i32
    %c0_i32_1 = arith.constant 0 : i32
    return %c0_i32, %c0_i32_0 : i32, i32
  }
  func.func @transform_5(%arg0: i32) -> (i32, i32) {
    %c0_i32 = arith.constant 0 : i32
    %c0_i32_0 = arith.constant 0 : i32
    %c0_i32_1 = arith.constant 0 : i32
    return %c0_i32, %c0_i32_0 : i32, i32
  }
  func.func @transform_6(%arg0: i32) -> (i32, i32) {
    %c0_i32 = arith.constant 0 : i32
    %c0_i32_0 = arith.constant 0 : i32
    %c0_i32_1 = arith.constant 0 : i32
    return %c0_i32, %c0_i32_0 : i32, i32
  }
  func.func @transform_7(%arg0: i32) -> (i32, i32) {
    %c0_i32 = arith.constant 0 : i32
    %c0_i32_0 = arith.constant 0 : i32
    %c0_i32_1 = arith.constant 0 : i32
    return %c0_i32, %c0_i32_0 : i32, i32
  }
  func.func @transform_8(%arg0: i32) -> (i32, i32) {
    %c0_i32 = arith.constant 0 : i32
    %c0_i32_0 = arith.constant 0 : i32
    %c0_i32_1 = arith.constant 0 : i32
    return %c0_i32, %c0_i32_0 : i32, i32
  }
  func.func @transform_9(%arg0: i32) -> (i32, i32) {
    %c0_i32 = arith.constant 0 : i32
    %c0_i32_0 = arith.constant 0 : i32
    %c0_i32_1 = arith.constant 0 : i32
    return %c0_i32, %c0_i32_0 : i32, i32
  }
  func.func @transform_10(%arg0: i32) -> (i32, i32) {
    %c0_i32 = arith.constant 0 : i32
    %c0_i32_0 = arith.constant 0 : i32
    %c0_i32_1 = arith.constant 0 : i32
    return %c0_i32, %c0_i32_0 : i32, i32
  }
  func.func @transform_11(%arg0: i32) -> (i32, i32, i32, i32) {
    %c0_i32 = arith.constant 0 : i32
    %c0_i32_0 = arith.constant 0 : i32
    %c0_i32_1 = arith.constant 0 : i32
    %c0_i32_2 = arith.constant 0 : i32
    return %arg0, %c0_i32, %c0_i32_0, %c0_i32_1 : i32, i32, i32, i32
  }
}

</mosaic_0001>

<bundles_post_ra>
// kernel: ghost_module_v2.1
= control target key start
LH: loop header
LB: loop body
LE: loop exit
PB: predicated region body
PF: predicated region fallthrough
CT: control target
= control target key end

     0   :  { %s2757_s17 = smov 0   ;;  %s4771_s0 = inlined_call_operand.vmem [shape: f32[2,16,8,16], index: 0, kind: input, shape index: {}]   ;;  %s4772_s1 = inlined_call_operand.vmem [shape: f32[8,8], index: 1, kind: input, shape index: {}]   ;;  %s4773_s2 = inlined_call_operand.vmem [shape: f32[1,8], index: 2, kind: input, shape index: {}]   ;;  %s4774_s3 = inlined_call_operand.vmem [shape: f32[3,3,8], index: 3, kind: input, shape index: {}]   ;;  %s4775_s4 = inlined_call_operand.vmem [shape: f32[1,8], index: 4, kind: input, shape index: {}]   ;;  %s4776_s5 = inlined_call_operand.vmem [shape: f32[8,16], index: 5, kind: input, shape index: {}]   ;;  %s4777_s6 = inlined_call_operand.vmem [shape: f32[1,16], index: 6, kind: input, shape index: {}]   ;;  %s4778_s7 = inlined_call_operand.vmem [shape: f32[5,16], index: 7, kind: input, shape index: {}]   ;;  %s4779_s8 = inlined_call_operand.vmem [shape: f32[1,16], index: 8, kind: input, shape index: {}]   ;;  %s4780_s9 = inlined_call_operand.vmem [shape: f32[5,16], index: 9, kind: input, shape index: {}]   ;;  %s4781_s10 = inlined_call_operand.vmem [shape: f32[1,16], index: 10, kind: input, shape index: {}]   ;;  %s4782_s11 = inlined_call_operand.vmem [shape: f32[2,16,8,32], index: 11, kind: output, shape index: {}]  }
   0x1 LB: > { %s2576_s18 = sadd.s32 4294967295, %s2691_s17   ;;  %p2580_p0 = scmp.ge.s32.totalorder %s2691_s17, 1  ;;  %s2691_s17 = sphi %s2757_s17, %s21_s17  }
   0x2   : > { %p337_p1 = scmp.lt.s32.totalorder %s2691_s17, 3 }
   0x4   : > { %p338_p2 = pnand %p2580_p0, %p337_p1 }
   0x6   : > { %341 = sbr.rel (%p338_p2) target bundleno = 741 (0x2e5), region = 64 }
   0xb   : > { %p377_p3 = scmp.lt.s32.totalorder %s2576_s18, 1  ;;  %s2693_s23 = smov 120   ;;  %vm408_vm0 = vcmask 64512   ;;  %v403_v6 = vld [vmem:[%s4772_s1] sm:$0xff]  ;;  %vm689_vm1 = vcmask 57344   ;;  %vm684_vm2 = vcmask 58368  }
   0xc   : > { %2630 = vmatpush.msra.mxu3 %v403_v6  ;;  %472 = vmatpush.msra.mxu0 %v403_v6  ;;  %v1691_v17 = vld [vmem:[%s4776_s5] sm:$0xff]  ;;  %vm1761_vm3 = vcmask 123904   ;;  %vm1778_vm4 = vcmask 130048   ;;  %s2695_s26 = smov 8  }
   0xd   : > { %s5080_s18 = smov (!%p377_p3, %s2576_s18), 1  ;;  %2629 = vmatpush.msra.mxu2 %v403_v6  ;;  %617 = vmatpush.msra.mxu1 %v403_v6  ;;  %v2895_v46 = vld [vmem:[%s4773_s2] ss:$0 sm:$0xff] }
   0xe   : > { %s2627_s19 = sshll.u32 %s5080_s18, 7  ;;  %2631 = vmatpush.msrb.mxu3 %v403_v6 }
   0xf   : > { %s2773_s22 = scalar_lea.vmem %s4771_s0, %s2627_s19  ;;  %1735 = vmatpush.msrb.mxu2 %v1691_v17 }
  0x10   : > { %v2776_v0 = vld [vmem:[%s2773_s22 + $0x10] sm:$0xff]  ;;  %v387_v1 = vld [vmem:[%s2773_s22] sm:$0xff]  ;;  %v2788_v3 = vld [vmem:[%s2773_s22 + $0x18] sm:$0xff] }
  0x11   : > { %542 = vrot.lane.b32.xlu1 %v2776_v0, %s2693_s23  ;;  %538 = vrot.lane.b32.xlu0 %v387_v1, %s2693_s23  ;;  %v2783_v2 = vld [vmem:[%s2773_s22 + $0x20] sm:$0xff]  ;;  %v388_v4 = vld [vmem:[%s2773_s22 + $0x8] sm:$0xff] }
  0x12   : > { %546 = vrot.lane.b32.xlu2 %v2783_v2, %s2693_s23  ;;  %v2795_v5 = vld [vmem:[%s2773_s22 + $0x28] sm:$0xff]  ;;  %v2801_v7 = vld [vmem:[%s2773_s22 + $0x60] sm:$0xff]  ;;  %v2808_v8 = vld [vmem:[%s2773_s22 + $0x50] sm:$0xff]  ;;  %2585 = vmatmul.msk.f32.vlgmr.msra.gmra.mxu0 %vm408_vm0, %v387_v1 }
  0x13   : > { %2597 = vmatmul.msk.f32.vlgmr.msra.gmra.mxu3 %vm408_vm0, %v2801_v7  ;;  %v2811_v9 = vld [vmem:[%s2773_s22 + $0x30] sm:$0xff]  ;;  %2595 = vmatmul.msk.f32.vlgmr.msra.gmra.mxu2 %vm408_vm0, %v2808_v8  ;;  %v394_v10 = vld [vmem:[%s2773_s22 + $0x38] sm:$0xff]  ;;  %v2822_v11 = vld [vmem:[%s2773_s22 + $0x68] sm:$0xff] }
  0x14   : > { %v2828_v12 = vld [vmem:[%s2773_s22 + $0x58] sm:$0xff]  ;;  %v395_v13 = vld [vmem:[%s2773_s22 + $0x40] sm:$0xff]  ;;  %v396_v14 = vld [vmem:[%s2773_s22 + $0x48] sm:$0xff] }
  0x15   : > { %v2839_v15 = vld [vmem:[%s2773_s22 + $0x70] sm:$0xff]  ;;  %v2851_v16 = vld [vmem:[%s2773_s22 + $0x78] sm:$0xff] }
  0x19   : > { %544 = vrot.lane.b32.xlu1 %v2788_v3, %s2693_s23  ;;  %540 = vrot.lane.b32.xlu0 %v388_v4, %s2693_s23 }
  0x1a   : > { %548 = vrot.lane.b32.xlu2 %v2795_v5, %s2693_s23  ;;  %2586 = vmatmul.msk.f32.gmra.mxu0 %vm408_vm0, %v388_v4 }
  0x1b   : > { %2598 = vmatmul.msk.f32.gmra.mxu3 %vm408_vm0, %v2822_v11  ;;  %2596 = vmatmul.msk.f32.gmra.mxu2 %vm408_vm0, %v2828_v12 }
  0x21   : > { %550 = vrot.lane.b32.xlu1 %v2811_v9, %s2693_s23  ;;  %558 = vrot.lane.b32.xlu0 %v2808_v8, %s2693_s23 }
  0x22   : > { %552 = vrot.lane.b32.xlu2 %v394_v10, %s2693_s23  ;;  %2587 = vmatmul.msk.f32.gmra.mxu0 %vm408_vm0, %v2776_v0 }
  0x23   : > { %2599 = vmatmul.msk.f32.gmra.mxu3 %vm408_vm0, %v2839_v15 }
  0x29   : > { %554 = vrot.lane.b32.xlu1 %v395_v13, %s2693_s23  ;;  %560 = vrot.lane.b32.xlu0 %v2828_v12, %s2693_s23 }
  0x2a   : > { %556 = vrot.lane.b32.xlu2 %v396_v14, %s2693_s23  ;;  %2588 = vmatmul.msk.f32.gmra.mxu0 %vm408_vm0, %v2788_v3 }
  0x2b   : > { %2600 = vmatmul.msk.f32.gmra.mxu3 %vm408_vm0, %v2851_v16 }
  0x31   : > { %564 = vrot.lane.b32.xlu1 %v2822_v11, %s2693_s23  ;;  %562 = vrot.lane.b32.xlu0 %v2801_v7, %s2693_s23 }
  0x32   : > { %566 = vrot.lane.b32.xlu2 %v2839_v15, %s2693_s23  ;;  %2589 = vmatmul.msk.f32.gmra.mxu0 %vm408_vm0, %v2783_v2 }
  0x39   : > { %568 = vrot.lane.b32.xlu0 %v2851_v16, %s2693_s23  ;;  %s2696_s23 = smov 16  }
  0x3a   : > { %2590 = vmatmul.msk.f32.gmra.mxu0 %vm408_vm0, %v2795_v5 }
  0x42   : > { %2591 = vmatmul.msk.f32.gmra.mxu0 %vm408_vm0, %v2811_v9 }
  0x4a   : > { %2592 = vmatmul.msk.f32.gmra.mxu0 %vm408_vm0, %v394_v10 }
  0x52   : > { %2593 = vmatmul.msk.f32.gmra.mxu0 %vm408_vm0, %v395_v13 }
  0x5a   : > { %2594 = vmatmul.msk.f32.gmra.mxu0 %vm408_vm0, %v396_v14 }
  0x6c   : > { %v547_v20 = vpop.permute.xlu2 %546 }
  0x6d   : > { %v1671_v32 = vadd.f32 %v547_v20, %v2783_v2 }
  0x74   : > { %v549_v29 = vpop.permute.xlu2 %548 }
  0x75   : > { %v1672_v33 = vadd.f32 %v549_v29, %v2795_v5 }
  0x77   : > { %v1685_v36 = vadd.f32 %v1672_v33, %v1671_v32 }
  0x7c   : > { %v553_v35 = vpop.permute.xlu2 %552 }
  0x7d   : > { %v1674_v39 = vadd.f32 %v553_v35, %v394_v10 }
  0x83   : > { %v543_v18 = vpop.permute.xlu1 %542  ;;  %v539_v19 = vpop.permute.xlu0 %538 }
  0x84   : > { %2601 = vmatmul.msk.f32.vlgmr.msra.gmra.mxu1 %vm408_vm0, %v539_v19  ;;  %v1667_v22 = vadd.f32 %v539_v19, %v387_v1  ;;  %v1669_v26 = vadd.f32 %v543_v18, %v2776_v0  ;;  %v557_v42 = vpop.permute.xlu2 %556 }
  0x85   : > { %v1676_v44 = vadd.f32 %v557_v42, %v396_v14 }
  0x8b   : > { %v541_v21 = vpop.permute.xlu0 %540  ;;  %v545_v24 = vpop.permute.xlu1 %544 }
  0x8c   : > { %v1668_v23 = vadd.f32 %v541_v21, %v388_v4  ;;  %2602 = vmatmul.msk.f32.gmra.mxu1 %vm408_vm0, %v541_v21  ;;  %v1670_v27 = vadd.f32 %v545_v24, %v2788_v3  ;;  %v567_v54 = vpop.permute.xlu2 %566  ;;  %v4805_v4 = vmov 0.0  }
  0x8d   : > { %v1681_v1 = vadd.f32 %v567_v54, %v2839_v15  ;;  %683 = vst.msk [vmem:[#allocation2] sm:$0xff] %vm408_vm0, %v4805_v4 }
  0x8e   : > { %v1683_v25 = vadd.f32 %v1668_v23, %v1667_v22  ;;  %v1684_v30 = vadd.f32 %v1670_v27, %v1669_v26  ;;  %687 = vst.msk [vmem:[#allocation2 + $0x110] sm:$0xff] %vm408_vm0, %v4805_v4 }
  0x8f   : > { %v474_v48 = vpop.f32.mrf.mxu0  ;;  %726 = vst.msk [vmem:[#allocation3] sm:$0xff] %vm408_vm0, %v4805_v4 }
  0x90   : > { %2617 = vmatmul.msk.f32.vlgmr.msrb.gmra.mxu2 %vm408_vm0, %v1683_v25  ;;  %v2901_v51 = vadd.f32 %v2895_v46, %v474_v48  ;;  %729 = vst.msk [vmem:[#allocation3 + $0x110] sm:$0xff] %vm408_vm0, %v4805_v4 }
  0x91   : > { %709 = vst.msk [vmem:[#allocation2 + $0x19] sm:$0x1] %vm689_vm1, %v4805_v4 }
  0x92   : > { %4872 = vst [vmem:[#allocation7_spill] sm:$0xff] %v2901_v51  ;;  %v4797_v53 = vmax.f32 %v2901_v51, 0.0 }
  0x93   : > { %v559_v28 = vpop.permute.xlu0 %558  ;;  %v551_v31 = vpop.permute.xlu1 %550  ;;  %685 = vst.msk [vmem:[#allocation2 + $0x8] sm:$0x3] %vm684_vm2, %v4805_v4 }
  0x94   : > { %2603 = vmatmul.msk.f32.gmra.mxu1 %vm408_vm0, %v543_v18  ;;  %2611 = vmatmul.msk.f32.vlgmr.msrb.gmra.mxu3 %vm408_vm0, %v559_v28  ;;  %v1673_v38 = vadd.f32 %v551_v31, %v2811_v9  ;;  %768 = vst.msk [vmem:[#allocation2 + $0x11] sm:$0xff] %vm408_vm0, %v4797_v53  ;;  %v1677_v56 = vadd.f32 %v559_v28, %v2808_v8 }
  0x95   : > { %708 = vst.msk [vmem:[#allocation2 + $0x9] sm:$0x1] %vm689_vm1, %v4805_v4 }
  0x96   : > { %v1686_v41 = vadd.f32 %v1674_v39, %v1673_v38  ;;  %v510_v47 = vpop.f32.mrf.mxu3  ;;  %v504_v5 = vpop.f32.mrf.mxu2  ;;  %710 = vst.msk [vmem:[#allocation2 + $0x29] sm:$0x1] %vm689_vm1, %v4805_v4 }
  0x97   : > { %v2898_v50 = vadd.f32 %v2895_v46, %v510_v47  ;;  %v477_v6 = vpop.f32.mrf.mxu0  ;;  %727 = vst.msk [vmem:[#allocation3 + $0x8] sm:$0x3] %vm684_vm2, %v4805_v4 }
  0x98   : > { %2618 = vmatmul.msk.f32.gmra.mxu2 %vm408_vm0, %v1684_v30  ;;  %v2956_v8 = vadd.f32 %v2895_v46, %v477_v6  ;;  %688 = vst.msk [vmem:[#allocation2 + $0x118] sm:$0x3] %vm684_vm2, %v4805_v4 }
  0x99   : > { %4871 = vst [vmem:[#allocation6_spill] sm:$0xff] %v2898_v50  ;;  %v4791_v52 = vmax.f32 %v2898_v50, 0.0 }
  0x9a   : > { %4875 = vst [vmem:[#allocation10_spill] sm:$0xff] %v2956_v8  ;;  %v3015_v25 = vld [vmem:[#allocation2 + $0x1] sm:$0xff] }
  0x9b   : > { %v561_v34 = vpop.permute.xlu0 %560  ;;  %v555_v37 = vpop.permute.xlu1 %554  ;;  %780 = vst.msk [vmem:[#allocation2 + $0xd1] sm:$0xff] %vm408_vm0, %v4791_v52 }
  0x9c   : > { %2604 = vmatmul.msk.f32.gmra.mxu1 %vm408_vm0, %v545_v24  ;;  %2612 = vmatmul.msk.f32.gmra.mxu3 %vm408_vm0, %v561_v34  ;;  %v1675_v43 = vadd.f32 %v555_v37, %v395_v13  ;;  %v1678_v55 = vadd.f32 %v561_v34, %v2828_v12  ;;  %v4798_v12 = vmax.f32 %v2956_v8, 0.0  ;;  %1762 = vst.msk [vmem:[#allocation4] sm:$0x3] %vm1761_vm3, %v4805_v4  ;;  %v801_v24 = vld [vmem:[%s4774_s3] sm:$0x7] }
  0x9d   : > { %1770 = vst.msk [vmem:[#allocation4 + $0xa] sm:$0x3] %vm1761_vm3, %v4805_v4  ;;  %v3021_v27 = vperm.slane %v801_v24, 0  ;;  %v3023_v28 = vperm.slane %v801_v24, 1  ;;  %v1347_v33 = vld [vmem:[#allocation2 + $0x2] sm:$0xff] }
  0x9e   : > { %v1687_v49 = vadd.f32 %v1676_v44, %v1675_v43  ;;  %v513_v57 = vpop.f32.mrf.mxu3  ;;  %v1688_v59 = vadd.f32 %v1678_v55, %v1677_v56  ;;  %769 = vst.msk [vmem:[#allocation2 + $0x21] sm:$0xff] %vm408_vm0, %v4798_v12  ;;  %v507_v14 = vpop.f32.mrf.mxu2  ;;  %v3017_v26 = vld [vmem:[#allocation3 + $0x1] sm:$0xff]  ;;  %v1459_v55 = vld [vmem:[#allocation2 + $0x12] sm:$0xff] }
  0x9f   : > { %v2917_v58 = vadd.f32 %v2895_v46, %v513_v57  ;;  %v480_v15 = vpop.f32.mrf.mxu0  ;;  %1763 = vst.msk [vmem:[#allocation4 + $0x10] sm:$0x3] %vm1761_vm3, %v4805_v4  ;;  %v1315_v30 = vmul.f32 %v3017_v26, %v3023_v28 }
  0xa0   : > { %2619 = vmatmul.msk.f32.gmra.mxu2 %vm408_vm0, %v1685_v36  ;;  %v2979_v17 = vadd.f32 %v2895_v46, %v480_v15  ;;  %1764 = vst.msk [vmem:[#allocation4 + $0x20] sm:$0x3] %vm1761_vm3, %v4805_v4 }
  0xa1   : > { %4873 = vst [vmem:[#allocation8_spill] sm:$0xff] %v2917_v58  ;;  %v4793_v60 = vmax.f32 %v2917_v58, 0.0 }
  0xa2   : > { %4878 = vst [vmem:[#allocation13_spill] sm:$0xff] %v2979_v17  ;;  %v4792_v21 = vmax.f32 %v2979_v17, 0.0 }
  0xa3   : > { %v563_v40 = vpop.permute.xlu0 %562  ;;  %v565_v45 = vpop.permute.xlu1 %564  ;;  %781 = vst.msk [vmem:[#allocation2 + $0xe1] sm:$0xff] %vm408_vm0, %v4793_v60 }
  0xa4   : > { %2605 = vmatmul.msk.f32.gmra.mxu1 %vm408_vm0, %v547_v20  ;;  %2613 = vmatmul.msk.f32.gmra.mxu3 %vm408_vm0, %v563_v40  ;;  %v1680_v61 = vadd.f32 %v565_v45, %v2822_v11  ;;  %v1679_v62 = vadd.f32 %v563_v40, %v2801_v7  ;;  %v2953_v7 = vadd.f32 %v2895_v46, %v504_v5 }
  0xa5   : > { %770 = vst.msk [vmem:[#allocation2 + $0x31] sm:$0xff] %vm408_vm0, %v4792_v21 }
  0xa6   : > { %v1689_v0 = vadd.f32 %v1680_v61, %v1679_v62  ;;  %4874 = vst [vmem:[#allocation9_spill] sm:$0xff] %v2953_v7  ;;  %v516_v9 = vpop.f32.mrf.mxu3  ;;  %v4784_v11 = vmax.f32 %v2953_v7, 0.0  ;;  %v803_v62 = vld [vmem:[%s4774_s3 + $0x8] sm:$0x7] }
  0xa7   : > { %v2959_v10 = vadd.f32 %v2895_v46, %v516_v9  ;;  %v483_v23 = vpop.f32.mrf.mxu0  ;;  %1765 = vst.msk [vmem:[#allocation4 + $0x30] sm:$0x3] %vm1761_vm3, %v4805_v4  ;;  %v3110_v5 = vperm.slane %v803_v62, 0 }
  0xa8   : > { %2620 = vmatmul.msk.f32.gmra.mxu2 %vm408_vm0, %v1686_v41  ;;  %778 = vst.msk [vmem:[#allocation2 + $0xb1] sm:$0xff] %vm408_vm0, %v4784_v11  ;;  %v3045_v36 = vadd.f32 %v2895_v46, %v483_v23 }
  0xa9   : > { %4876 = vst [vmem:[#allocation11_spill] sm:$0xff] %v2959_v10  ;;  %v4786_v13 = vmax.f32 %v2959_v10, 0.0 }
  0xaa   : > { %1766 = vst.msk [vmem:[#allocation4 + $0x40] sm:$0x3] %vm1761_vm3, %v4805_v4  ;;  %v4789_v44 = vmax.f32 %v3045_v36, 0.0 }
  0xab   : > { %v569_v63 = vpop.permute.xlu0 %568  ;;  %782 = vst.msk [vmem:[#allocation2 + $0xf1] sm:$0xff] %vm408_vm0, %v4786_v13 }
  0xac   : > { %2606 = vmatmul.msk.f32.gmra.mxu1 %vm408_vm0, %v549_v29  ;;  %2614 = vmatmul.msk.f32.gmra.mxu3 %vm408_vm0, %v565_v45  ;;  %v1682_v2 = vadd.f32 %v569_v63, %v2851_v16  ;;  %v2976_v16 = vadd.f32 %v2895_v46, %v507_v14  ;;  %1767 = vst.msk [vmem:[#allocation4 + $0x50] sm:$0x3] %vm1761_vm3, %v4805_v4 }
  0xad   : > { %1768 = vst.msk [vmem:[#allocation4 + $0x60] sm:$0x3] %vm1761_vm3, %v4805_v4  ;;  %v1283_v29 = vmul.f32 %v3015_v25, %v3021_v27 }
  0xae   : > { %v1690_v3 = vadd.f32 %v1682_v2, %v1681_v1  ;;  %4877 = vst [vmem:[#allocation12_spill] sm:$0xff] %v2976_v16  ;;  %v519_v18 = vpop.f32.mrf.mxu3  ;;  %v4788_v20 = vmax.f32 %v2976_v16, 0.0  ;;  %v3103_v2 = vld [vmem:[#allocation2 + $0x21] sm:$0xff] }
  0xaf   : > { %v2982_v19 = vadd.f32 %v2895_v46, %v519_v18  ;;  %1769 = vst.msk [vmem:[#allocation4 + $0x70] sm:$0x3] %vm1761_vm3, %v4805_v4  ;;  %v486_v32 = vpop.f32.mrf.mxu0  ;;  %v1331_v40 = vadd.f32 %v1315_v30, %v1283_v29  ;;  %v1507_v18 = vmul.f32 %v3103_v2, %v3110_v5  ;;  %v865_v51 = vld [vmem:[#allocation2 + $0xb1] sm:$0xff] }
  0xb0   : > { %2621 = vmatmul.msk.f32.gmra.mxu2 %vm408_vm0, %v1687_v49  ;;  %779 = vst.msk [vmem:[#allocation2 + $0xc1] sm:$0xff] %vm408_vm0, %v4788_v20  ;;  %v3054_v39 = vadd.f32 %v2895_v46, %v486_v32  ;;  %v3123_v32 = vperm.slane %v803_v62, 2 }
  0xb1   : > { %4879 = vst [vmem:[#allocation14_spill] sm:$0xff] %v2982_v19  ;;  %v4785_v22 = vmax.f32 %v2982_v19, 0.0 }
  0xb2   : > { %1771 = vst.msk [vmem:[#allocation4 + $0x1a] sm:$0x3] %vm1761_vm3, %v4805_v4  ;;  %v4790_v45 = vmax.f32 %v3054_v39, 0.0 }
  0xb3   : > { %783 = vst.msk [vmem:[#allocation2 + $0x101] sm:$0xff] %vm408_vm0, %v4785_v22 }
  0xb4   : > { %2607 = vmatmul.msk.f32.gmra.mxu1 %vm408_vm0, %v551_v31  ;;  %2615 = vmatmul.msk.f32.gmra.mxu3 %vm408_vm0, %v567_v54  ;;  %1772 = vst.msk [vmem:[#allocation4 + $0x2a] sm:$0x3] %vm1761_vm3, %v4805_v4 }
  0xb5   : > { %1773 = vst.msk [vmem:[#allocation4 + $0x3a] sm:$0x3] %vm1761_vm3, %v4805_v4 }
  0xb6   : > { %1774 = vst.msk [vmem:[#allocation4 + $0x4a] sm:$0x3] %vm1761_vm3, %v4805_v4 }
  0xb7   : > { %1775 = vst.msk [vmem:[#allocation4 + $0x5a] sm:$0x3] %vm1761_vm3, %v4805_v4 }
  0xb8   : > { %2622 = vmatmul.msk.f32.gmra.mxu2 %vm408_vm0, %v1688_v59  ;;  %4881 = vst [vmem:[#allocation16_spill] sm:$0xff] %v3045_v36 }
  0xb9   : > { %1776 = vst.msk [vmem:[#allocation4 + $0x6a] sm:$0x3] %vm1761_vm3, %v4805_v4 }
  0xba   : > { %4882 = vst [vmem:[#allocation17_spill] sm:$0xff] %v3054_v39 }
  0xbb   : > { %1777 = vst.msk [vmem:[#allocation4 + $0x7a] sm:$0x3] %vm1761_vm3, %v4805_v4 }
  0xbc   : > { %2608 = vmatmul.msk.f32.gmra.mxu1 %vm408_vm0, %v553_v35  ;;  %2616 = vmatmul.msk.f32.gmra.mxu3 %vm408_vm0, %v569_v63  ;;  %v3040_v35 = vperm.slane %v801_v24, 2  ;;  %1925 = vst.msk [vmem:[#allocation5] sm:$0xff] %vm1778_vm4, %v4805_v4  ;;  %v3117_v24 = vld [vmem:[#allocation2 + $0x22] sm:$0xff] }
  0xbd   : > { %1926 = vst.msk [vmem:[#allocation5 + $0x8] sm:$0xff] %vm1778_vm4, %v4805_v4 }
  0xbe   : > { %v1363_v41 = vmul.f32 %v1347_v33, %v3040_v35  ;;  %1928 = vst.msk [vmem:[#allocation5 + $0x50] sm:$0xff] %vm1778_vm4, %v4805_v4 }
  0xbf   : > { %1929 = vst.msk [vmem:[#allocation5 + $0x58] sm:$0xff] %vm1778_vm4, %v4805_v4 }
  0xc0   : > { %2623 = vmatmul.msk.f32.gmra.mxu2 %vm408_vm0, %v1689_v0  ;;  %v1379_v47 = vadd.f32 %v1363_v41, %v1331_v40  ;;  %771 = vst.msk [vmem:[#allocation2 + $0x41] sm:$0xff] %vm408_vm0, %v4789_v44  ;;  %v1587_v41 = vmul.f32 %v3117_v24, %v3123_v32 }
  0xc1   : > { %772 = vst.msk [vmem:[#allocation2 + $0x51] sm:$0xff] %vm408_vm0, %v4790_v45 }
  0xc2   : > { %711 = vst.msk [vmem:[#allocation2 + $0x39] sm:$0x1] %vm689_vm1, %v4805_v4 }
  0xc3   : > { %712 = vst.msk [vmem:[#allocation2 + $0x49] sm:$0x1] %vm689_vm1, %v4805_v4 }
  0xc4   : > { %2609 = vmatmul.msk.f32.gmra.mxu1 %vm408_vm0, %v555_v37  ;;  %v802_v37 = vld [vmem:[%s4774_s3 + $0x4] sm:$0x7]  ;;  %713 = vst.msk [vmem:[#allocation2 + $0x59] sm:$0x1] %vm689_vm1, %v4805_v4 }
  0xc5   : > { %v3064_v43 = vperm.slane %v802_v37, 0  ;;  %v3088_v57 = vperm.slane %v802_v37, 1  ;;  %v3090_v59 = vperm.slane %v802_v37, 2  ;;  %714 = vst.msk [vmem:[#allocation2 + $0x69] sm:$0x1] %vm689_vm1, %v4805_v4 }
  0xc6   : > { %715 = vst.msk [vmem:[#allocation2 + $0x79] sm:$0x1] %vm689_vm1, %v4805_v4 }
  0xc7   : > { %v1475_v1 = vmul.f32 %v1459_v55, %v3090_v59  ;;  %716 = vst.msk [vmem:[#allocation2 + $0x89] sm:$0x1] %vm689_vm1, %v4805_v4  ;;  %v1476_v53 = vmul.f32 %v3117_v24, %v3090_v59 }
  0xc8   : > { %2624 = vmatmul.msk.f32.gmra.mxu2 %vm408_vm0, %v1690_v3  ;;  %v3108_v3 = vld [vmem:[%s4777_s6] ss:$0 sm:$0xff]  ;;  %717 = vst.msk [vmem:[#allocation2 + $0x99] sm:$0x1] %vm689_vm1, %v4805_v4 }
  0xc9   : > { %718 = vst.msk [vmem:[#allocation2 + $0xa9] sm:$0x1] %vm689_vm1, %v4805_v4 }
  0xca   : > { %719 = vst.msk [vmem:[#allocation2 + $0xb9] sm:$0x1] %vm689_vm1, %v4805_v4 }
  0xcb   : > { %720 = vst.msk [vmem:[#allocation2 + $0xc9] sm:$0x1] %vm689_vm1, %v4805_v4 }
  0xcc   : > { %2610 = vmatmul.msk.f32.gmra.mxu1 %vm408_vm0, %v557_v42  ;;  %v3059_v42 = vld [vmem:[#allocation2 + $0x11] sm:$0xff]  ;;  %721 = vst.msk [vmem:[#allocation2 + $0xd9] sm:$0x1] %vm689_vm1, %v4805_v4 }
  0xcd   : > { %v1395_v48 = vmul.f32 %v3059_v42, %v3064_v43  ;;  %v3269_v10 = vmul.f32 %v3088_v57, %v3059_v42  ;;  %722 = vst.msk [vmem:[#allocation2 + $0xe9] sm:$0x1] %vm689_vm1, %v4805_v4 }
  0xce   : > { %723 = vst.msk [vmem:[#allocation2 + $0xf9] sm:$0x1] %vm689_vm1, %v4805_v4 }
  0xcf   : > { %v1411_v61 = vadd.f32 %v1395_v48, %v1379_v47  ;;  %v1787_v48 = vld [vmem:[%s4778_s7] sm:$0x1f]  ;;  %724 = vst.msk [vmem:[#allocation2 + $0x109] sm:$0x1] %vm689_vm1, %v4805_v4 }
  0xd0   : > { %v3182_v20 = vperm.slane %v1787_v48, 3  ;;  %v3185_v21 = vperm.slane %v1787_v48, 4 }
  0xd2   : > { %4891 = vst [vmem:[#allocation26_spill] sm:$0xff] %v3182_v20 }
  0xd3   : > { %4892 = vst [vmem:[#allocation27_spill] sm:$0xff] %v3185_v21 }
 0x101   : > { %v619_v31 = vpop.f32.mrf.mxu1 }
 0x102   : > { %v3036_v34 = vadd.f32 %v2895_v46, %v619_v31  ;;  %v3121_v31 = vperm.slane %v803_v62, 1 }
 0x104   : > { %4880 = vst [vmem:[#allocation15_spill] sm:$0xff] %v3036_v34  ;;  %v4799_v38 = vmax.f32 %v3036_v34, 0.0 }
 0x106   : > { %785 = vst.msk [vmem:[#allocation3 + $0x11] sm:$0xff] %vm408_vm0, %v4799_v38 }
 0x109   : > { %v622_v49 = vpop.f32.mrf.mxu1 }
 0x10a   : > { %v3077_v54 = vadd.f32 %v2895_v46, %v622_v49 }
 0x10c   : > { %4883 = vst [vmem:[#allocation18_spill] sm:$0xff] %v3077_v54  ;;  %v4795_v56 = vmax.f32 %v3077_v54, 0.0 }
 0x10d   : > { %v3095_v63 = vld [vmem:[#allocation3 + $0x11] sm:$0xff] }
 0x10e   : > { %786 = vst.msk [vmem:[#allocation3 + $0x21] sm:$0xff] %vm408_vm0, %v4795_v56  ;;  %v1427_v0 = vmul.f32 %v3095_v63, %v3088_v57  ;;  %v3243_v56 = vld [vmem:[%s4779_s8] ss:$0 sm:$0xff] }
 0x10f   : > { %4897 = vst [vmem:[#allocation32_spill] sm:$0xff] %v3243_v56 }
 0x110   : > { %v1443_v6 = vadd.f32 %v1427_v0, %v1411_v61  ;;  %v3144_v61 = vld [vmem:[%s4775_s4] ss:$0 sm:$0xff] }
 0x111   : > { %v625_v9 = vpop.f32.mrf.mxu1 }
 0x112   : > { %v3113_v14 = vadd.f32 %v2895_v46, %v625_v9  ;;  %v1491_v15 = vadd.f32 %v1475_v1, %v1443_v6 }
 0x113   : > { %v1737_v23 = vpop.f32.mrf.mxu2 }
 0x114   : > { %4884 = vst [vmem:[#allocation19_spill] sm:$0xff] %v3113_v14  ;;  %v4787_v29 = vmax.f32 %v3113_v14, 0.0  ;;  %v1738_v30 = vadd.f32 %v3108_v3, %v1737_v23  ;;  %v1523_v37 = vadd.f32 %v1507_v18, %v1491_v15  ;;  %v3154_v15 = vperm.slane %v1787_v48, 0 }
 0x115   : > { %v3125_v33 = vld [vmem:[#allocation3 + $0x21] sm:$0xff]  ;;  %v3156_v18 = vperm.slane %v1787_v48, 1 }
 0x116   : > { %787 = vst.msk [vmem:[#allocation3 + $0x31] sm:$0xff] %vm408_vm0, %v4787_v29  ;;  %v1539_v40 = vmul.f32 %v3125_v33, %v3121_v31  ;;  %v3313_v4 = vmul.f32 %v3125_v33, %v3090_v59 }
 0x117   : > { %1779 = vst.msk [vmem:[#allocation4 + $0x2] sm:$0xff] %vm1778_vm4, %v1738_v30  ;;  %v649_v47 = vpop.f32.mrf.mxu3 }
 0x118   : > { %v3139_v49 = vadd.f32 %v2895_v46, %v649_v47  ;;  %v1555_v62 = vadd.f32 %v1539_v40, %v1523_v37  ;;  %4887 = vst [vmem:[#allocation22_spill] sm:$0xff] %v3154_v15  ;;  %v3168_v47 = vperm.slane %v1787_v48, 2 }
 0x119   : > { %v628_v0 = vpop.f32.mrf.mxu1  ;;  %4888 = vst [vmem:[#allocation23_spill] sm:$0xff] %v3156_v18 }
 0x11a   : > { %4885 = vst [vmem:[#allocation20_spill] sm:$0xff] %v3139_v49  ;;  %v4783_v1 = vmax.f32 %v3139_v49, 0.0  ;;  %v3150_v6 = vadd.f32 %v2895_v46, %v628_v0  ;;  %v1603_v9 = vadd.f32 %v1587_v41, %v1555_v62  ;;  %v1284_v41 = vmul.f32 %v3059_v42, %v3021_v27  ;;  %v3174_v0 = vld [vmem:[#allocation2 + $0xd1] sm:$0xff] }
 0x11b   : > { %v1740_v23 = vpop.f32.mrf.mxu2  ;;  %4889 = vst [vmem:[#allocation24_spill] sm:$0xff] %v3168_v47  ;;  %v1316_v62 = vmul.f32 %v3095_v63, %v3023_v28 }
 0x11c   : > { %4886 = vst [vmem:[#allocation21_spill] sm:$0xff] %v3150_v6  ;;  %v4794_v30 = vmax.f32 %v3150_v6, 0.0  ;;  %v1741_v37 = vadd.f32 %v3108_v3, %v1740_v23  ;;  %v1619_v40 = vadd.f32 %v3144_v61, %v1603_v9  ;;  %v1364_v23 = vmul.f32 %v1459_v55, %v3040_v35  ;;  %v3350_v6 = vld [vmem:[#allocation2 + $0x41] sm:$0xff] }
 0x11d   : > { %795 = vst.msk [vmem:[#allocation3 + $0xb1] sm:$0xff] %vm408_vm0, %v4783_v1  ;;  %v1332_v45 = vadd.f32 %v1316_v62, %v1284_v41  ;;  %v3207_v41 = vmul.f32 %v3121_v31, %v3174_v0  ;;  %v3222_v62 = vmul.f32 %v3023_v28, %v3015_v25  ;;  %v1317_v25 = vmul.f32 %v3125_v33, %v3023_v28 }
 0x11e   : > { %4890 = vst [vmem:[#allocation25_spill] sm:$0xff] %v3174_v0  ;;  %v1788_v1 = vld [vmem:[#allocation4] sm:$0xff]  ;;  %v1635_v9 = vmax.f32 %v1619_v40, 0.0 }
 0x11f   : > { %v1813_v11 = vld [vmem:[#allocation4 + $0x1] sm:$0xff]  ;;  %788 = vst.msk [vmem:[#allocation3 + $0x41] sm:$0xff] %vm408_vm0, %v4794_v30  ;;  %v1797_v13 = vmul.f32 %v3154_v15, %v1788_v1  ;;  %v652_v44 = vpop.f32.mrf.mxu3  ;;  %v1380_v48 = vadd.f32 %v1364_v23, %v1332_v45 }
 0x120   : > { %v1838_v22 = vld [vmem:[#allocation4 + $0x2] sm:$0xff]  ;;  %v1822_v29 = vmul.f32 %v3156_v18, %v1813_v11  ;;  %1780 = vst.msk [vmem:[#allocation4 + $0x12] sm:$0xff] %vm1778_vm4, %v1741_v37  ;;  %v3188_v60 = vadd.f32 %v2895_v46, %v652_v44  ;;  %2344 = vrot.lane.b32.xlu2 %v1635_v9, %s2695_s26  ;;  %v3195_v11 = vmul.f32 %v3174_v0, %v3110_v5 }
 0x121   : > { %v1863_v52 = vld [vmem:[#allocation4 + $0x3] sm:$0xff]  ;;  %v1847_v1 = vmul.f32 %v3168_v47, %v1838_v22  ;;  %v1396_v44 = vmul.f32 %v3103_v2, %v3064_v43  ;;  %4894 = vst [vmem:[#allocation29_spill] sm:$0xff] %v3207_v41  ;;  %v3215_v22 = vmul.f32 %v3174_v0, %v3088_v57  ;;  %v3226_v9 = vmul.f32 %v3040_v35, %v3017_v26  ;;  %v631_v36 = vpop.f32.mrf.mxu1 }
 0x122   : > { %4893 = vst [vmem:[#allocation28_spill] sm:$0xff] %v3188_v60  ;;  %v1830_v55 = vadd.f32 %v1822_v29, %v1797_v13  ;;  %v1888_v37 = vld [vmem:[#allocation4 + $0x4] sm:$0xff]  ;;  %v4796_v40 = vmax.f32 %v3188_v60, 0.0  ;;  %v3211_v13 = vmul.f32 %v3174_v0, %v3064_v43  ;;  %v1872_v29 = vmul.f32 %v3182_v20, %v1863_v52 }
 0x123   : > { %4895 = vst [vmem:[#allocation30_spill] sm:$0xff] %v3215_v22  ;;  %v3228_v23 = vld [vmem:[#allocation2 + $0xe1] sm:$0xff]  ;;  %v1428_v52 = vmul.f32 %v3125_v33, %v3088_v57  ;;  %v1897_v26 = vmul.f32 %v3185_v21, %v1888_v37  ;;  %v4903_v60 = vmov 0.0  }
 0x124   : > { %v1855_v45 = vadd.f32 %v1847_v1, %v1830_v55  ;;  %4896 = vst [vmem:[#allocation31_spill] sm:$0xff] %v3228_v23  ;;  %v1412_v55 = vadd.f32 %v1396_v44, %v1380_v48  ;;  %v1285_v1 = vmul.f32 %v3103_v2, %v3021_v27  ;;  %v3249_v48 = vmul.f32 %v3090_v59, %v3095_v63  ;;  %v914_v8 = vld [vmem:[#allocation3 + $0xb1] sm:$0xff] }
 0x125   : > { %796 = vst.msk [vmem:[#allocation3 + $0xc1] sm:$0xff] %vm408_vm0, %v4796_v40  ;;  %v3253_v44 = vmul.f32 %v3174_v0, %v3021_v27  ;;  %v3261_v38 = vmul.f32 %v3228_v23, %v3110_v5 }
 0x126   : > { %v1880_v30 = vadd.f32 %v1872_v29, %v1855_v45  ;;  %v1444_v37 = vadd.f32 %v1428_v52, %v1412_v55  ;;  %v1333_v12 = vadd.f32 %v1317_v25, %v1285_v1  ;;  %v3271_v55 = vld [vmem:[#allocation2 + $0x31] sm:$0xff]  ;;  %v3283_v25 = vmul.f32 %v3095_v63, %v3040_v35  ;;  %730 = vst.msk [vmem:[#allocation3 + $0x118] sm:$0x3] %vm684_vm2, %v4903_v60  ;;  %v3394_v22 = vld [vmem:[#allocation3 + $0x41] sm:$0xff] }
 0x127   : > { %4898 = vst [vmem:[#allocation33_spill] sm:$0xff] %v3253_v44  ;;  %v1789_v40 = vld [vmem:[#allocation4 + $0x10] sm:$0xff]  ;;  %v3299_v63 = vmul.f32 %v3123_v32, %v3125_v33  ;;  %v489_v44 = vpop.f32.mrf.mxu0 }
 0x128   : > { %v1814_v45 = vld [vmem:[#allocation4 + $0x11] sm:$0xff]  ;;  %4899 = vst [vmem:[#allocation34_spill] sm:$0xff] %v3261_v38  ;;  %v1905_v49 = vadd.f32 %v1897_v26, %v1880_v30  ;;  %v1798_v7 = vmul.f32 %v3154_v15, %v1789_v40  ;;  %v1492_v1 = vadd.f32 %v1476_v53, %v1444_v37  ;;  %v1508_v30 = vmul.f32 %v3271_v55, %v3110_v5  ;;  %v3434_v15 = vld [vmem:[#allocation2 + $0x42] sm:$0xff] }
 0x129   : > { %v1839_v29 = vld [vmem:[#allocation4 + $0x12] sm:$0xff]  ;;  %v1823_v19 = vmul.f32 %v3156_v18, %v1814_v45  ;;  %4900 = vst [vmem:[#allocation35_spill] sm:$0xff] %v3271_v55  ;;  %v3279_v40 = vmul.f32 %v3059_v42, %v3023_v28  ;;  %v1365_v53 = vmul.f32 %v3117_v24, %v3040_v35  ;;  %v3295_v42 = vmul.f32 %v3121_v31, %v3103_v2 }
 0x12a   : > { %v1864_v52 = vld [vmem:[#allocation4 + $0x13] sm:$0xff]  ;;  %v1917_v26 = vadd.f32 %v3243_v56, %v1905_v49  ;;  %v1848_v14 = vmul.f32 %v3168_v47, %v1839_v29  ;;  %v1524_v39 = vadd.f32 %v1508_v30, %v1492_v1  ;;  %731 = vst.msk [vmem:[#allocation3] sm:$0x1] %vm689_vm1, %v4903_v60  ;;  %v3330_v1 = vmul.f32 %v3103_v2, %v3088_v57 }
 0x12b   : > { %v1831_v45 = vadd.f32 %v1823_v19, %v1798_v7  ;;  %v1889_v37 = vld [vmem:[#allocation4 + $0x14] sm:$0xff]  ;;  %v1397_v7 = vmul.f32 %v3271_v55, %v3064_v43  ;;  %v3305_v19 = vmul.f32 %v3121_v31, %v3228_v23  ;;  %v1873_v49 = vmul.f32 %v3182_v20, %v1864_v52  ;;  %732 = vst.msk [vmem:[#allocation3 + $0x10] sm:$0x1] %vm689_vm1, %v4903_v60 }
 0x12c   : > { %1931 = vst.msk [vmem:[#allocation5 + $0x10] sm:$0xff] %vm1778_vm4, %v1917_v26  ;;  %v3309_v29 = vld [vmem:[#allocation3 + $0x31] sm:$0xff]  ;;  %v1381_v16 = vadd.f32 %v1365_v53, %v1333_v12  ;;  %v3323_v52 = vmul.f32 %v3103_v2, %v3023_v28  ;;  %v3334_v30 = vmul.f32 %v3125_v33, %v3040_v35  ;;  %v1743_v53 = vpop.f32.mrf.mxu2  ;;  %v3348_v33 = vadd.f32 %v2895_v46, %v631_v36 }
 0x12d   : > { %4901 = vst [vmem:[#allocation36_spill] sm:$0xff] %v3305_v19  ;;  %v1856_v24 = vadd.f32 %v1848_v14, %v1831_v45  ;;  %v1540_v50 = vmul.f32 %v3309_v29, %v3121_v31  ;;  %v1429_v14 = vmul.f32 %v3309_v29, %v3088_v57  ;;  %v1898_v45 = vmul.f32 %v3185_v21, %v1889_v37  ;;  %v1572_v12 = vld [vmem:[#allocation2 + $0x32] sm:$0xff]  ;;  %v655_v21 = vpop.f32.mrf.mxu3 }
 0x12e   : > { %4902 = vst [vmem:[#allocation37_spill] sm:$0xff] %v3309_v29  ;;  %v3341_v37 = vmul.f32 %v3123_v32, %v3309_v29  ;;  %v1413_v58 = vadd.f32 %v1397_v7, %v1381_v16  ;;  %v3357_v54 = vmul.f32 %v3309_v29, %v3090_v59  ;;  %v3362_v16 = vadd.f32 %v3108_v3, %v1743_v53  ;;  %v1358_v19 = vld [vmem:[#allocation2 + $0xb2] sm:$0xff] }
 0x12f   : > { %v1881_v26 = vadd.f32 %v1873_v49, %v1856_v24  ;;  %v1556_v17 = vadd.f32 %v1540_v50, %v1524_v39  ;;  %v1588_v24 = vmul.f32 %v1572_v12, %v3123_v32  ;;  %v3343_v49 = vld [vmem:[#allocation2 + $0xd2] sm:$0xff]  ;;  %733 = vst.msk [vmem:[#allocation3 + $0x20] sm:$0x1] %vm689_vm1, %v4903_v60  ;;  %v1477_v50 = vmul.f32 %v1572_v12, %v3090_v59  ;;  %v3353_v39 = vld [vmem:[#allocation2 + $0xe2] sm:$0xff] }
 0x130   : > { %4904 = vst [vmem:[#allocation38_spill] sm:$0xff] %v3343_v49  ;;  %v3366_v36 = vmul.f32 %v3121_v31, %v3271_v55  ;;  %v3373_v34 = vmul.f32 %v3343_v49, %v3123_v32  ;;  %v1509_v53 = vmul.f32 %v3350_v6, %v3110_v5  ;;  %v3392_v38 = vmul.f32 %v3023_v28, %v865_v51 }
 0x131   : > { %v1906_v2 = vadd.f32 %v1898_v45, %v1881_v26  ;;  %4905 = vst [vmem:[#allocation39_spill] sm:$0xff] %v3348_v33  ;;  %v1604_v7 = vadd.f32 %v1588_v24, %v1556_v17  ;;  %v1445_v26 = vadd.f32 %v1429_v14, %v1413_v58  ;;  %v3379_v17 = vmul.f32 %v3343_v49, %v3090_v59 }
 0x132   : > { %4906 = vst [vmem:[#allocation40_spill] sm:$0xff] %v3350_v6  ;;  %v1294_v14 = vmul.f32 %v865_v51, %v3021_v27  ;;  %v1326_v24 = vmul.f32 %v914_v8, %v3023_v28  ;;  %v1374_v51 = vmul.f32 %v1358_v19, %v3040_v35  ;;  %v1541_v20 = vmul.f32 %v3394_v22, %v3121_v31 }
 0x133   : > { %4907 = vst [vmem:[#allocation41_spill] sm:$0xff] %v3353_v39  ;;  %v1918_v45 = vadd.f32 %v3243_v56, %v1906_v2  ;;  %v1620_v58 = vadd.f32 %v3144_v61, %v1604_v7  ;;  %v3388_v2 = vmul.f32 %v3353_v39, %v3123_v32  ;;  %v3398_v7 = vmul.f32 %v3271_v55, %v3088_v57 }
 0x134   : > { %734 = vst.msk [vmem:[#allocation3 + $0x30] sm:$0x1] %vm689_vm1, %v4903_v60  ;;  %v3402_v56 = vmul.f32 %v3271_v55, %v3021_v27  ;;  %v1342_v41 = vadd.f32 %v1326_v24, %v1294_v14  ;;  %v3417_v47 = vmul.f32 %v3309_v29, %v3023_v28  ;;  %v3428_v14 = vadd.f32 %v2895_v46, %v489_v44  ;;  %v634_v44 = vpop.f32.mrf.mxu1  ;;  %v492_v55 = vpop.f32.mrf.mxu0 }
 0x135   : > { %4908 = vst [vmem:[#allocation42_spill] sm:$0xff] %v3362_v16  ;;  %v3441_v0 = vadd.f32 %v2895_v46, %v655_v21 }
 0x136   : > { %735 = vst.msk [vmem:[#allocation3 + $0x40] sm:$0x1] %vm689_vm1, %v4903_v60  ;;  %v3425_v19 = vld [vmem:[#allocation3 + $0x20] sm:$0xff]  ;;  %v1390_v29 = vadd.f32 %v1374_v51, %v1342_v41  ;;  %v1746_v51 = vpop.f32.mrf.mxu2 }
 0x137   : > { %4909 = vst [vmem:[#allocation43_spill] sm:$0xff] %v3373_v34  ;;  %v3408_v34 = vmul.f32 %v3040_v35, %v914_v8 }
 0x138   : > { %4910 = vst [vmem:[#allocation44_spill] sm:$0xff] %v3379_v17  ;;  %v1493_v17 = vadd.f32 %v1477_v50, %v1445_v26  ;;  %v952_v26 = vld [vmem:[#allocation3 + $0x10] sm:$0xff] }
 0x139   : > { %736 = vst.msk [vmem:[#allocation3 + $0x50] sm:$0x1] %vm689_vm1, %v4903_v60  ;;  %v823_v24 = vmul.f32 %v952_v26, %v3021_v27  ;;  %v969_v8 = vmul.f32 %v3064_v43, %v952_v26 }
 0x13a   : > { %4911 = vst [vmem:[#allocation45_spill] sm:$0xff] %v3388_v2  ;;  %v1636_v2 = vmax.f32 %v1620_v58, 0.0  ;;  %v3420_v58 = vmul.f32 %v1572_v12, %v3040_v35  ;;  %v1525_v18 = vadd.f32 %v1509_v53, %v1493_v17  ;;  %v970_v17 = vmul.f32 %v3425_v19, %v3064_v43 }
 0x13b   : > { %1932 = vst.msk [vmem:[#allocation5 + $0x18] sm:$0xff] %vm1778_vm4, %v1918_v45  ;;  %v805_v45 = vld [vmem:[#allocation3] sm:$0xff]  ;;  %v888_v53 = vadd.f32 %v3279_v40, %v823_v24  ;;  %v3458_v41 = vld [vmem:[#allocation3 + $0x30] sm:$0xff]  ;;  %v1589_v24 = vmul.f32 %v3434_v15, %v3123_v32 }
 0x13c   : > { %4912 = vst [vmem:[#allocation46_spill] sm:$0xff] %v3394_v22  ;;  %v822_v50 = vmul.f32 %v3021_v27, %v805_v45  ;;  %2346 = vrot.lane.b32.xlu0 %v1636_v2, %s2695_s26  ;;  %v3432_v45 = vld [vmem:[#allocation2 + $0xc1] sm:$0xff]  ;;  %v3446_v2 = vadd.f32 %v2895_v46, %v634_v44  ;;  %v1557_v26 = vadd.f32 %v1541_v20, %v1525_v18 }
 0x13d   : > { %737 = vst.msk [vmem:[#allocation3 + $0x60] sm:$0x1] %vm689_vm1, %v4903_v60  ;;  %v1406_v40 = vmul.f32 %v3432_v45, %v3064_v43  ;;  %v1117_v44 = vmul.f32 %v3110_v5, %v3425_v19 }
 0x13e   : > { %738 = vst.msk [vmem:[#allocation3 + $0x70] sm:$0x1] %vm689_vm1, %v4903_v60  ;;  %v887_v12 = vadd.f32 %v3222_v62, %v822_v50  ;;  %v3453_v62 = vmul.f32 %v3123_v32, %v3394_v22  ;;  %v3460_v50 = vld [vmem:[#allocation3 + $0xc1] sm:$0xff]  ;;  %v1605_v23 = vadd.f32 %v1589_v24, %v1557_v26  ;;  %v1295_v26 = vmul.f32 %v3432_v45, %v3021_v27 }
 0x13f   : > { %739 = vst.msk [vmem:[#allocation3 + $0x80] sm:$0x1] %vm689_vm1, %v4903_v60  ;;  %v1438_v16 = vmul.f32 %v3460_v50, %v3088_v57  ;;  %v1422_v39 = vadd.f32 %v1406_v40, %v1390_v29  ;;  %v3487_v29 = vadd.f32 %v2895_v46, %v492_v55 }
 0x140   : > { %4913 = vst [vmem:[#allocation47_spill] sm:$0xff] %v3428_v14  ;;  %v936_v21 = vadd.f32 %v3226_v9, %v887_v12  ;;  %v937_v12 = vadd.f32 %v3283_v25, %v888_v53  ;;  %v1118_v25 = vmul.f32 %v3110_v5, %v3458_v41 }
 0x141   : > { %740 = vst.msk [vmem:[#allocation3 + $0x90] sm:$0x1] %vm689_vm1, %v4903_v60  ;;  %v1454_v40 = vadd.f32 %v1438_v16, %v1422_v39  ;;  %v3506_v39 = vadd.f32 %v3108_v3, %v1746_v51  ;;  %v637_v16 = vpop.f32.mrf.mxu1  ;;  %v1749_v51 = vpop.f32.mrf.mxu2 }
 0x142   : > { %4914 = vst [vmem:[#allocation48_spill] sm:$0xff] %v3441_v0  ;;  %v985_v20 = vadd.f32 %v969_v8, %v936_v21  ;;  %v986_v14 = vadd.f32 %v970_v17, %v937_v12  ;;  %v658_v21 = vpop.f32.mrf.mxu3  ;;  %v3498_v12 = vadd.f32 %v3144_v61, %v1605_v23  ;;  %v824_v0 = vmul.f32 %v3425_v19, %v3021_v27 }
 0x143   : > { %741 = vst.msk [vmem:[#allocation3 + $0xa0] sm:$0x1] %vm689_vm1, %v4903_v60  ;;  %v3495_v24 = vadd.f32 %v2895_v46, %v658_v21 }
 0x144   : > { %4915 = vst [vmem:[#allocation49_spill] sm:$0xff] %v3446_v2  ;;  %v1034_v8 = vadd.f32 %v3269_v10, %v985_v20  ;;  %v1035_v17 = vadd.f32 %v3330_v1, %v986_v14  ;;  %v1327_v10 = vmul.f32 %v3460_v50, %v3023_v28  ;;  %v1029_v1 = vmul.f32 %v3088_v57, %v3432_v45 }
 0x145   : > { %4916 = vst [vmem:[#allocation50_spill] sm:$0xff] %v3453_v62  ;;  %v1470_v62 = vld [vmem:[#allocation2 + $0xc2] sm:$0xff]  ;;  %v3512_v14 = vmul.f32 %v3090_v59, %v3460_v50  ;;  %v3516_v20 = vadd.f32 %v2895_v46, %v637_v16 }
 0x146   : > { %742 = vst.msk [vmem:[#allocation3 + $0xb0] sm:$0x1] %vm689_vm1, %v4903_v60  ;;  %v1486_v53 = vmul.f32 %v1470_v62, %v3090_v59  ;;  %v1083_v55 = vadd.f32 %v3249_v48, %v1034_v8  ;;  %v1084_v23 = vadd.f32 %v3313_v4, %v1035_v17  ;;  %v1375_v48 = vmul.f32 %v1470_v62, %v3040_v35 }
 0x147   : > { %743 = vst.msk [vmem:[#allocation3 + $0xc0] sm:$0x1] %vm689_vm1, %v4903_v60  ;;  %v1343_v2 = vadd.f32 %v1327_v10, %v1295_v26  ;;  %v971_v10 = vmul.f32 %v3458_v41, %v3064_v43  ;;  %v1070_v4 = vmul.f32 %v3394_v22, %v3090_v59 }
 0x148   : > { %744 = vst.msk [vmem:[#allocation3 + $0xd0] sm:$0x1] %vm689_vm1, %v4903_v60  ;;  %v1502_v21 = vadd.f32 %v1486_v53, %v1454_v40  ;;  %v1133_v8 = vadd.f32 %v1117_v44, %v1083_v55  ;;  %v495_v40 = vpop.f32.mrf.mxu0 }
 0x149   : > { %745 = vst.msk [vmem:[#allocation3 + $0xe0] sm:$0x1] %vm689_vm1, %v4903_v60 }
 0x14a   : > { %746 = vst.msk [vmem:[#allocation3 + $0xf0] sm:$0x1] %vm689_vm1, %v4903_v60  ;;  %v1183_v53 = vadd.f32 %v3295_v42, %v1133_v8  ;;  %v661_v42 = vpop.f32.mrf.mxu3  ;;  %v883_v8 = vmul.f32 %v3432_v45, %v3023_v28 }
 0x14b   : > { %4917 = vst [vmem:[#allocation51_spill] sm:$0xff] %v3487_v29 }
 0x14c   : > { %747 = vst.msk [vmem:[#allocation3 + $0x100] sm:$0x1] %vm689_vm1, %v4903_v60  ;;  %v1232_v55 = vadd.f32 %v3299_v63, %v1183_v53  ;;  %v1752_v53 = vpop.f32.mrf.mxu2 }
 0x14d   : > { %4918 = vst [vmem:[#allocation52_spill] sm:$0xff] %v3495_v24  ;;  %v816_v9 = vld [vmem:[#allocation3 + $0xb0] sm:$0xff] }
 0x14e   : > { %748 = vst.msk [vmem:[#allocation3 + $0x110] sm:$0x1] %vm689_vm1, %v4903_v60  ;;  %v833_v18 = vmul.f32 %v3021_v27, %v816_v9  ;;  %v1134_v60 = vadd.f32 %v1118_v25, %v1084_v23  ;;  %v889_v9 = vadd.f32 %v3323_v52, %v824_v0  ;;  %v3532_v25 = vadd.f32 %v3195_v11, %v1502_v21  ;;  %v3539_v23 = vld [vmem:[#allocation3 + $0x40] sm:$0xff] }
 0x14f   : > { %4919 = vst [vmem:[#allocation53_spill] sm:$0xff] %v3506_v39  ;;  %v963_v39 = vld [vmem:[#allocation3 + $0xc0] sm:$0xff]  ;;  %v3543_v0 = vadd.f32 %v3108_v3, %v1749_v51  ;;  %v3546_v11 = vadd.f32 %v2895_v46, %v495_v40  ;;  %v3549_v52 = vadd.f32 %v2895_v46, %v661_v42  ;;  %v1251_v63 = vadd.f32 %v3144_v61, %v1232_v55  ;;  %v4942_v55 = vld [vmem:[#allocation47_spill] sm:$0xff] }
 0x150   : > { %4920 = vst [vmem:[#allocation54_spill] sm:$0xff] %v3516_v20  ;;  %v898_v62 = vadd.f32 %v3392_v38, %v833_v18  ;;  %v980_v44 = vmul.f32 %v3064_v43, %v963_v39  ;;  %v1184_v26 = vadd.f32 %v3366_v36, %v1134_v60  ;;  %v1391_v38 = vadd.f32 %v1375_v48, %v1343_v2  ;;  %v640_v36 = vpop.f32.mrf.mxu1  ;;  %v498_v45 = vpop.f32.mrf.mxu0 }
 0x151   : > { %v938_v18 = vadd.f32 %v3334_v30, %v889_v9  ;;  %4921 = vst [vmem:[#allocation55_spill] sm:$0xff] %v3539_v23  ;;  %v834_v30 = vmul.f32 %v963_v39, %v3021_v27  ;;  %v1119_v48 = vmul.f32 %v3110_v5, %v3539_v23  ;;  %v1267_v51 = vmax.f32 %v1251_v63, 0.0 }
 0x152   : > { %v947_v16 = vadd.f32 %v3408_v34, %v898_v62  ;;  %v1233_v60 = vadd.f32 %v3341_v37, %v1184_v26  ;;  %4922 = vst [vmem:[#allocation56_spill] sm:$0xff] %v3546_v11  ;;  %v3555_v37 = vadd.f32 %v2895_v46, %v640_v36  ;;  %v3562_v62 = vadd.f32 %v3211_v13, %v1391_v38 }
 0x153   : > { %4923 = vst [vmem:[#allocation57_spill] sm:$0xff] %v3549_v52  ;;  %v987_v2 = vadd.f32 %v971_v10, %v938_v18  ;;  %v1169_v26 = vmul.f32 %v3121_v31, %v3350_v6  ;;  %v899_v10 = vadd.f32 %v883_v8, %v834_v30  ;;  %2248 = vrot.lane.b32.xlu1 %v1267_v51, %s2695_s26  ;;  %v3583_v18 = vld [vmem:[#allocation2 + $0x51] sm:$0xff]  ;;  %v4943_v9 = vmax.f32 %v4942_v55, 0.0 }
 0x154   : > { %v996_v34 = vadd.f32 %v980_v44, %v947_v16  ;;  %v1252_v21 = vadd.f32 %v3144_v61, %v1233_v60  ;;  %4924 = vst [vmem:[#allocation58_spill] sm:$0xff] %v3555_v37  ;;  %v932_v13 = vmul.f32 %v3460_v50, %v3040_v35  ;;  %v3578_v16 = vadd.f32 %v3108_v3, %v1752_v53  ;;  %v3587_v60 = vld [vmem:[#allocation2 + $0x52] sm:$0xff]  ;;  %v664_v50 = vpop.f32.mrf.mxu3 }
 0x155   : > { %v1036_v44 = vadd.f32 %v3398_v7, %v987_v2  ;;  %v1334_v7 = vadd.f32 %v3417_v47, %v3402_v56  ;;  %v3581_v38 = vadd.f32 %v2895_v46, %v498_v45  ;;  %4926 = vst [vmem:[#allocation60_spill] sm:$0xff] %v3583_v18  ;;  %v1430_v36 = vmul.f32 %v3394_v22, %v3088_v57  ;;  %v3609_v53 = vld [vmem:[#allocation2 + $0xf1] sm:$0xff] }
 0x156   : > { %v1045_v40 = vadd.f32 %v1029_v1, %v996_v34  ;;  %v1268_v39 = vmax.f32 %v1252_v21, 0.0  ;;  %4927 = vst [vmem:[#allocation61_spill] sm:$0xff] %v3587_v60  ;;  %v3597_v2 = vadd.f32 %v2895_v46, %v664_v50  ;;  %v3599_v30 = vadd.f32 %v932_v13, %v899_v10  ;;  %v4935_v50 = vld [vmem:[#allocation50_spill] sm:$0xff]  ;;  %v4941_v34 = vld [vmem:[#allocation37_spill] sm:$0xff] }
 0x157   : > { %v1085_v42 = vadd.f32 %v3357_v54, %v1036_v44  ;;  %4925 = vst [vmem:[#allocation59_spill] sm:$0xff] %v3581_v38  ;;  %v1398_v54 = vmul.f32 %v3350_v6, %v3064_v43  ;;  %v1382_v63 = vadd.f32 %v3420_v58, %v1334_v7  ;;  %v1478_v21 = vmul.f32 %v3434_v15, %v3090_v59 }
 0x158   : > { %2250 = vrot.lane.b32.xlu2 %v1268_v39, %s2695_s26  ;;  %v3590_v56 = vadd.f32 %v3512_v14, %v1045_v40  ;;  %4928 = vst [vmem:[#allocation62_spill] sm:$0xff] %v3597_v2  ;;  %v643_v8 = vpop.f32.mrf.mxu1  ;;  %v3607_v58 = vmul.f32 %v3587_v60, %v3123_v32  ;;  %v3611_v40 = vld [vmem:[#allocation2 + $0xf2] sm:$0xff]  ;;  %v4931_v44 = vmax.f32 %v3348_v33, 0.0  ;;  %v4932_v10 = vmov %v3343_v49 }
 0x159   : > { %v1135_v47 = vadd.f32 %v1119_v48, %v1085_v42  ;;  %v1414_v14 = vadd.f32 %v1398_v54, %v1382_v63  ;;  %v1510_v48 = vmul.f32 %v3583_v18, %v3110_v5  ;;  %4929 = vst [vmem:[#allocation63_spill] sm:$0xff] %v3609_v53  ;;  %v3622_v45 = vmul.f32 %v4932_v10, %v3040_v35  ;;  %v4933_v42 = vld [vmem:[#allocation31_spill] sm:$0xff]  ;;  %v1755_v54 = vpop.f32.mrf.mxu2 }
 0x15a   : > { %4930 = vst [vmem:[#allocation64_spill] sm:$0xff] %v3611_v40  ;;  %v3626_v13 = vmul.f32 %v4933_v42, %v3064_v43  ;;  %v4934_v7 = vmov 0.0   ;;  %v3640_v10 = vmul.f32 %v3609_v53, %v3110_v5  ;;  %v923_v1 = vmul.f32 %v4941_v34, %v3040_v35 }
 0x15b   : > { %v1185_v51 = vadd.f32 %v1169_v26, %v1135_v47  ;;  %789 = vst.msk [vmem:[#allocation3 + $0x51] sm:$0xff] %vm408_vm0, %v4931_v44  ;;  %v3618_v26 = vadd.f32 %v2895_v46, %v643_v8  ;;  %v1446_v63 = vadd.f32 %v1430_v36, %v1414_v14  ;;  %v4936_v44 = vld [vmem:[#allocation41_spill] sm:$0xff]  ;;  %v825_v46 = vmul.f32 %v3458_v41, %v3021_v27  ;;  %v4940_v14 = vld [vmem:[#allocation42_spill] sm:$0xff]  ;;  %v501_v41 = vpop.f32.mrf.mxu0 }
 0x15c   : > { %725 = vst.msk [vmem:[#allocation2 + $0x119] sm:$0x1] %vm689_vm1, %v4934_v7  ;;  %v3633_v17 = vmul.f32 %v4936_v44, %v3090_v59  ;;  %v3644_v7 = vmul.f32 %v3611_v40, %v3123_v32  ;;  %v972_v19 = vmul.f32 %v3539_v23, %v3064_v43  ;;  %v3685_v33 = vmul.f32 %v4933_v42, %v3088_v57 }
 0x15d   : > { %v1234_v47 = vadd.f32 %v4935_v50, %v1185_v51  ;;  %4937 = vst [vmem:[#allocation38_spill] sm:$0xff] %v3640_v10  ;;  %v4939_v51 = vld [vmem:[#allocation35_spill] sm:$0xff]  ;;  %v3651_v50 = vadd.f32 %v3108_v3, %v1755_v54  ;;  %v1494_v39 = vadd.f32 %v1478_v21, %v1446_v63  ;;  %v1021_v21 = vmul.f32 %v3350_v6, %v3088_v57 }
 0x15e   : > { %4938 = vst [vmem:[#allocation31_spill] sm:$0xff] %v3644_v7  ;;  %v874_v36 = vmul.f32 %v4939_v51, %v3023_v28  ;;  %v2681_v51 = vld [vmem:[%s4773_s2] ss:$0 sm:$0xff]  ;;  %v4959_v7 = vmax.f32 %v3495_v24, 0.0 }
 0x15f   : > { %1781 = vst.msk [vmem:[#allocation4 + $0x22] sm:$0xff] %vm1778_vm4, %v4940_v14  ;;  %v3654_v8 = vadd.f32 %v3144_v61, %v1234_v47  ;;  %v3664_v14 = vadd.f32 %v2681_v51, %v501_v41  ;;  %v4944_v47 = vld [vmem:[#allocation48_spill] sm:$0xff]  ;;  %v4946_v41 = vld [vmem:[#allocation25_spill] sm:$0xff] }
 0x160   : > { %773 = vst.msk [vmem:[#allocation2 + $0x61] sm:$0xff] %vm408_vm0, %v4943_v9  ;;  %v890_v54 = vadd.f32 %v874_v36, %v825_v46  ;;  %v4945_v63 = vmax.f32 %v4944_v47, 0.0  ;;  %v1526_v9 = vadd.f32 %v1510_v48, %v1494_v39  ;;  %v3678_v49 = vmul.f32 %v4946_v41, %v3023_v28  ;;  %v4947_v46 = vld [vmem:[#allocation49_spill] sm:$0xff]  ;;  %v646_v34 = vpop.f32.mrf.mxu1 }
 0x161   : > { %v4948_v36 = vmax.f32 %v4947_v46, 0.0  ;;  %4949 = vst [vmem:[#allocation50_spill] sm:$0xff] %v3685_v33  ;;  %v1319_v48 = vmul.f32 %v3394_v22, %v3023_v28  ;;  %v4950_v39 = vld [vmem:[#allocation53_spill] sm:$0xff]  ;;  %v3708_v47 = vmul.f32 %v4936_v44, %v3040_v35  ;;  %v3713_v41 = vadd.f32 %v2681_v51, %v646_v34  ;;  %v1758_v44 = vpop.f32.mrf.mxu2 }
 0x162   : > { %797 = vst.msk [vmem:[#allocation3 + $0xd1] sm:$0xff] %vm408_vm0, %v4945_v63  ;;  %v939_v55 = vadd.f32 %v923_v1, %v890_v54  ;;  %v1287_v63 = vmul.f32 %v3350_v6, %v3021_v27  ;;  %v3694_v46 = vld [vmem:[#allocation3 + $0x51] sm:$0xff]  ;;  %v3698_v1 = vmul.f32 %v3121_v31, %v3609_v53  ;;  %v3700_v54 = vld [vmem:[#allocation2 + $0x101] sm:$0xff] }
 0x163   : > { %790 = vst.msk [vmem:[#allocation3 + $0x61] sm:$0xff] %vm408_vm0, %v4948_v36  ;;  %v3704_v36 = vmul.f32 %v4933_v42, %v3021_v27  ;;  %v1542_v22 = vmul.f32 %v3694_v46, %v3121_v31  ;;  %v3717_v6 = vld [vmem:[#allocation3 + $0x50] sm:$0xff]  ;;  %v3721_v42 = vmul.f32 %v3609_v53, %v3064_v43  ;;  %v3732_v51 = vmul.f32 %v3123_v32, %v3694_v46 }
 0x164   : > { %1782 = vst.msk [vmem:[#allocation4 + $0x32] sm:$0xff] %vm1778_vm4, %v4950_v39  ;;  %v4956_v39 = vmax.f32 %v3487_v29, 0.0 }
 0x165   : > { %4951 = vst [vmem:[#allocation41_spill] sm:$0xff] %v3694_v46  ;;  %v1558_v53 = vadd.f32 %v1542_v22, %v1526_v9 }
 0x166   : > { %4952 = vst [vmem:[#allocation35_spill] sm:$0xff] %v3698_v1  ;;  %v988_v1 = vadd.f32 %v972_v19, %v939_v55  ;;  %v3734_v19 = vadd.f32 %v1319_v48, %v1287_v63  ;;  %v3738_v55 = vmul.f32 %v3611_v40, %v3090_v59  ;;  %v1790_v34 = vld [vmem:[#allocation4 + $0x20] sm:$0xff]  ;;  %v3749_v63 = vmul.f32 %v3700_v54, %v3110_v5 }
 0x167   : > { %4953 = vst [vmem:[#allocation42_spill] sm:$0xff] %v3700_v54  ;;  %v1815_v29 = vld [vmem:[#allocation4 + $0x21] sm:$0xff]  ;;  %v1606_v54 = vadd.f32 %v3607_v58, %v1558_v53  ;;  %v4972_v53 = vmax.f32 %v3555_v37, 0.0 }
 0x168   : > { %4954 = vst [vmem:[#allocation37_spill] sm:$0xff] %v3704_v36  ;;  %v1840_v24 = vld [vmem:[#allocation4 + $0x22] sm:$0xff] }
 0x169   : > { %4955 = vst [vmem:[#allocation25_spill] sm:$0xff] %v3708_v47  ;;  %v4965_v48 = vld [vmem:[#allocation22_spill] sm:$0xff] }
 0x16a   : > { %774 = vst.msk [vmem:[#allocation2 + $0x71] sm:$0xff] %vm408_vm0, %v4956_v39  ;;  %v3728_v39 = vmul.f32 %v3110_v5, %v3717_v6  ;;  %v1799_v40 = vmul.f32 %v4965_v48, %v1790_v34  ;;  %v1865_v23 = vld [vmem:[#allocation4 + $0x23] sm:$0xff]  ;;  %v3764_v34 = vld [vmem:[#allocation3 + $0xd1] sm:$0xff] }
 0x16b   : > { %4957 = vst [vmem:[#allocation53_spill] sm:$0xff] %v3717_v6  ;;  %v3745_v6 = vmul.f32 %v3434_v15, %v3040_v35  ;;  %v1890_v36 = vld [vmem:[#allocation4 + $0x24] sm:$0xff]  ;;  %v4967_v15 = vld [vmem:[#allocation24_spill] sm:$0xff] }
 0x16c   : > { %4958 = vst [vmem:[#allocation65_spill] sm:$0xff] %v3721_v42  ;;  %v1037_v42 = vadd.f32 %v1021_v21, %v988_v1  ;;  %v3757_v21 = vadd.f32 %v3108_v3, %v1758_v44  ;;  %v1849_v9 = vmul.f32 %v4967_v15, %v1840_v24  ;;  %v4968_v1 = vld [vmem:[#allocation26_spill] sm:$0xff]  ;;  %v4970_v44 = vld [vmem:[#allocation27_spill] sm:$0xff]  ;;  %v4971_v24 = vmax.f32 %v3549_v52, 0.0  ;;  %v1841_v58 = vld [vmem:[#allocation4 + $0x32] sm:$0xff] }
 0x16d   : > { %798 = vst.msk [vmem:[#allocation3 + $0xe1] sm:$0xff] %vm408_vm0, %v4959_v7  ;;  %v4962_v7 = vmax.f32 %v3516_v20, 0.0  ;;  %v4969_v20 = vmax.f32 %v3546_v11, 0.0  ;;  %v1899_v22 = vmul.f32 %v4970_v44, %v1890_v36  ;;  %v1791_v11 = vld [vmem:[#allocation4 + $0x30] sm:$0xff]  ;;  %v1850_v46 = vmul.f32 %v4967_v15, %v1841_v58 }
 0x16e   : > { %4960 = vst [vmem:[#allocation66_spill] sm:$0xff] %v3734_v19  ;;  %v1800_v33 = vmul.f32 %v4965_v48, %v1791_v11  ;;  %v1866_v10 = vld [vmem:[#allocation4 + $0x33] sm:$0xff] }
 0x16f   : > { %4961 = vst [vmem:[#allocation67_spill] sm:$0xff] %v3738_v55  ;;  %v4966_v55 = vld [vmem:[#allocation23_spill] sm:$0xff]  ;;  %v1891_v37 = vld [vmem:[#allocation4 + $0x34] sm:$0xff] }
 0x170   : > { %791 = vst.msk [vmem:[#allocation3 + $0x71] sm:$0xff] %vm408_vm0, %v4962_v7  ;;  %v1824_v47 = vmul.f32 %v4966_v55, %v1815_v29  ;;  %v1874_v7 = vmul.f32 %v4968_v1, %v1865_v23  ;;  %v3766_v29 = vld [vmem:[#allocation3 + $0xd0] sm:$0xff] }
 0x171   : > { %4963 = vst [vmem:[#allocation68_spill] sm:$0xff] %v3745_v6  ;;  %v1128_v23 = vmul.f32 %v3110_v5, %v3766_v29  ;;  %v981_v36 = vmul.f32 %v3766_v29, %v3064_v43  ;;  %v4974_v6 = vmax.f32 %v3597_v2, 0.0 }
 0x172   : > { %4964 = vst [vmem:[#allocation69_spill] sm:$0xff] %v3749_v63  ;;  %v1832_v3 = vadd.f32 %v1824_v47, %v1799_v40  ;;  %v1816_v63 = vld [vmem:[#allocation4 + $0x31] sm:$0xff]  ;;  %v1227_v40 = vmul.f32 %v3123_v32, %v3764_v34  ;;  %v1439_v47 = vmul.f32 %v3764_v34, %v3088_v57 }
 0x173   : > { %1783 = vst.msk [vmem:[#allocation4 + $0x42] sm:$0xff] %vm1778_vm4, %v3543_v0  ;;  %v3771_v0 = vmul.f32 %v3121_v31, %v3583_v18  ;;  %v1825_v60 = vmul.f32 %v4966_v55, %v1816_v63  ;;  %v4973_v18 = vmax.f32 %v3581_v38, 0.0  ;;  %v1144_v11 = vadd.f32 %v1128_v23, %v3590_v56  ;;  %v4975_v23 = vld [vmem:[#allocation43_spill] sm:$0xff]  ;;  %v4976_v38 = vld [vmem:[#allocation29_spill] sm:$0xff] }
 0x174   : > { %775 = vst.msk [vmem:[#allocation2 + $0x81] sm:$0xff] %vm408_vm0, %v4969_v20  ;;  %v1550_v20 = vmul.f32 %v3764_v34, %v3121_v31  ;;  %v1857_v52 = vadd.f32 %v1849_v9, %v1832_v3  ;;  %v1900_v3 = vmul.f32 %v4970_v44, %v1891_v37  ;;  %v3814_v58 = vld [vmem:[#allocation3 + $0xe1] sm:$0xff]  ;;  %v1455_v37 = vadd.f32 %v1439_v47, %v3562_v62 }
 0x175   : > { %799 = vst.msk [vmem:[#allocation3 + $0xf1] sm:$0xff] %vm408_vm0, %v4971_v24  ;;  %v3790_v24 = vadd.f32 %v1070_v4, %v1037_v42  ;;  %v3807_v42 = vadd.f32 %v3144_v61, %v1606_v54  ;;  %v1833_v9 = vadd.f32 %v1825_v60, %v1800_v33  ;;  %v4977_v33 = vmax.f32 %v3618_v26, 0.0 }
 0x176   : > { %792 = vst.msk [vmem:[#allocation3 + $0x81] sm:$0xff] %vm408_vm0, %v4972_v53  ;;  %v3798_v53 = vmul.f32 %v3764_v34, %v3090_v59  ;;  %v1566_v4 = vadd.f32 %v1550_v20, %v3532_v25  ;;  %v1882_v63 = vadd.f32 %v1874_v7, %v1857_v52  ;;  %v1194_v52 = vadd.f32 %v4976_v38, %v1144_v11 }
 0x177   : > { %1784 = vst.msk [vmem:[#allocation4 + $0x52] sm:$0xff] %vm1778_vm4, %v3578_v16  ;;  %v1875_v16 = vmul.f32 %v4968_v1, %v1866_v10  ;;  %v997_v60 = vadd.f32 %v981_v36, %v3599_v30  ;;  %v1858_v10 = vadd.f32 %v1850_v46, %v1833_v9  ;;  %v4978_v11 = vmax.f32 %v3664_v14, 0.0  ;;  %v4979_v46 = vld [vmem:[#allocation32_spill] sm:$0xff] }
 0x178   : > { %776 = vst.msk [vmem:[#allocation2 + $0x91] sm:$0xff] %vm408_vm0, %v4973_v18  ;;  %v3816_v18 = vld [vmem:[#allocation3 + $0xe0] sm:$0xff]  ;;  %v1614_v54 = vadd.f32 %v4975_v23, %v1566_v4  ;;  %v1551_v62 = vmul.f32 %v3814_v58, %v3121_v31  ;;  %v4980_v9 = vmax.f32 %v3713_v41, 0.0 }
 0x179   : > { %800 = vst.msk [vmem:[#allocation3 + $0x101] sm:$0xff] %vm408_vm0, %v4974_v6  ;;  %v1907_v6 = vadd.f32 %v1899_v22, %v1882_v63  ;;  %v1129_v30 = vmul.f32 %v3110_v5, %v3816_v18  ;;  %v1883_v47 = vadd.f32 %v1875_v16, %v1858_v10 }
 0x17a   : > { %v1792_v25 = vld [vmem:[#allocation4 + $0x40] sm:$0xff]  ;;  %793 = vst.msk [vmem:[#allocation3 + $0x91] sm:$0xff] %vm408_vm0, %v4977_v33  ;;  %v1630_v4 = vadd.f32 %v3144_v61, %v1614_v54  ;;  %v4981_v33 = vld [vmem:[#allocation44_spill] sm:$0xff] }
 0x17b   : > { %v1817_v20 = vld [vmem:[#allocation4 + $0x41] sm:$0xff]  ;;  %v1801_v7 = vmul.f32 %v4965_v48, %v1792_v25  ;;  %1785 = vst.msk [vmem:[#allocation4 + $0x62] sm:$0xff] %vm1778_vm4, %v3651_v50  ;;  %v1919_v22 = vadd.f32 %v4979_v46, %v1907_v6  ;;  %v1243_v50 = vadd.f32 %v1227_v40, %v1194_v52 }
 0x17c   : > { %v1842_v56 = vld [vmem:[#allocation4 + $0x42] sm:$0xff]  ;;  %v1826_v2 = vmul.f32 %v4966_v55, %v1817_v20  ;;  %777 = vst.msk [vmem:[#allocation2 + $0xa1] sm:$0xff] %vm408_vm0, %v4978_v11  ;;  %v1646_v54 = vmax.f32 %v1630_v4, 0.0  ;;  %v1503_v11 = vadd.f32 %v4981_v33, %v1455_v37  ;;  %v1228_v37 = vmul.f32 %v3123_v32, %v3814_v58 }
 0x17d   : > { %v1867_v19 = vld [vmem:[#allocation4 + $0x43] sm:$0xff]  ;;  %v1851_v38 = vmul.f32 %v4967_v15, %v1842_v56  ;;  %794 = vst.msk [vmem:[#allocation3 + $0xa1] sm:$0xff] %vm408_vm0, %v4980_v9 }
 0x17e   : > { %v1834_v36 = vadd.f32 %v1826_v2, %v1801_v7  ;;  %v1892_v63 = vld [vmem:[#allocation4 + $0x44] sm:$0xff]  ;;  %v1876_v25 = vmul.f32 %v4968_v1, %v1867_v19  ;;  %v1793_v20 = vld [vmem:[#allocation4 + $0x50] sm:$0xff]  ;;  %1786 = vst.msk [vmem:[#allocation4 + $0x72] sm:$0xff] %vm1778_vm4, %v3757_v21  ;;  %v1908_v2 = vadd.f32 %v1900_v3, %v1883_v47  ;;  %2366 = vrot.lane.b32.xlu1 %v1646_v54, %s2695_s26 }
 0x17f   : > { %v1818_v56 = vld [vmem:[#allocation4 + $0x51] sm:$0xff]  ;;  %v4982_v6 = vld [vmem:[#allocation30_spill] sm:$0xff]  ;;  %1933 = vst.msk [vmem:[#allocation5 + $0x20] sm:$0xff] %vm1778_vm4, %v1919_v22  ;;  %v1802_v52 = vmul.f32 %v4965_v48, %v1793_v20  ;;  %v1901_v9 = vmul.f32 %v4970_v44, %v1892_v63  ;;  %v1262_v21 = vadd.f32 %v3144_v61, %v1243_v50 }
 0x180   : > { %v1843_v23 = vld [vmem:[#allocation4 + $0x52] sm:$0xff]  ;;  %v1046_v16 = vadd.f32 %v4982_v6, %v997_v60  ;;  %v1859_v40 = vadd.f32 %v1851_v38, %v1834_v36  ;;  %v1827_v10 = vmul.f32 %v4966_v55, %v1818_v56  ;;  %v1920_v3 = vadd.f32 %v4979_v46, %v1908_v2 }
 0x181   : > { %v1868_v19 = vld [vmem:[#allocation4 + $0x53] sm:$0xff]  ;;  %v1852_v4 = vmul.f32 %v4967_v15, %v1843_v23  ;;  %v1278_v36 = vmax.f32 %v1262_v21, 0.0  ;;  %v4983_v23 = vld [vmem:[#allocation34_spill] sm:$0xff] }
 0x182   : > { %v1893_v7 = vld [vmem:[#allocation4 + $0x54] sm:$0xff]  ;;  %v1884_v60 = vadd.f32 %v1876_v25, %v1859_v40  ;;  %v1835_v38 = vadd.f32 %v1827_v10, %v1802_v52  ;;  %v1877_v22 = vmul.f32 %v4968_v1, %v1868_v19  ;;  %v1794_v20 = vld [vmem:[#allocation4 + $0x60] sm:$0xff]  ;;  %v1535_v33 = vadd.f32 %v4983_v23, %v1503_v11  ;;  %1934 = vst.msk [vmem:[#allocation5 + $0x28] sm:$0xff] %vm1778_vm4, %v1920_v3 }
 0x183   : > { %v1902_v47 = vmul.f32 %v4970_v44, %v1893_v7  ;;  %v1819_v63 = vld [vmem:[#allocation4 + $0x61] sm:$0xff]  ;;  %v1095_v54 = vadd.f32 %v3798_v53, %v1046_v16  ;;  %v1803_v6 = vmul.f32 %v4965_v48, %v1794_v20  ;;  %2270 = vrot.lane.b32.xlu0 %v1278_v36, %s2695_s26  ;;  %v1328_v53 = vmul.f32 %v3764_v34, %v3023_v28 }
 0x184   : > { %v1844_v56 = vld [vmem:[#allocation4 + $0x62] sm:$0xff]  ;;  %v1909_v61 = vadd.f32 %v1901_v9, %v1884_v60  ;;  %v1860_v50 = vadd.f32 %v1852_v4, %v1835_v38  ;;  %v1828_v25 = vmul.f32 %v4966_v55, %v1819_v63  ;;  %v1567_v19 = vadd.f32 %v1551_v62, %v1535_v33  ;;  %v4984_v38 = vld [vmem:[#allocation45_spill] sm:$0xff] }
 0x185   : > { %v1869_v2 = vld [vmem:[#allocation4 + $0x63] sm:$0xff]  ;;  %v1853_v52 = vmul.f32 %v4967_v15, %v1844_v56  ;;  %v1795_v9 = vld [vmem:[#allocation4 + $0x70] sm:$0xff]  ;;  %v1145_v3 = vadd.f32 %v1129_v30, %v1095_v54  ;;  %v4985_v30 = vmax.f32 %v3498_v12, 0.0  ;;  %v1440_v12 = vmul.f32 %v3814_v58, %v3088_v57 }
 0x186   : > { %v1894_v40 = vld [vmem:[#allocation4 + $0x64] sm:$0xff]  ;;  %v1878_v10 = vmul.f32 %v4968_v1, %v1869_v2  ;;  %v1921_v11 = vadd.f32 %v4979_v46, %v1909_v61  ;;  %v1885_v16 = vadd.f32 %v1877_v22, %v1860_v50  ;;  %v1836_v7 = vadd.f32 %v1828_v25, %v1803_v6  ;;  %v1820_v4 = vld [vmem:[#allocation4 + $0x71] sm:$0xff] }
 0x187   : > { %v1845_v21 = vld [vmem:[#allocation4 + $0x72] sm:$0xff]  ;;  %v1903_v60 = vmul.f32 %v4970_v44, %v1894_v40  ;;  %v1615_v36 = vadd.f32 %v4984_v38, %v1567_v19  ;;  %v1804_v20 = vmul.f32 %v4965_v48, %v1795_v9  ;;  %v1829_v63 = vmul.f32 %v4966_v55, %v1820_v4  ;;  %2348 = vrot.lane.b32.xlu1 %v4985_v30, %s2695_s26  ;;  %v3883_v48 = vld [vmem:[%s4775_s4] ss:$0 sm:$0xff] }
 0x188   : > { %v1870_v62 = vld [vmem:[#allocation4 + $0x73] sm:$0xff]  ;;  %1935 = vst.msk [vmem:[#allocation5 + $0x30] sm:$0xff] %vm1778_vm4, %v1921_v11  ;;  %v1910_v23 = vadd.f32 %v1902_v47, %v1885_v16  ;;  %v1861_v33 = vadd.f32 %v1853_v52, %v1836_v7  ;;  %v1854_v22 = vmul.f32 %v4967_v15, %v1845_v21  ;;  %v1638_v4 = vmax.f32 %v3807_v42, 0.0 }
 0x189   : > { %v1895_v56 = vld [vmem:[#allocation4 + $0x74] sm:$0xff]  ;;  %v1879_v61 = vmul.f32 %v4968_v1, %v1870_v62  ;;  %v1631_v55 = vadd.f32 %v3883_v48, %v1615_v36  ;;  %v1837_v54 = vadd.f32 %v1829_v63, %v1804_v20  ;;  %v1080_v20 = vmul.f32 %v3814_v58, %v3090_v59 }
 0x18a   : > { %v4986_v50 = vld [vmem:[#allocation36_spill] sm:$0xff]  ;;  %v4987_v47 = vld [vmem:[#allocation33_spill] sm:$0xff]  ;;  %v1922_v15 = vadd.f32 %v4979_v46, %v1910_v23  ;;  %v1886_v2 = vadd.f32 %v1878_v10, %v1861_v33  ;;  %v1904_v1 = vmul.f32 %v4970_v44, %v1895_v56  ;;  %v835_v10 = vmul.f32 %v3766_v29, %v3021_v27  ;;  %v3929_v56 = vld [vmem:[#allocation3 + $0x61] sm:$0xff] }
 0x18b   : > { %v1195_v6 = vadd.f32 %v4986_v50, %v1145_v3  ;;  %v1344_v25 = vadd.f32 %v1328_v53, %v4987_v47  ;;  %v1647_v40 = vmax.f32 %v1631_v55, 0.0  ;;  %v1862_v52 = vadd.f32 %v1854_v22, %v1837_v54  ;;  %v3894_v7 = vld [vmem:[#allocation3 + $0xf1] sm:$0xff]  ;;  %v4989_v23 = vld [vmem:[#allocation66_spill] sm:$0xff] }
 0x18c   : > { %1936 = vst.msk [vmem:[#allocation5 + $0x38] sm:$0xff] %vm1778_vm4, %v1922_v15  ;;  %v1911_v16 = vadd.f32 %v1903_v60, %v1886_v2  ;;  %v1136_v53 = vadd.f32 %v3728_v39, %v3790_v24  ;;  %v933_v44 = vmul.f32 %v3764_v34, %v3040_v35  ;;  %v3909_v39 = vld [vmem:[#allocation3 + $0xf0] sm:$0xff]  ;;  %v900_v34 = vadd.f32 %v3678_v49, %v835_v10  ;;  %v4994_v15 = vld [vmem:[#allocation61_spill] sm:$0xff] }
 0x18d   : > { %v1244_v19 = vadd.f32 %v1228_v37, %v1195_v6  ;;  %v1392_v11 = vadd.f32 %v3622_v45, %v1344_v25  ;;  %2368 = vrot.lane.b32.xlu2 %v1647_v40, %s2695_s26  ;;  %v4988_v37 = vmax.f32 %v3654_v8, 0.0  ;;  %v1887_v45 = vadd.f32 %v1879_v61, %v1862_v52  ;;  %v4990_v33 = vld [vmem:[#allocation68_spill] sm:$0xff]  ;;  %v3940_v6 = vld [vmem:[#allocation2 + $0x62] sm:$0xff] }
 0x18e   : > { %v1923_v29 = vadd.f32 %v4979_v46, %v1911_v16  ;;  %v1186_v24 = vadd.f32 %v3771_v0, %v1136_v53  ;;  %v982_v3 = vmul.f32 %v3816_v18, %v3064_v43  ;;  %v1552_v36 = vmul.f32 %v3894_v7, %v3121_v31  ;;  %v3924_v0 = vld [vmem:[#allocation2 + $0x61] sm:$0xff]  ;;  %v4991_v22 = vld [vmem:[#allocation60_spill] sm:$0xff] }
 0x18f   : > { %2252 = vrot.lane.b32.xlu0 %v4988_v37, %s2695_s26  ;;  %v1263_v9 = vadd.f32 %v3883_v48, %v1244_v19  ;;  %v1424_v21 = vadd.f32 %v3626_v13, %v1392_v11  ;;  %v1912_v8 = vadd.f32 %v1904_v1, %v1887_v45  ;;  %v949_v42 = vadd.f32 %v933_v44, %v900_v34  ;;  %v4995_v52 = vld [vmem:[#allocation50_spill] sm:$0xff]  ;;  %v4997_v34 = vld [vmem:[#allocation55_spill] sm:$0xff] }
 0x190   : > { %1937 = vst.msk [vmem:[#allocation5 + $0x40] sm:$0xff] %vm1778_vm4, %v1923_v29  ;;  %v1235_v13 = vadd.f32 %v3732_v51, %v1186_v24  ;;  %v1130_v49 = vmul.f32 %v3110_v5, %v3909_v39  ;;  %v1383_v51 = vadd.f32 %v4990_v33, %v4989_v23  ;;  %v1399_v61 = vmul.f32 %v4991_v22, %v3064_v43  ;;  %v3955_v53 = vld [vmem:[#allocation2 + $0x102] sm:$0xff] }
 0x191   : > { %v1279_v60 = vmax.f32 %v1263_v9, 0.0  ;;  %v1456_v38 = vadd.f32 %v1440_v12, %v1424_v21  ;;  %v1924_v63 = vadd.f32 %v4979_v46, %v1912_v8  ;;  %v998_v55 = vadd.f32 %v982_v3, %v949_v42  ;;  %v4992_v46 = vld [vmem:[#allocation41_spill] sm:$0xff]  ;;  %v3948_v12 = vld [vmem:[#allocation3 + $0x101] sm:$0xff] }
 0x192   : > { %v1254_v30 = vadd.f32 %v3883_v48, %v1235_v13  ;;  %v1229_v54 = vmul.f32 %v3123_v32, %v3894_v7  ;;  %v1431_v50 = vmul.f32 %v4992_v46, %v3088_v57  ;;  %v1415_v25 = vadd.f32 %v1399_v61, %v1383_v51  ;;  %v4996_v21 = vld [vmem:[#allocation37_spill] sm:$0xff]  ;;  %v4998_v8 = vld [vmem:[#allocation31_spill] sm:$0xff]  ;;  %v3972_v42 = vld [vmem:[#allocation3 + $0x60] sm:$0xff] }
 0x193   : > { %2272 = vrot.lane.b32.xlu1 %v1279_v60, %s2695_s26  ;;  %v1504_v62 = vadd.f32 %v3633_v17, %v1456_v38  ;;  %1938 = vst.msk [vmem:[#allocation5 + $0x48] sm:$0xff] %vm1778_vm4, %v1924_v63  ;;  %v4993_v17 = vld [vmem:[#allocation38_spill] sm:$0xff]  ;;  %v1479_v2 = vmul.f32 %v4994_v15, %v3090_v59  ;;  %v1511_v1 = vmul.f32 %v3924_v0, %v3110_v5  ;;  %v5000_v63 = vld [vmem:[#allocation25_spill] sm:$0xff] }
 0x194   : > { %v1270_v40 = vmax.f32 %v1254_v30, 0.0  ;;  %v1047_v19 = vadd.f32 %v4995_v52, %v998_v55  ;;  %v1543_v11 = vmul.f32 %v3929_v56, %v3121_v31  ;;  %v1329_v16 = vmul.f32 %v3814_v58, %v3023_v28  ;;  %v5001_v23 = vld [vmem:[#allocation46_spill] sm:$0xff]  ;;  %v5002_v51 = vld [vmem:[#allocation53_spill] sm:$0xff] }
 0x195   : > { %v1536_v47 = vadd.f32 %v4993_v17, %v1504_v62  ;;  %2350 = vrot.lane.b32.xlu2 %v1638_v4, %s2695_s26  ;;  %v1447_v44 = vadd.f32 %v1431_v50, %v1415_v25  ;;  %v1591_v37 = vmul.f32 %v3940_v6, %v3123_v32  ;;  %v1441_v45 = vmul.f32 %v3894_v7, %v3088_v57 }
 0x196   : > { %v1096_v9 = vadd.f32 %v1080_v20, %v1047_v19  ;;  %v1345_v29 = vadd.f32 %v1329_v16, %v4996_v21  ;;  %v1553_v24 = vmul.f32 %v3948_v12, %v3121_v31  ;;  %v826_v3 = vmul.f32 %v4997_v34, %v3021_v27 }
 0x197   : > { %v1568_v10 = vadd.f32 %v1552_v36, %v1536_v47  ;;  %v1495_v4 = vadd.f32 %v1479_v2, %v1447_v44  ;;  %v1601_v38 = vmul.f32 %v3955_v53, %v3123_v32  ;;  %v4999_v36 = vld [vmem:[#allocation40_spill] sm:$0xff]  ;;  %v924_v33 = vmul.f32 %v5001_v23, %v3040_v35  ;;  %v5003_v47 = vld [vmem:[#allocation35_spill] sm:$0xff] }
 0x198   : > { %v875_v13 = vmul.f32 %v4999_v36, %v3023_v28  ;;  %v1146_v20 = vadd.f32 %v1130_v49, %v1096_v9  ;;  %v1393_v62 = vadd.f32 %v5000_v63, %v1345_v29  ;;  %v973_v61 = vmul.f32 %v5002_v51, %v3064_v43  ;;  %v5004_v49 = vld [vmem:[#allocation65_spill] sm:$0xff]  ;;  %v2683_v29 = vld [vmem:[#allocation2 + $0xe1] sm:$0xff] }
 0x199   : > { %v1616_v60 = vadd.f32 %v4998_v8, %v1568_v10  ;;  %v1527_v55 = vadd.f32 %v1511_v1, %v1495_v4  ;;  %v1022_v17 = vmul.f32 %v4991_v22, %v3088_v57  ;;  %v1071_v52 = vmul.f32 %v4992_v46, %v3090_v59  ;;  %v3999_v4 = vld [vmem:[#allocation3 + $0x100] sm:$0xff]  ;;  %v5006_v63 = vld [vmem:[#allocation63_spill] sm:$0xff] }
 0x19a   : > { %v891_v50 = vadd.f32 %v875_v13, %v826_v3  ;;  %v1196_v25 = vadd.f32 %v5003_v47, %v1146_v20  ;;  %v1425_v2 = vadd.f32 %v5004_v49, %v1393_v62  ;;  %v1121_v19 = vmul.f32 %v3110_v5, %v3972_v42 }
 0x19b   : > { %v1632_v30 = vadd.f32 %v3883_v48, %v1616_v60  ;;  %2254 = vrot.lane.b32.xlu1 %v1270_v40, %s2695_s26  ;;  %v1559_v10 = vadd.f32 %v1543_v11, %v1527_v55  ;;  %v1171_v1 = vmul.f32 %v3121_v31, %v3924_v0  ;;  %v836_v21 = vmul.f32 %v3816_v18, %v3021_v27 }
 0x19c   : > { %v940_v44 = vadd.f32 %v924_v33, %v891_v50  ;;  %v1245_v40 = vadd.f32 %v1229_v54, %v1196_v25  ;;  %v1457_v9 = vadd.f32 %v1441_v45, %v1425_v2  ;;  %v885_v34 = vmul.f32 %v2683_v29, %v3023_v28  ;;  %v5005_v45 = vld [vmem:[#allocation67_spill] sm:$0xff]  ;;  %v5007_v33 = vld [vmem:[#allocation69_spill] sm:$0xff]  ;;  %v5008_v25 = vld [vmem:[#allocation42_spill] sm:$0xff] }
 0x19d   : > { %v1648_v16 = vmax.f32 %v1632_v30, 0.0  ;;  %v1607_v3 = vadd.f32 %v1591_v37, %v1559_v10  ;;  %v1220_v60 = vmul.f32 %v3123_v32, %v3929_v56  ;;  %v934_v11 = vmul.f32 %v3814_v58, %v3040_v35  ;;  %v4018_v10 = vld [vmem:[#allocation2 + $0x71] sm:$0xff] }
 0x19e   : > { %v989_v8 = vadd.f32 %v973_v61, %v940_v44  ;;  %v1264_v54 = vadd.f32 %v3883_v48, %v1245_v40  ;;  %v1505_v36 = vadd.f32 %v5005_v45, %v1457_v9  ;;  %v901_v18 = vadd.f32 %v885_v34, %v836_v21  ;;  %v4020_v44 = vld [vmem:[#allocation3 + $0x71] sm:$0xff] }
 0x19f   : > { %2370 = vrot.lane.b32.xlu0 %v1648_v16, %s2695_s26  ;;  %v983_v13 = vmul.f32 %v3909_v39, %v3064_v43  ;;  %v1623_v20 = vadd.f32 %v3883_v48, %v1607_v3  ;;  %v1032_v62 = vmul.f32 %v5006_v63, %v3088_v57  ;;  %v1081_v23 = vmul.f32 %v3894_v7, %v3090_v59 }
 0x1a0   : > { %v1038_v37 = vadd.f32 %v1022_v17, %v989_v8  ;;  %v1280_v58 = vmax.f32 %v1264_v54, 0.0  ;;  %v1537_v61 = vadd.f32 %v5007_v33, %v1505_v36  ;;  %v950_v30 = vadd.f32 %v934_v11, %v901_v18  ;;  %v4034_v54 = vld [vmem:[#allocation2 + $0x72] sm:$0xff] }
 0x1a1   : > { %v1131_v55 = vmul.f32 %v3110_v5, %v3999_v4  ;;  %v1639_v50 = vmax.f32 %v1623_v20, 0.0  ;;  %v1181_v49 = vmul.f32 %v3121_v31, %v5008_v25  ;;  %v1288_v17 = vmul.f32 %v4991_v22, %v3021_v27  ;;  %v1165_v20 = vld [vmem:[#allocation2 + $0x111] sm:$0xff] }
 0x1a2   : > { %v1087_v47 = vadd.f32 %v1071_v52, %v1038_v37  ;;  %2274 = vrot.lane.b32.xlu2 %v1280_v58, %s2695_s26  ;;  %v1569_v2 = vadd.f32 %v1553_v24, %v1537_v61  ;;  %v999_v16 = vadd.f32 %v983_v13, %v950_v30  ;;  %v1320_v40 = vmul.f32 %v4992_v46, %v3023_v28  ;;  %v4048_v58 = vld [vmem:[#allocation3 + $0x111] sm:$0xff] }
 0x1a3   : > { %v1368_v52 = vmul.f32 %v4994_v15, %v3040_v35  ;;  %v1230_v21 = vmul.f32 %v3123_v32, %v3948_v12  ;;  %v1400_v29 = vmul.f32 %v3924_v0, %v3064_v43  ;;  %v1432_v24 = vmul.f32 %v3929_v56, %v3088_v57  ;;  %v5009_v33 = vld [vmem:[#allocation64_spill] sm:$0xff] }
 0x1a4   : > { %v1137_v9 = vadd.f32 %v1121_v19, %v1087_v47  ;;  %v1617_v34 = vadd.f32 %v1601_v38, %v1569_v2  ;;  %v1048_v3 = vadd.f32 %v1032_v62, %v999_v16  ;;  %v1336_v8 = vadd.f32 %v1320_v40, %v1288_v17  ;;  %v1586_v2 = vld [vmem:[#allocation2 + $0x112] sm:$0xff] }
 0x1a5   : > { %v1480_v11 = vmul.f32 %v3940_v6, %v3090_v59  ;;  %v1512_v19 = vmul.f32 %v4018_v10, %v3110_v5  ;;  %v1544_v45 = vmul.f32 %v4020_v44, %v3121_v31  ;;  %v1298_v36 = vmul.f32 %v5006_v63, %v3021_v27 }
 0x1a6   : > { %v1187_v15 = vadd.f32 %v1171_v1, %v1137_v9  ;;  %v1633_v38 = vadd.f32 %v3883_v48, %v1617_v34  ;;  %v1097_v18 = vadd.f32 %v1081_v23, %v1048_v3  ;;  %v1384_v13 = vadd.f32 %v1368_v52, %v1336_v8 }
 0x1a7   : > { %2352 = vrot.lane.b32.xlu0 %v1639_v50, %s2695_s26  ;;  %v1330_v37 = vmul.f32 %v3894_v7, %v3023_v28  ;;  %v1592_v1 = vmul.f32 %v4034_v54, %v3123_v32  ;;  %v1378_v61 = vmul.f32 %v5009_v33, %v3040_v35  ;;  %v1410_v30 = vmul.f32 %v5008_v25, %v3064_v43 }
 0x1a8   : > { %v1236_v62 = vadd.f32 %v1220_v60, %v1187_v15  ;;  %v1649_v50 = vmax.f32 %v1633_v38, 0.0  ;;  %v1147_v47 = vadd.f32 %v1131_v55, %v1097_v18  ;;  %v1416_v23 = vadd.f32 %v1400_v29, %v1384_v13 }
 0x1a9   : > { %v1346_v17 = vadd.f32 %v1330_v37, %v1298_v36  ;;  %v1442_v60 = vmul.f32 %v3948_v12, %v3088_v57  ;;  %v1490_v40 = vmul.f32 %v3955_v53, %v3090_v59  ;;  %v1522_v52 = vmul.f32 %v1165_v20, %v3110_v5  ;;  %v4068_v53 = vld [vmem:[#allocation3 + $0x70] sm:$0xff] }
 0x1aa   : > { %v1255_v16 = vadd.f32 %v3883_v48, %v1236_v62  ;;  %2372 = vrot.lane.b32.xlu1 %v1649_v50, %s2695_s26  ;;  %v1197_v9 = vadd.f32 %v1181_v49, %v1147_v47  ;;  %v1448_v34 = vadd.f32 %v1432_v24, %v1416_v23  ;;  %v1554_v55 = vmul.f32 %v4048_v58, %v3121_v31 }
 0x1ab   : > { %v1394_v3 = vadd.f32 %v1378_v61, %v1346_v17  ;;  %v1602_v8 = vmul.f32 %v1586_v2, %v3123_v32  ;;  %v827_v15 = vmul.f32 %v5002_v51, %v3021_v27  ;;  %v876_v36 = vmul.f32 %v4991_v22, %v3023_v28  ;;  %v1115_v2 = vld [vmem:[#allocation3 + $0x110] sm:$0xff] }
 0x1ac   : > { %v1271_v29 = vmax.f32 %v1255_v16, 0.0  ;;  %v1246_v38 = vadd.f32 %v1230_v21, %v1197_v9  ;;  %v1496_v18 = vadd.f32 %v1480_v11, %v1448_v34  ;;  %v925_v49 = vmul.f32 %v4992_v46, %v3040_v35 }
 0x1ad   : > { %v1426_v13 = vadd.f32 %v1410_v30, %v1394_v3  ;;  %v892_v24 = vadd.f32 %v876_v36, %v827_v15  ;;  %v974_v37 = vmul.f32 %v3972_v42, %v3064_v43  ;;  %v1023_v51 = vmul.f32 %v3924_v0, %v3088_v57 }
 0x1ae   : > { %2256 = vrot.lane.b32.xlu2 %v1271_v29, %s2695_s26  ;;  %v1072_v22 = vmul.f32 %v3929_v56, %v3090_v59  ;;  %v1265_v62 = vadd.f32 %v3883_v48, %v1246_v38  ;;  %v1528_v21 = vadd.f32 %v1512_v19, %v1496_v18  ;;  %v1122_v33 = vmul.f32 %v3110_v5, %v4068_v53  ;;  %v4108_v18 = vld [vmem:[#allocation2 + $0x81] sm:$0xff] }
 0x1af   : > { %v1458_v11 = vadd.f32 %v1442_v60, %v1426_v13  ;;  %v941_v46 = vadd.f32 %v925_v49, %v892_v24  ;;  %v1172_v61 = vmul.f32 %v3121_v31, %v4018_v10  ;;  %v837_v30 = vmul.f32 %v3909_v39, %v3021_v27  ;;  %v4110_v13 = vld [vmem:[#allocation3 + $0x81] sm:$0xff] }
 0x1b0   : > { %v886_v50 = vmul.f32 %v5006_v63, %v3023_v28  ;;  %v1281_v47 = vmax.f32 %v1265_v62, 0.0  ;;  %v1560_v23 = vadd.f32 %v1544_v45, %v1528_v21  ;;  %v935_v19 = vmul.f32 %v3894_v7, %v3040_v35  ;;  %v4120_v21 = vld [vmem:[#allocation2 + $0x82] sm:$0xff] }
 0x1b1   : > { %v1506_v17 = vadd.f32 %v1490_v40, %v1458_v11  ;;  %v990_v16 = vadd.f32 %v974_v37, %v941_v46  ;;  %v1221_v60 = vmul.f32 %v3123_v32, %v4020_v44  ;;  %v984_v34 = vmul.f32 %v3999_v4, %v3064_v43 }
 0x1b2   : > { %v902_v9 = vadd.f32 %v886_v50, %v837_v30  ;;  %2276 = vrot.lane.b32.xlu0 %v1281_v47, %s2695_s26  ;;  %v1608_v39 = vadd.f32 %v1592_v1, %v1560_v23  ;;  %v1033_v63 = vmul.f32 %v5008_v25, %v3088_v57  ;;  %v1082_v45 = vmul.f32 %v3948_v12, %v3090_v59  ;;  %v4128_v50 = vld [vmem:[#allocation2 + $0x91] sm:$0xff] }
 0x1b3   : > { %v1538_v3 = vadd.f32 %v1522_v52, %v1506_v17  ;;  %v1039_v7 = vadd.f32 %v1023_v51, %v990_v16  ;;  %v1132_v29 = vmul.f32 %v3110_v5, %v1115_v2  ;;  %v1182_v15 = vmul.f32 %v3121_v31, %v1165_v20  ;;  %v4136_v16 = vld [vmem:[#allocation3 + $0x91] sm:$0xff] }
 0x1b4   : > { %v951_v40 = vadd.f32 %v935_v19, %v902_v9  ;;  %v1624_v36 = vadd.f32 %v3883_v48, %v1608_v39  ;;  %v1289_v4 = vmul.f32 %v3924_v0, %v3021_v27  ;;  %v1321_v1 = vmul.f32 %v3929_v56, %v3023_v28 }
 0x1b5   : > { %v1570_v38 = vadd.f32 %v1554_v55, %v1538_v3  ;;  %v1088_v52 = vadd.f32 %v1072_v22, %v1039_v7  ;;  %v1231_v12 = vmul.f32 %v3123_v32, %v4048_v58  ;;  %v1369_v20 = vmul.f32 %v3940_v6, %v3040_v35 }
 0x1b6   : > { %v1000_v25 = vadd.f32 %v984_v34, %v951_v40  ;;  %v1640_v49 = vmax.f32 %v1624_v36, 0.0  ;;  %v1337_v24 = vadd.f32 %v1321_v1, %v1289_v4  ;;  %v1401_v37 = vmul.f32 %v4018_v10, %v3064_v43 }
 0x1b7   : > { %v1618_v55 = vadd.f32 %v1602_v8, %v1570_v38  ;;  %v1138_v51 = vadd.f32 %v1122_v33, %v1088_v52  ;;  %v1433_v22 = vmul.f32 %v4020_v44, %v3088_v57  ;;  %v1481_v58 = vmul.f32 %v4034_v54, %v3090_v59 }
 0x1b8   : > { %v1049_v62 = vadd.f32 %v1033_v63, %v1000_v25  ;;  %2354 = vrot.lane.b32.xlu1 %v1640_v49, %s2695_s26  ;;  %v1385_v11 = vadd.f32 %v1369_v20, %v1337_v24  ;;  %v1513_v8 = vmul.f32 %v4108_v18, %v3110_v5  ;;  %v1545_v33 = vmul.f32 %v4110_v13, %v3121_v31  ;;  %v4142_v63 = vld [vmem:[#allocation2 + $0x92] sm:$0xff]  ;;  %v1106_v20 = vld [vmem:[#allocation3 + $0x80] sm:$0xff] }
 0x1b9   : > { %v1634_v6 = vadd.f32 %v3883_v48, %v1618_v55  ;;  %v1188_v46 = vadd.f32 %v1172_v61, %v1138_v51  ;;  %v1290_v47 = vmul.f32 %v4018_v10, %v3021_v27  ;;  %v1322_v23 = vmul.f32 %v4020_v44, %v3023_v28 }
 0x1ba   : > { %v1098_v30 = vadd.f32 %v1082_v45, %v1049_v62  ;;  %v1417_v19 = vadd.f32 %v1401_v37, %v1385_v11  ;;  %v1593_v2 = vmul.f32 %v4120_v21, %v3123_v32  ;;  %v1370_v9 = vmul.f32 %v4034_v54, %v3040_v35 }
 0x1bb   : > { %v1650_v17 = vmax.f32 %v1634_v6, 0.0  ;;  %v1237_v61 = vadd.f32 %v1221_v60, %v1188_v46  ;;  %v1338_v39 = vadd.f32 %v1322_v23, %v1290_v47  ;;  %v1402_v3 = vmul.f32 %v4108_v18, %v3064_v43 }
 0x1bc   : > { %v1148_v34 = vadd.f32 %v1132_v29, %v1098_v30  ;;  %v1449_v45 = vadd.f32 %v1433_v22, %v1417_v19  ;;  %v1434_v7 = vmul.f32 %v4110_v13, %v3088_v57  ;;  %v1482_v40 = vmul.f32 %v4120_v21, %v3090_v59 }
 0x1bd   : > { %2374 = vrot.lane.b32.xlu2 %v1650_v17, %s2695_s26  ;;  %v1514_v54 = vmul.f32 %v4128_v50, %v3110_v5  ;;  %v1256_v60 = vadd.f32 %v3883_v48, %v1237_v61  ;;  %v1386_v36 = vadd.f32 %v1370_v9, %v1338_v39  ;;  %v1546_v38 = vmul.f32 %v4136_v16, %v3121_v31  ;;  %v4179_v17 = vld [vmem:[#allocation3 + $0x90] sm:$0xff] }
 0x1be   : > { %v1198_v29 = vadd.f32 %v1182_v15, %v1148_v34  ;;  %v1497_v4 = vadd.f32 %v1481_v58, %v1449_v45  ;;  %v1594_v1 = vmul.f32 %v4142_v63, %v3123_v32  ;;  %v828_v52 = vmul.f32 %v3972_v42, %v3021_v27 }
 0x1bf   : > { %v877_v25 = vmul.f32 %v3924_v0, %v3023_v28  ;;  %v1272_v49 = vmax.f32 %v1256_v60, 0.0  ;;  %v1418_v24 = vadd.f32 %v1402_v3, %v1386_v36  ;;  %v926_v15 = vmul.f32 %v3929_v56, %v3040_v35 }
 0x1c0   : > { %v1247_v55 = vadd.f32 %v1231_v12, %v1198_v29  ;;  %v1529_v37 = vadd.f32 %v1513_v8, %v1497_v4  ;;  %v975_v62 = vmul.f32 %v4068_v53, %v3064_v43  ;;  %v1024_v22 = vmul.f32 %v4018_v10, %v3088_v57  ;;  %v4197_v29 = vld [vmem:[#allocation3 + $0xa0] sm:$0xff] }
 0x1c1   : > { %v893_v51 = vadd.f32 %v877_v25, %v828_v52  ;;  %2258 = vrot.lane.b32.xlu0 %v1272_v49, %s2695_s26  ;;  %v1450_v0 = vadd.f32 %v1434_v7, %v1418_v24  ;;  %v1073_v12 = vmul.f32 %v4020_v44, %v3090_v59  ;;  %v1123_v58 = vmul.f32 %v3110_v5, %v1106_v20 }
 0x1c2   : > { %v1266_v42 = vadd.f32 %v3883_v48, %v1247_v55  ;;  %v1561_v6 = vadd.f32 %v1545_v33, %v1529_v37  ;;  %v1173_v11 = vmul.f32 %v3121_v31, %v4108_v18  ;;  %v829_v8 = vmul.f32 %v4068_v53, %v3021_v27 }
 0x1c3   : > { %v942_v56 = vadd.f32 %v926_v15, %v893_v51  ;;  %v1498_v30 = vadd.f32 %v1482_v40, %v1450_v0  ;;  %v1222_v47 = vmul.f32 %v3123_v32, %v4110_v13  ;;  %v878_v23 = vmul.f32 %v4018_v10, %v3023_v28 }
 0x1c4   : > { %v1282_v46 = vmax.f32 %v1266_v42, 0.0  ;;  %v1609_v19 = vadd.f32 %v1593_v2, %v1561_v6  ;;  %v927_v33 = vmul.f32 %v4020_v44, %v3040_v35  ;;  %v976_v61 = vmul.f32 %v1106_v20, %v3064_v43  ;;  %v1940_v6 = vld [vmem:[#allocation5] sm:$0xff] }
 0x1c5   : > { %v991_v9 = vadd.f32 %v975_v62, %v942_v56  ;;  %v1530_v53 = vadd.f32 %v1514_v54, %v1498_v30  ;;  %v894_v34 = vadd.f32 %v878_v23, %v829_v8  ;;  %v1025_v39 = vmul.f32 %v4108_v18, %v3088_v57  ;;  %v4215_v62 = vld [vmem:[#allocation2 + $0xa1] sm:$0xff]  ;;  %v4222_v56 = vld [vmem:[#allocation5 + $0x10] sm:$0xff] }
 0x1c6   : > { %2278 = vrot.lane.b32.xlu1 %v1282_v46, %s2695_s26  ;;  %v1074_v3 = vmul.f32 %v4110_v13, %v3090_v59  ;;  %v1625_v10 = vadd.f32 %v3883_v48, %v1609_v19  ;;  %v1124_v2 = vmul.f32 %v3110_v5, %v4179_v17  ;;  %v1174_v44 = vmul.f32 %v3121_v31, %v4128_v50  ;;  %v4230_v19 = vld [vmem:[#allocation5 + $0x18] sm:$0xff] }
 0x1c7   : > { %v1040_v45 = vadd.f32 %v1024_v22, %v991_v9  ;;  %v1562_v7 = vadd.f32 %v1546_v38, %v1530_v53  ;;  %v943_v40 = vadd.f32 %v927_v33, %v894_v34  ;;  %v830_v54 = vmul.f32 %v1106_v20, %v3021_v27  ;;  %v1939_v20 = vld [vmem:[%s4780_s9] sm:$0x1f] }
 0x1c8   : > { %v879_v60 = vmul.f32 %v4108_v18, %v3023_v28  ;;  %v1641_v36 = vmax.f32 %v1625_v10, 0.0  ;;  %v1223_v52 = vmul.f32 %v3123_v32, %v4136_v16  ;;  %v928_v25 = vmul.f32 %v4110_v13, %v3040_v35 }
 0x1c9   : > { %v1089_v4 = vadd.f32 %v1073_v12, %v1040_v45  ;;  %v1610_v49 = vadd.f32 %v1594_v1, %v1562_v7  ;;  %v992_v55 = vadd.f32 %v976_v61, %v943_v40  ;;  %v977_v38 = vmul.f32 %v4179_v17, %v3064_v43  ;;  %v4239_v45 = vld [vmem:[#allocation5 + $0x20] sm:$0xff] }
 0x1ca   : > { %v895_v24 = vadd.f32 %v879_v60, %v830_v54  ;;  %2356 = vrot.lane.b32.xlu2 %v1641_v36, %s2695_s26  ;;  %v1026_v37 = vmul.f32 %v4128_v50, %v3088_v57  ;;  %v1075_v51 = vmul.f32 %v4136_v16, %v3090_v59  ;;  %v1125_v1 = vmul.f32 %v3110_v5, %v4197_v29 }
 0x1cb   : > { %v1139_v15 = vadd.f32 %v1123_v58, %v1089_v4  ;;  %v1626_v22 = vadd.f32 %v3883_v48, %v1610_v49  ;;  %v1041_v42 = vadd.f32 %v1025_v39, %v992_v55  ;;  %v1175_v12 = vmul.f32 %v3121_v31, %v4215_v62  ;;  %v4220_v58 = vld [vmem:[#allocation5 + $0x8] sm:$0xff] }
 0x1cc   : > { %v944_v0 = vadd.f32 %v928_v25, %v895_v24  ;;  %v4224_v46 = vperm.slane %v1939_v20, 0  ;;  %v4226_v30 = vperm.slane %v1939_v20, 1  ;;  %v4228_v23 = vperm.slane %v1939_v20, 2  ;;  %v4251_v55 = vld [vmem:[#allocation3 + $0xa1] sm:$0xff] }
 0x1cd   : > { %v1189_v8 = vadd.f32 %v1173_v11, %v1139_v15  ;;  %v1642_v9 = vmax.f32 %v1626_v22, 0.0  ;;  %v1090_v33 = vadd.f32 %v1074_v3, %v1041_v42  ;;  %v4232_v53 = vperm.slane %v1939_v20, 3 }
 0x1ce   : > { %v993_v61 = vadd.f32 %v977_v38, %v944_v0  ;;  %v1949_v39 = vmul.f32 %v4224_v46, %v1940_v6  ;;  %v1975_v10 = vmul.f32 %v4226_v30, %v4220_v58  ;;  %v2000_v11 = vmul.f32 %v4228_v23, %v4222_v56 }
 0x1cf   : > { %v1238_v34 = vadd.f32 %v1222_v47, %v1189_v8  ;;  %2358 = vrot.lane.b32.xlu0 %v1642_v9, %s2695_s26  ;;  %v1140_v7 = vadd.f32 %v1124_v2, %v1090_v33  ;;  %v2026_v3 = vmul.f32 %v4232_v53, %v4230_v19  ;;  %v4244_v54 = vperm.slane %v1939_v20, 4 }
 0x1d0   : > { %v1042_v40 = vadd.f32 %v1026_v37, %v993_v61  ;;  %v1983_v60 = vadd.f32 %v1975_v10, %v1949_v39  ;;  %v1291_v36 = vmul.f32 %v4108_v18, %v3021_v27  ;;  %v1323_v4 = vmul.f32 %v4110_v13, %v3023_v28  ;;  %v1579_v10 = vld [vmem:[#allocation2 + $0xa2] sm:$0xff] }
 0x1d1   : > { %v1257_v47 = vadd.f32 %v3883_v48, %v1238_v34  ;;  %v1190_v25 = vadd.f32 %v1174_v44, %v1140_v7  ;;  %v2052_v2 = vmul.f32 %v4244_v54, %v4239_v45  ;;  %v1371_v24 = vmul.f32 %v4120_v21, %v3040_v35 }
 0x1d2   : > { %v1091_v49 = vadd.f32 %v1075_v51, %v1042_v40  ;;  %v2008_v20 = vadd.f32 %v2000_v11, %v1983_v60  ;;  %v1339_v15 = vadd.f32 %v1323_v4, %v1291_v36  ;;  %v1403_v37 = vmul.f32 %v4128_v50, %v3064_v43  ;;  %v4265_v51 = vld [vmem:[%s4781_s10] ss:$0 sm:$0xff]  ;;  %v2345_v4 = vpop.permute.xlu2 %2344 }
 0x1d3   : > { %v1273_v38 = vmax.f32 %v1257_v47, 0.0  ;;  %v1239_v18 = vadd.f32 %v1223_v52, %v1190_v25  ;;  %v1224_v13 = vmul.f32 %v3123_v32, %v4251_v55  ;;  %v1435_v42 = vmul.f32 %v4136_v16, %v3088_v57 }
 0x1d4   : > { %v1141_v22 = vadd.f32 %v1125_v1, %v1091_v49  ;;  %v2034_v44 = vadd.f32 %v2026_v3, %v2008_v20  ;;  %v1387_v21 = vadd.f32 %v1371_v24, %v1339_v15  ;;  %v1292_v52 = vmul.f32 %v4128_v50, %v3021_v27  ;;  %v4292_v20 = vld [vmem:[#allocation3 + $0xb1] sm:$0xff] }
 0x1d5   : > { %2260 = vrot.lane.b32.xlu1 %v1273_v38, %s2695_s26  ;;  %v1258_v0 = vadd.f32 %v3883_v48, %v1239_v18  ;;  %v1324_v1 = vmul.f32 %v4136_v16, %v3023_v28  ;;  %v1483_v33 = vmul.f32 %v4142_v63, %v3090_v59  ;;  %v1372_v61 = vmul.f32 %v4142_v63, %v3040_v35  ;;  %v4290_v38 = vld [vmem:[#allocation2 + $0xb1] sm:$0xff] }
 0x1d6   : > { %v1191_v6 = vadd.f32 %v1175_v12, %v1141_v22  ;;  %v2060_v8 = vadd.f32 %v2052_v2, %v2034_v44  ;;  %v1419_v9 = vadd.f32 %v1403_v37, %v1387_v21  ;;  %v1404_v12 = vmul.f32 %v4215_v62, %v3064_v43 }
 0x1d7   : > { %v1274_v34 = vmax.f32 %v1258_v0, 0.0  ;;  %v1340_v11 = vadd.f32 %v1324_v1, %v1292_v52  ;;  %v1515_v3 = vmul.f32 %v4215_v62, %v3110_v5  ;;  %v1436_v63 = vmul.f32 %v4251_v55, %v3088_v57  ;;  %v1580_v1 = vld [vmem:[#allocation2 + $0xb2] sm:$0xff] }
 0x1d8   : > { %v1240_v39 = vadd.f32 %v1224_v13, %v1191_v6  ;;  %v2072_v7 = vadd.f32 %v4265_v51, %v2060_v8  ;;  %v1451_v40 = vadd.f32 %v1435_v42, %v1419_v9  ;;  %v1547_v49 = vmul.f32 %v4251_v55, %v3121_v31  ;;  %v5010_v42 = vld [vmem:[#allocation15_spill] sm:$0xff] }
 0x1d9   : > { %2262 = vrot.lane.b32.xlu2 %v1274_v34, %s2695_s26  ;;  %v1388_v60 = vadd.f32 %v1372_v61, %v1340_v11  ;;  %v1484_v2 = vmul.f32 %v1579_v10, %v3090_v59  ;;  %v1293_v37 = vmul.f32 %v4215_v62, %v3021_v27  ;;  %v1325_v18 = vmul.f32 %v4251_v55, %v3023_v28  ;;  %v4310_v34 = vld [vmem:[#allocation2 + $0xc1] sm:$0xff] }
 0x1da   : > { %v1259_v47 = vadd.f32 %v3883_v48, %v1240_v39  ;;  %v2080_v36 = vsub.f32 0.0, %v2072_v7  ;;  %v1499_v25 = vadd.f32 %v1483_v33, %v1451_v40  ;;  %v1595_v44 = vmul.f32 %v1579_v10, %v3123_v32 }
 0x1db   : > { %v1420_v15 = vadd.f32 %v1404_v12, %v1388_v60  ;;  %v1373_v21 = vmul.f32 %v1579_v10, %v3040_v35  ;;  %v5011_v0 = vmax.f32 %v5010_v42, 0.0  ;;  %v1341_v8 = vadd.f32 %v1325_v18, %v1293_v37 }
 0x1dc   : > { %v1275_v24 = vmax.f32 %v1259_v47, 0.0  ;;  %v2088_v22 = vmul.f32 1.442695, %v2080_v36  ;;  %v1531_v13 = vadd.f32 %v1515_v3, %v1499_v25  ;;  %v1516_v33 = vmul.f32 %v4290_v38, %v3110_v5  ;;  %v4317_v3 = vld [vmem:[#allocation3 + $0xc1] sm:$0xff] }
 0x1dd   : > { %v4304_v6 = vsel %vm408_vm0, %v5011_v0, %v2345_v4  ;;  %v1452_v52 = vadd.f32 %v1436_v63, %v1420_v15  ;;  %v1548_v61 = vmul.f32 %v4292_v20, %v3121_v31  ;;  %v1389_v10 = vadd.f32 %v1373_v21, %v1341_v8  ;;  %v1109_v0 = vld [vmem:[#allocation3 + $0xb0] sm:$0xff] }
 0x1de   : > { %2264 = vrot.lane.b32.xlu0 %v1275_v24, %s2695_s26  ;;  %2649 = vpow2.f32 %v2088_v22  ;;  %v1563_v9 = vadd.f32 %v1547_v49, %v1531_v13  ;;  %v1405_v11 = vmul.f32 %v4290_v38, %v3064_v43  ;;  %v831_v12 = vmul.f32 %v4179_v17, %v3021_v27  ;;  %v1581_v49 = vld [vmem:[#allocation2 + $0xc2] sm:$0xff]  ;;  %v2251_v22 = vpop.permute.xlu2 %2250 }
 0x1df   : > { %v1500_v39 = vadd.f32 %v1484_v2, %v1452_v52  ;;  %v1596_v40 = vmul.f32 %v1580_v1, %v3123_v32  ;;  %v1437_v47 = vmul.f32 %v4292_v20, %v3088_v57  ;;  %v880_v60 = vmul.f32 %v4128_v50, %v3023_v28 }
 0x1e0   : > { %v1611_v7 = vadd.f32 %v1595_v44, %v1563_v9  ;;  %v1421_v36 = vadd.f32 %v1405_v11, %v1389_v10  ;;  %v1485_v4 = vmul.f32 %v1580_v1, %v3090_v59  ;;  %v1517_v25 = vmul.f32 %v4310_v34, %v3110_v5 }
 0x1e1   : > { %v1532_v63 = vadd.f32 %v1516_v33, %v1500_v39  ;;  %v896_v2 = vadd.f32 %v880_v60, %v831_v12  ;;  %v929_v24 = vmul.f32 %v4136_v16, %v3040_v35  ;;  %v978_v15 = vmul.f32 %v4197_v29, %v3064_v43 }
 0x1e2   : > { %v1627_v17 = vadd.f32 %v3883_v48, %v1611_v7  ;;  %v1453_v18 = vadd.f32 %v1437_v47, %v1421_v36  ;;  %v1549_v50 = vmul.f32 %v4317_v3, %v3121_v31  ;;  %v1027_v13 = vmul.f32 %v4215_v62, %v3088_v57 }
 0x1e3   : > { %v1564_v37 = vadd.f32 %v1548_v61, %v1532_v63  ;;  %v945_v42 = vadd.f32 %v929_v24, %v896_v2  ;;  %v832_v52 = vmul.f32 %v4197_v29, %v3021_v27  ;;  %v881_v16 = vmul.f32 %v4215_v62, %v3023_v28  ;;  %v5012_v61 = vld [vmem:[#allocation10_spill] sm:$0xff]  ;;  %v4362_v24 = vld [vmem:[#allocation5 + $0x30] sm:$0xff] }
 0x1e4   : > { %v2650_v44 = vpop.eup %2649  ;;  %v1643_v21 = vmax.f32 %v1627_v17, 0.0  ;;  %v1501_v9 = vadd.f32 %v1485_v4, %v1453_v18  ;;  %v1597_v33 = vmul.f32 %v1581_v49, %v3123_v32  ;;  %v5013_v39 = vmax.f32 %v5012_v61, 0.0  ;;  %v1110_v63 = vld [vmem:[#allocation3 + $0xc0] sm:$0xff] }
 0x1e5   : > { %v4339_v1 = vadd.f32 1.0, %v2650_v44  ;;  %v1612_v8 = vadd.f32 %v1596_v40, %v1564_v37  ;;  %v994_v11 = vadd.f32 %v978_v15, %v945_v42  ;;  %v897_v12 = vadd.f32 %v881_v16, %v832_v52  ;;  %v4366_v15 = vld [vmem:[#allocation5 + $0x40] sm:$0xff] }
 0x1e6   : > { %2360 = vrot.lane.b32.xlu1 %v1643_v21, %s2695_s26  ;;  %v4346_v10 = vsel %vm408_vm0, %v5013_v39, %v2251_v22  ;;  %v930_v27 = vmul.f32 %v4251_v55, %v3040_v35  ;;  %v1076_v29 = vmul.f32 %v4251_v55, %v3090_v59  ;;  %v979_v62 = vmul.f32 %v1109_v0, %v3064_v43 }
 0x1e7   : > { %2651 = vrcp.f32 %v4339_v1  ;;  %v2123_v28 = vand.u32 2147483648, %v4339_v1  ;;  %v1628_v7 = vadd.f32 %v3883_v48, %v1612_v8  ;;  %v1533_v40 = vadd.f32 %v1517_v25, %v1501_v9  ;;  %v4364_v25 = vld [vmem:[#allocation5 + $0x38] sm:$0xff] }
 0x1e8   : > { %v1043_v47 = vadd.f32 %v1027_v13, %v994_v11  ;;  %v946_v60 = vadd.f32 %v930_v27, %v897_v12  ;;  %v2121_v36 = vand.u32 2147483647, %v4339_v1  ;;  %v1126_v4 = vmul.f32 %v3110_v5, %v1109_v0  ;;  %v2249_v27 = vpop.permute.xlu1 %2248 }
 0x1e9   : > { %v1176_v35 = vmul.f32 %v3121_v31, %v4290_v38  ;;  %v1028_v17 = vmul.f32 %v4290_v38, %v3088_v57  ;;  %v1644_v49 = vmax.f32 %v1628_v7, 0.0  ;;  %v1565_v55 = vadd.f32 %v1549_v50, %v1533_v40  ;;  %v4373_v57 = vld [vmem:[#allocation5 + $0x48] sm:$0xff] }
 0x1ea   : > { %v1092_v2 = vadd.f32 %v1076_v29, %v1043_v47  ;;  %v995_v43 = vadd.f32 %v979_v62, %v946_v60  ;;  %v2124_v37 = vor.u32 1.1754944e-38, %v2123_v28  ;;  %v1225_v18 = vmul.f32 %v3123_v32, %v4292_v20  ;;  %v2347_v28 = vpop.permute.xlu0 %2346 }
 0x1eb   : > { %v1077_v22 = vmul.f32 %v4292_v20, %v3090_v59  ;;  %v1127_v13 = vmul.f32 %v3110_v5, %v1110_v63  ;;  %vm2117_vm5 = vweird.f32 %v4339_v1  ;;  %2362 = vrot.lane.b32.xlu2 %v1644_v49, %s2695_s26  ;;  %v1613_v38 = vadd.f32 %v1597_v33, %v1565_v55  ;;  %v5018_v55 = vld [vmem:[#allocation18_spill] sm:$0xff] }
 0x1ec   : > { %v1142_v50 = vadd.f32 %v1126_v4, %v1092_v2  ;;  %v1044_v44 = vadd.f32 %v1028_v17, %v995_v43  ;;  %v1177_v21 = vmul.f32 %v3121_v31, %v4310_v34  ;;  %v1226_v0 = vmul.f32 %v3123_v32, %v4317_v3  ;;  %v4395_v3 = vld [vmem:[#allocation5 + $0x50] sm:$0xff] }
 0x1ed   : > { %v2652_v42 = vpop.eup %2651  ;;  %v1955_v59 = vmul.f32 %v4224_v46, %v4362_v24  ;;  %v1981_v5 = vmul.f32 %v4226_v30, %v4364_v25  ;;  %v2006_v20 = vmul.f32 %v4228_v23, %v4366_v15  ;;  %vm4388_vm6 = vcmp.eq.f32.partialorder %v2121_v36, 8.507059e+37  ;;  %v2044_v36 = vld [vmem:[#allocation5 + $0x28] sm:$0xff] }
 0x1ee   : > { %v2113_v52 = vmul.f32 %v2652_v42, %v4339_v1  ;;  %v1629_v31 = vadd.f32 %v3883_v48, %v1613_v38  ;;  %v1192_v34 = vadd.f32 %v1176_v35, %v1142_v50  ;;  %v2032_v32 = vmul.f32 %v4232_v53, %v4373_v57  ;;  %v5016_v35 = vld [vmem:[#allocation7_spill] sm:$0xff] }
 0x1ef   : > { %v1093_v8 = vadd.f32 %v1077_v22, %v1044_v44  ;;  %v1989_v9 = vadd.f32 %v1981_v5, %v1955_v59  ;;  %v1950_v33 = vmul.f32 %v4220_v58, %v4224_v46  ;;  %v1976_v61 = vmul.f32 %v4222_v56, %v4226_v30 }
 0x1f0   : > { %v2114_v39 = vsub.f32 1.0, %v2113_v52  ;;  %v1645_v11 = vmax.f32 %v1629_v31, 0.0  ;;  %v1241_v12 = vadd.f32 %v1225_v18, %v1192_v34  ;;  %v2001_v29 = vmul.f32 %v4230_v19, %v4228_v23 }
 0x1f1   : > { %vm2118_vm7 = vweird.f32 %v2652_v42  ;;  %v1143_v62 = vadd.f32 %v1127_v13, %v1093_v8  ;;  %v2014_v7 = vadd.f32 %v2006_v20, %v1989_v9  ;;  %v2058_v40 = vmul.f32 %v4244_v54, %v4395_v3  ;;  %v4424_v20 = vpop.permute.xlu2 %2368 }
 0x1f2   : > { %v2115_v47 = vmul.f32 %v2652_v42, %v2114_v39  ;;  %2364 = vrot.lane.b32.xlu0 %v1645_v11, %s2695_s26  ;;  %v1260_v58 = vadd.f32 %v3883_v48, %v1241_v12  ;;  %v1984_v60 = vadd.f32 %v1976_v61, %v1950_v33  ;;  %v2027_v63 = vmul.f32 %v4239_v45, %v4232_v53  ;;  %vm2119_vm8 = vmor %vm2117_vm5, %vm2118_vm7 }
 0x1f3   : > { %v1193_v4 = vadd.f32 %v1177_v21, %v1143_v62  ;;  %v5017_v17 = vmax.f32 %v5016_v35, 0.0  ;;  %v5019_v2 = vmax.f32 %v5018_v55, 0.0  ;;  %v2040_v18 = vadd.f32 %v2032_v32, %v2014_v7 }
 0x1f4   : > { %v2116_v22 = vadd.f32 %v2652_v42, %v2115_v47  ;;  %v1276_v13 = vmax.f32 %v1260_v58, 0.0  ;;  %v2009_v38 = vadd.f32 %v2001_v29, %v1984_v60  ;;  %v1977_v48 = vmul.f32 %v4230_v19, %v4226_v30 }
 0x1f5   : > { %v2296_v49 = vsel %vm408_vm0, %v5017_v17, %v2249_v27  ;;  %v2393_v43 = vsel %vm408_vm0, %v5019_v2, %v2347_v28  ;;  %v1242_v50 = vadd.f32 %v1226_v0, %v1193_v4  ;;  %v2066_v44 = vadd.f32 %v2058_v40, %v2040_v18  ;;  %v2684_v0 = vld [vmem:[%s4775_s4] ss:$0 sm:$0xff] }
 0x1f6   : > { %v2053_v21 = vmul.f32 %v4244_v54, %v2044_v36  ;;  %v1951_v59 = vmul.f32 %v4222_v56, %v4224_v46  ;;  %v2120_v5 = vsel %vm2119_vm8, %v2652_v42, %v2116_v22  ;;  %2266 = vrot.lane.b32.xlu1 %v1276_v13, %s2695_s26  ;;  %v2035_v52 = vadd.f32 %v2027_v63, %v2009_v38 }
 0x1f7   : > { %v2002_v31 = vmul.f32 %v4239_v45, %v4228_v23  ;;  %v2028_v34 = vmul.f32 %v2044_v36, %v4232_v53  ;;  %v2125_v1 = vsel %vm4388_vm6, %v2124_v37, %v2120_v5  ;;  %v1261_v32 = vadd.f32 %v2684_v0, %v1242_v50 }
 0x1f8   : > { %v2078_v56 = vadd.f32 %v4265_v51, %v2066_v44  ;;  %v1978_v42 = vmul.f32 %v4239_v45, %v4226_v30  ;;  %v2408_v8 = vmul.f32 %v4304_v6, %v2125_v1  ;;  %v4439_v9 = vmul.f32 %v4346_v10, %v2125_v1 }
 0x1f9   : > { %v4441_v33 = vmul.f32 %v2296_v49, %v2125_v1  ;;  %v1985_v61 = vadd.f32 %v1977_v48, %v1951_v59  ;;  %v1277_v16 = vmax.f32 %v1261_v32, 0.0  ;;  %v2061_v39 = vadd.f32 %v2053_v21, %v2035_v52  ;;  %v2351_v4 = vpop.permute.xlu2 %2350  ;;  %v4473_v32 = vpop.permute.xlu0 %2270 }
 0x1fa   : > { %v2086_v37 = vsub.f32 0.0, %v2078_v56  ;;  %v1952_v11 = vmul.f32 %v4230_v19, %v4224_v46  ;;  %2440 = vrot.lane.b32.xlu0 %v2408_v8, %s2696_s23  ;;  %v2409_v12 = vmul.f32 %v2393_v43, %v2125_v1  ;;  %v2054_v6 = vmul.f32 %v4244_v54, %v4362_v24 }
 0x1fb   : > { %v2010_v27 = vadd.f32 %v2002_v31, %v1985_v61  ;;  %v2003_v10 = vmul.f32 %v2044_v36, %v4228_v23  ;;  %2268 = vrot.lane.b32.xlu2 %v1277_v16, %s2695_s26  ;;  %v2073_v29 = vadd.f32 %v4265_v51, %v2061_v39  ;;  %v1980_v62 = vmul.f32 %v4226_v30, %v4362_v24  ;;  %s4704_s26 = scalar_lea.vmem %s4782_s11, %s2627_s19 }
 0x1fc   : > { %v2100_v28 = vmul.f32 1.442695, %v2086_v37  ;;  %v1986_v7 = vadd.f32 %v1978_v42, %v1952_v11  ;;  %v2029_v40 = vmul.f32 %v4232_v53, %v4362_v24  ;;  %v1953_v47 = vmul.f32 %v4239_v45, %v4224_v46 }
 0x1fd   : > { %v2036_v19 = vadd.f32 %v2028_v34, %v2010_v27  ;;  %v1979_v58 = vmul.f32 %v2044_v36, %v4226_v30  ;;  %v2081_v60 = vsub.f32 0.0, %v2073_v29  ;;  %v1954_v63 = vmul.f32 %v2044_v36, %v4224_v46  ;;  %v4470_v34 = vpop.permute.xlu1 %2366 }
 0x1fe   : > { %2653 = vpow2.f32 %v2100_v28  ;;  %2442 = vrot.lane.b32.xlu1 %v2409_v12, %s2696_s23  ;;  %v2011_v17 = vadd.f32 %v2003_v10, %v1986_v7  ;;  %v2005_v43 = vmul.f32 %v4228_v23, %v4364_v25  ;;  %v2055_v22 = vmul.f32 %v4244_v54, %v4364_v25 }
 0x1ff   : > { %v2062_v35 = vadd.f32 %v2054_v6, %v2036_v19  ;;  %v1987_v49 = vadd.f32 %v1979_v58, %v1953_v47  ;;  %v2090_v55 = vmul.f32 1.442695, %v2081_v60  ;;  %v1988_v2 = vadd.f32 %v1980_v62, %v1954_v63  ;;  %v5020_v47 = vld [vmem:[#allocation48_spill] sm:$0xff]  ;;  %v5022_v60 = vld [vmem:[#allocation21_spill] sm:$0xff] }
 0x200   : > { %v2037_v45 = vadd.f32 %v2029_v40, %v2011_v17  ;;  %v2031_v36 = vmul.f32 %v4232_v53, %v4366_v15  ;;  %v2057_v38 = vmul.f32 %v4244_v54, %v4373_v57  ;;  %v1956_v56 = vmul.f32 %v4364_v25, %v4224_v46 }
 0x201   : > { %v2074_v18 = vadd.f32 %v4265_v51, %v2062_v35  ;;  %2655 = vpow2.f32 %v2090_v55  ;;  %v2013_v13 = vadd.f32 %v2005_v43, %v1988_v2  ;;  %v1982_v42 = vmul.f32 %v4366_v15, %v4226_v30  ;;  %v2275_v61 = vpop.permute.xlu2 %2274 }
 0x202   : > { %v2063_v50 = vadd.f32 %v2055_v22, %v2037_v45  ;;  %v2004_v11 = vmul.f32 %v4228_v23, %v4362_v24  ;;  %v2030_v46 = vmul.f32 %v4232_v53, %v4364_v25  ;;  %v2056_v24 = vmul.f32 %v4244_v54, %v4366_v15  ;;  %v5026_v45 = vld [vmem:[#allocation8_spill] sm:$0xff] }
 0x203   : > { %v2082_v48 = vsub.f32 0.0, %v2074_v18  ;;  %v2039_v21 = vadd.f32 %v2031_v36, %v2013_v13  ;;  %v1990_v37 = vadd.f32 %v1982_v42, %v1956_v56  ;;  %v5021_v58 = vmax.f32 %v5020_v47, 0.0  ;;  %v2050_v36 = vld [vmem:[#allocation5 + $0x58] sm:$0xff] }
 0x204   : > { %v2654_v44 = vpop.eup %2653  ;;  %v2075_v31 = vadd.f32 %v4265_v51, %v2063_v50  ;;  %v2012_v29 = vadd.f32 %v2004_v11, %v1987_v49  ;;  %v5023_v63 = vmax.f32 %v5022_v60, 0.0  ;;  %v2007_v17 = vmul.f32 %v4373_v57, %v4228_v23 }
 0x205   : > { %v2110_v59 = vadd.f32 1.0, %v2654_v44  ;;  %v2092_v5 = vmul.f32 1.442695, %v2082_v48  ;;  %v2065_v52 = vadd.f32 %v2057_v38, %v2039_v21  ;;  %v4486_v7 = vpop.permute.xlu1 %2348  ;;  %v2404_v25 = vsel %vm408_vm0, %v5021_v58, %v4424_v20 }
 0x206   : > { %v2083_v39 = vsub.f32 0.0, %v2075_v31  ;;  %v4499_v35 = vsel %vm408_vm0, %v5023_v63, %v2351_v4  ;;  %v2038_v15 = vadd.f32 %v2030_v46, %v2012_v29  ;;  %v2253_v4 = vpop.permute.xlu0 %2252  ;;  %v5027_v22 = vmax.f32 %v5026_v45, 0.0  ;;  %v5030_v46 = vld [vmem:[#allocation13_spill] sm:$0xff]  ;;  %v5038_v45 = vld [vmem:[#allocation52_spill] sm:$0xff] }
 0x207   : > { %2657 = vrcp.f32 %v2110_v59  ;;  %v2656_v1 = vpop.eup %2655  ;;  %v2077_v0 = vadd.f32 %v4265_v51, %v2065_v52  ;;  %v2211_v30 = vand.u32 2147483647, %v2110_v59  ;;  %v2213_v62 = vand.u32 2147483648, %v2110_v59  ;;  %v5034_v63 = vld [vmem:[#allocation17_spill] sm:$0xff] }
 0x208   : > { %2659 = vpow2.f32 %v2092_v5  ;;  %v4479_v8 = vadd.f32 1.0, %v2656_v1  ;;  %v2094_v27 = vmul.f32 1.442695, %v2083_v39  ;;  %vm2207_vm9 = vweird.f32 %v2110_v59 }
 0x209   : > { %v2085_v16 = vsub.f32 0.0, %v2077_v0  ;;  %vm4505_vm11 = vcmp.eq.f32.partialorder %v2211_v30, 8.507059e+37  ;;  %v2214_v18 = vor.u32 1.1754944e-38, %v2213_v62  ;;  %v2309_v23 = vsel %vm408_vm0, %v5027_v22, %v2275_v61  ;;  %v2257_v57 = vpop.permute.xlu2 %2256  ;;  %v5032_v30 = vld [vmem:[#allocation6_spill] sm:$0xff] }
 0x20a   : > { %2661 = vrcp.f32 %v4479_v8  ;;  %v2136_v55 = vand.u32 2147483647, %v4479_v8  ;;  %v2015_v13 = vadd.f32 %v2007_v17, %v1990_v37  ;;  %v2064_v38 = vadd.f32 %v2056_v24, %v2038_v15 }
 0x20b   : > { %v2098_v12 = vmul.f32 1.442695, %v2085_v16  ;;  %v2138_v21 = vand.u32 2147483648, %v4479_v8  ;;  %v2033_v5 = vmul.f32 %v4395_v3, %v4232_v53  ;;  %vm2132_vm13 = vweird.f32 %v4479_v8 }
 0x20c   : > { %vm4519_vm15 = vcmp.eq.f32.partialorder %v2136_v55, 8.507059e+37  ;;  %v2059_v61 = vmul.f32 %v4244_v54, %v2050_v36  ;;  %v2076_v37 = vadd.f32 %v4265_v51, %v2064_v38  ;;  %v5033_v29 = vmax.f32 %v5032_v30, 0.0 }
 0x20d   : > { %v2658_v6 = vpop.eup %2657  ;;  %2663 = vpow2.f32 %v2098_v12  ;;  %v2041_v42 = vadd.f32 %v2033_v5, %v2015_v13  ;;  %v2273_v3 = vpop.permute.xlu1 %2272  ;;  %v2139_v12 = vor.u32 1.1754944e-38, %v2138_v21  ;;  %v5035_v17 = vmax.f32 %v5034_v63, 0.0 }
 0x20e   : > { %v2660_v10 = vpop.eup %2659  ;;  %v2203_v28 = vmul.f32 %v2658_v6, %v2110_v59  ;;  %2665 = vpow2.f32 %v2094_v27  ;;  %vm2208_vm10 = vweird.f32 %v2658_v6  ;;  %v2308_v62 = vsel %vm408_vm0, %v5033_v29, %v2273_v3 }
 0x20f   : > { %v4488_v19 = vadd.f32 1.0, %v2660_v10  ;;  %vm2209_vm12 = vmor %vm2207_vm9, %vm2208_vm10  ;;  %v5031_v10 = vmax.f32 %v5030_v46, 0.0  ;;  %v2084_v60 = vsub.f32 0.0, %v2076_v37  ;;  %v2300_v55 = vsel %vm408_vm0, %v5035_v17, %v2257_v57 }
 0x210   : > { %v2204_v40 = vsub.f32 1.0, %v2203_v28  ;;  %v2662_v49 = vpop.eup %2661  ;;  %v5039_v22 = vmax.f32 %v5038_v45, 0.0 }
 0x211   : > { %2667 = vrcp.f32 %v4488_v19  ;;  %v2128_v20 = vmul.f32 %v2662_v49, %v4479_v8  ;;  %vm2133_vm14 = vweird.f32 %v2662_v49  ;;  %v2298_v28 = vsel %vm408_vm0, %v5031_v10, %v2253_v4 }
 0x212   : > { %v2205_v2 = vmul.f32 %v2658_v6, %v2204_v40  ;;  %vm2134_vm1 = vmor %vm2132_vm13, %vm2133_vm14  ;;  %v2153_v40 = vand.u32 2147483648, %v4488_v19  ;;  %v2067_v8 = vadd.f32 %v2059_v61, %v2041_v42  ;;  %vm2147_vm2 = vweird.f32 %v4488_v19 }
 0x213   : > { %v2664_v48 = vpop.eup %2663  ;;  %v2129_v44 = vsub.f32 1.0, %v2128_v20  ;;  %v2096_v21 = vmul.f32 1.442695, %v2084_v60 }
 0x214   : > { %v2206_v50 = vadd.f32 %v2658_v6, %v2205_v2  ;;  %v2666_v52 = vpop.eup %2665  ;;  %v4523_v1 = vadd.f32 1.0, %v2664_v48  ;;  %v2079_v15 = vadd.f32 %v4265_v51, %v2067_v8  ;;  %v2371_v2 = vpop.permute.xlu0 %2370 }
 0x215   : > { %v2130_v56 = vmul.f32 %v2662_v49, %v2129_v44  ;;  %v4529_v59 = vadd.f32 1.0, %v2666_v52  ;;  %v2255_v44 = vpop.permute.xlu1 %2254 }
 0x216   : > { %v2210_v0 = vsel %vm2209_vm12, %v2658_v6, %v2206_v50  ;;  %2669 = vrcp.f32 %v4523_v1  ;;  %v2151_v6 = vand.u32 2147483647, %v4488_v19  ;;  %v2087_v51 = vsub.f32 0.0, %v2079_v15 }
 0x217   : > { %v2668_v16 = vpop.eup %2667  ;;  %v2215_v53 = vsel %vm4505_vm11, %v2214_v18, %v2210_v0  ;;  %v2131_v11 = vadd.f32 %v2662_v49, %v2130_v56  ;;  %2671 = vrcp.f32 %v4529_v59  ;;  %v4566_v18 = vpop.permute.xlu2 %2374  ;;  %v2196_v38 = vand.u32 2147483647, %v4523_v1 }
 0x218   : > { %v2420_v39 = vmul.f32 %v2404_v25, %v2215_v53  ;;  %v4532_v27 = vmul.f32 %v2309_v23, %v2215_v53  ;;  %v2143_v54 = vmul.f32 %v2668_v16, %v4488_v19  ;;  %v4547_v47 = vmul.f32 %v2308_v62, %v2215_v53 }
 0x219   : > { %v2135_v24 = vsel %vm2134_vm1, %v2662_v49, %v2131_v11  ;;  %vm2148_vm3 = vweird.f32 %v2668_v16  ;;  %vm4562_vm5 = vcmp.eq.f32.partialorder %v2151_v6, 8.507059e+37  ;;  %v2405_v23 = vsel %vm408_vm0, %v5039_v22, %v2371_v2  ;;  %v5044_v6 = vld [vmem:[#allocation12_spill] sm:$0xff] }
 0x21a   : > { %2464 = vrot.lane.b32.xlu0 %v2420_v39, %s2696_s23  ;;  %v4551_v58 = vsel %vm4519_vm15, %v2139_v12, %v2135_v24  ;;  %v2144_v25 = vsub.f32 1.0, %v2143_v54  ;;  %v4574_v36 = vmul.f32 %v2405_v23, %v2215_v53  ;;  %v2154_v50 = vor.u32 1.1754944e-38, %v2153_v40  ;;  %vm2149_vm6 = vmor %vm2147_vm2, %vm2148_vm3  ;;  %v5042_v39 = vld [vmem:[#allocation28_spill] sm:$0xff] }
 0x21b   : > { %v4559_v49 = vmul.f32 %v2298_v28, %v4551_v58  ;;  %v2411_v57 = vmul.f32 %v4499_v35, %v4551_v58  ;;  %v2198_v52 = vand.u32 2147483648, %v4523_v1  ;;  %v2102_v31 = vmul.f32 1.442695, %v2087_v51  ;;  %v5040_v35 = vld [vmem:[#allocation16_spill] sm:$0xff] }
 0x21c   : > { %v2670_v43 = vpop.eup %2669  ;;  %v2145_v20 = vmul.f32 %v2668_v16, %v2144_v25  ;;  %v5041_v0 = vmax.f32 %v5040_v35, 0.0  ;;  %2673 = vpow2.f32 %v2096_v21  ;;  %v5043_v11 = vmax.f32 %v5042_v39, 0.0  ;;  %v2353_v30 = vpop.permute.xlu0 %2352 }
 0x21d   : > { %v2188_v13 = vmul.f32 %v2670_v43, %v4523_v1  ;;  %v2672_v42 = vpop.eup %2671  ;;  %vm2193_vm7 = vweird.f32 %v2670_v43  ;;  %2675 = vpow2.f32 %v2102_v31  ;;  %vm2192_vm8 = vweird.f32 %v4523_v1 }
 0x21e   : > { %v2146_v48 = vadd.f32 %v2668_v16, %v2145_v20  ;;  %v2299_v56 = vsel %vm408_vm0, %v5041_v0, %v2255_v44  ;;  %v2158_v19 = vmul.f32 %v2672_v42, %v4529_v59  ;;  %v2403_v12 = vsel %vm408_vm0, %v5043_v11, %v4470_v34  ;;  %vm2194_vm9 = vmor %vm2192_vm8, %vm2193_vm7  ;;  %v5046_v34 = vld [vmem:[#allocation39_spill] sm:$0xff] }
 0x21f   : > { %v2189_v5 = vsub.f32 1.0, %v2188_v13  ;;  %v4585_v53 = vmul.f32 %v2299_v56, %v4551_v58  ;;  %v5045_v46 = vmax.f32 %v5044_v6, 0.0  ;;  %vm2197_vm10 = vcmp.eq.f32.partialorder %v2196_v38, 8.507059e+37  ;;  %v5050_v38 = vld [vmem:[#allocation19_spill] sm:$0xff]  ;;  %v5052_v56 = vld [vmem:[#allocation49_spill] sm:$0xff] }
 0x220   : > { %v2150_v61 = vsel %vm2149_vm6, %v2668_v16, %v2146_v48  ;;  %v2159_v28 = vsub.f32 1.0, %v2158_v19  ;;  %v2199_v29 = vor.u32 1.1754944e-38, %v2198_v52  ;;  %v2168_v62 = vand.u32 2147483648, %v4529_v59 }
 0x221   : > { %v2190_v3 = vmul.f32 %v2670_v43, %v2189_v5  ;;  %v4590_v37 = vsel %vm4562_vm5, %v2154_v50, %v2150_v61  ;;  %v2307_v10 = vsel %vm408_vm0, %v5045_v46, %v4473_v32  ;;  %v5047_v24 = vmax.f32 %v5046_v34, 0.0 }
 0x222   : > { %2446 = vrot.lane.b32.xlu0 %v2411_v57, %s2696_s23  ;;  %v4598_v16 = vmul.f32 %v2300_v55, %v4590_v37  ;;  %v2160_v25 = vmul.f32 %v2672_v42, %v2159_v28  ;;  %vm2163_vm11 = vweird.f32 %v2672_v42  ;;  %v2674_v60 = vpop.eup %2673  ;;  %v2166_v32 = vand.u32 2147483647, %v4529_v59  ;;  %v4614_v55 = vpop.permute.xlu1 %2372  ;;  %v5048_v57 = vld [vmem:[#allocation54_spill] sm:$0xff] }
 0x223   : > { %v2191_v54 = vadd.f32 %v2670_v43, %v2190_v3  ;;  %v2396_v40 = vsel %vm408_vm0, %v5047_v24, %v2353_v30  ;;  %v2676_v15 = vpop.eup %2675  ;;  %vm2162_vm12 = vweird.f32 %v4529_v59  ;;  %v2108_v45 = vadd.f32 1.0, %v2674_v60 }
 0x224   : > { %v2412_v1 = vmul.f32 %v2396_v40, %v4590_v37  ;;  %v2357_v17 = vpop.permute.xlu2 %2356  ;;  %v2161_v4 = vadd.f32 %v2672_v42, %v2160_v25  ;;  %vm2164_vm13 = vmor %vm2162_vm12, %vm2163_vm11  ;;  %v2169_v23 = vor.u32 1.1754944e-38, %v2168_v62  ;;  %v5049_v13 = vmax.f32 %v5048_v57, 0.0  ;;  %v2277_v44 = vpop.permute.xlu0 %2276  ;;  %v5058_v25 = vld [vmem:[#allocation11_spill] sm:$0xff] }
 0x225   : > { %v2195_v8 = vsel %vm2194_vm9, %v2670_v43, %v2191_v54  ;;  %v2111_v43 = vadd.f32 1.0, %v2676_v15  ;;  %v5051_v48 = vmax.f32 %v5050_v38, 0.0  ;;  %vm2167_vm14 = vcmp.eq.f32.partialorder %v2166_v32, 8.507059e+37  ;;  %v5060_v15 = vld [vmem:[#allocation14_spill] sm:$0xff] }
 0x226   : > { %v4611_v63 = vsel %vm2197_vm10, %v2199_v29, %v2195_v8  ;;  %2448 = vrot.lane.b32.xlu1 %v2412_v1, %s2696_s23  ;;  %v2165_v22 = vsel %vm2164_vm13, %v2672_v42, %v2161_v4  ;;  %v2398_v51 = vsel %vm408_vm0, %v5049_v13, %v2357_v17  ;;  %v5053_v42 = vmax.f32 %v5052_v56, 0.0 }
 0x227   : > { %v2419_v2 = vmul.f32 %v2403_v12, %v4611_v63  ;;  %v4618_v20 = vmul.f32 %v2307_v10, %v4611_v63  ;;  %v2394_v50 = vsel %vm408_vm0, %v5051_v48, %v4486_v7  ;;  %2677 = vrcp.f32 %v2111_v43  ;;  %v5054_v12 = vld [vmem:[#allocation56_spill] sm:$0xff]  ;;  %v5056_v10 = vld [vmem:[#allocation47_spill] sm:$0xff]  ;;  %v5062_v48 = vld [vmem:[#allocation58_spill] sm:$0xff] }
 0x228   : > { %v2170_v59 = vsel %vm2167_vm14, %v2169_v23, %v2165_v22  ;;  %2679 = vrcp.f32 %v2108_v45  ;;  %v2410_v5 = vmul.f32 %v2394_v50, %v4551_v58  ;;  %v2226_v3 = vand.u32 2147483647, %v2111_v43 }
 0x229   : > { %2462 = vrot.lane.b32.xlu2 %v2419_v2, %s2696_s23  ;;  %v2414_v21 = vmul.f32 %v2398_v51, %v2170_v59  ;;  %v2228_v19 = vand.u32 2147483648, %v2111_v43  ;;  %v5055_v54 = vmax.f32 %v5054_v12, 0.0  ;;  %v5057_v28 = vmax.f32 %v5056_v10, 0.0 }
 0x22a   : > { %v2355_v52 = vpop.permute.xlu1 %2354  ;;  %vm2222_vm1 = vweird.f32 %v2111_v43  ;;  %v5059_v1 = vmax.f32 %v5058_v25, 0.0  ;;  %vm2227_vm3 = vcmp.eq.f32.partialorder %v2226_v3, 8.507059e+37  ;;  %v5061_v2 = vmax.f32 %v5060_v15, 0.0 }
 0x22b   : > { %2452 = vrot.lane.b32.xlu0 %v2414_v21, %s2696_s23  ;;  %v2397_v7 = vsel %vm408_vm0, %v5053_v42, %v2355_v52  ;;  %v2229_v8 = vor.u32 1.1754944e-38, %v2228_v19  ;;  %v2183_v13 = vand.u32 2147483648, %v2108_v45  ;;  %vm2177_vm6 = vweird.f32 %v2108_v45 }
 0x22c   : > { %v2413_v6 = vmul.f32 %v2397_v7, %v4590_v37  ;;  %v2310_v60 = vsel %vm408_vm0, %v5059_v1, %v2277_v44  ;;  %v2181_v38 = vand.u32 2147483647, %v2108_v45  ;;  %v5063_v50 = vmax.f32 %v5062_v48, 0.0  ;;  %v5074_v1 = vld [vmem:[#allocation57_spill] sm:$0xff] }
 0x22d   : > { %v2678_v31 = vpop.eup %2677  ;;  %v2184_v52 = vor.u32 1.1754944e-38, %v2183_v13  ;;  %v5064_v42 = vmax.f32 %v3713_v41, 0.0  ;;  %v5078_v13 = vmax.f32 %v3664_v14, 0.0  ;;  %vm2504_vm9 = vcmask 261120  }
 0x22e   : > { %v2680_v35 = vpop.eup %2679  ;;  %v2218_v0 = vmul.f32 %v2678_v31, %v2111_v43  ;;  %vm2223_vm15 = vweird.f32 %v2678_v31  ;;  %vm2182_vm8 = vcmp.eq.f32.partialorder %v2181_v38, 8.507059e+37 }
 0x22f   : > { %v2173_v46 = vmul.f32 %v2680_v35, %v2108_v45  ;;  %vm2224_vm2 = vmor %vm2222_vm1, %vm2223_vm15  ;;  %vm2178_vm5 = vweird.f32 %v2680_v35 }
 0x230   : > { %v2219_v61 = vsub.f32 1.0, %v2218_v0  ;;  %vm2179_vm7 = vmor %vm2177_vm6, %vm2178_vm5 }
 0x231   : > { %2444 = vrot.lane.b32.xlu2 %v2410_v5, %s2696_s23  ;;  %v2174_v32 = vsub.f32 1.0, %v2173_v46 }
 0x232   : > { %v2220_v29 = vmul.f32 %v2678_v31, %v2219_v61  ;;  %v5065_v61 = vld [vmem:[#allocation51_spill] sm:$0xff] }
 0x233   : > { %v2263_v39 = vpop.permute.xlu2 %2262  ;;  %v2259_v11 = vpop.permute.xlu0 %2258  ;;  %v2175_v43 = vmul.f32 %v2680_v35, %v2174_v32  ;;  %v5066_v45 = vmax.f32 %v5065_v61, 0.0 }
 0x234   : > { %v2303_v58 = vsel %vm408_vm0, %v5055_v54, %v2263_v39  ;;  %v2301_v30 = vsel %vm408_vm0, %v5057_v28, %v2259_v11  ;;  %v2221_v24 = vadd.f32 %v2678_v31, %v2220_v29 }
 0x235   : > { %v4643_v62 = vmul.f32 %v2303_v58, %v2170_v59  ;;  %v4646_v34 = vmul.f32 %v2301_v30, %v4590_v37  ;;  %v2176_v57 = vadd.f32 %v2680_v35, %v2175_v43  ;;  %v5071_v30 = vld [vmem:[#allocation9_spill] sm:$0xff] }
 0x236   : > { %v2225_v17 = vsel %vm2224_vm2, %v2678_v31, %v2221_v24  ;;  %v5072_v29 = vmax.f32 %v5071_v30, 0.0 }
 0x237   : > { %v2230_v37 = vsel %vm2227_vm3, %v2229_v8, %v2225_v17  ;;  %v2180_v5 = vsel %vm2179_vm7, %v2680_v35, %v2176_v57  ;;  %v5067_v35 = vld [vmem:[#allocation62_spill] sm:$0xff] }
 0x238   : > { %v2279_v40 = vpop.permute.xlu1 %2278  ;;  %v4655_v22 = vmul.f32 %v2310_v60, %v2230_v37  ;;  %v2185_v56 = vsel %vm2182_vm8, %v2184_v52, %v2180_v5  ;;  %v5068_v11 = vmax.f32 %v5067_v35, 0.0  ;;  %v5075_v60 = vmax.f32 %v5074_v1, 0.0 }
 0x239   : > { %2450 = vrot.lane.b32.xlu2 %v2413_v6, %s2696_s23  ;;  %v2311_v4 = vsel %vm408_vm0, %v5061_v2, %v2279_v40  ;;  %v5069_v6 = vld [vmem:[#allocation59_spill] sm:$0xff]  ;;  %v5076_v2 = vld [vmem:[#allocation20_spill] sm:$0xff] }
 0x23a   : > { %v4657_v23 = vmul.f32 %v2311_v4, %v2230_v37  ;;  %v2407_v12 = vsel %vm408_vm0, %v5068_v11, %v4566_v18  ;;  %v5070_v46 = vmax.f32 %v5069_v6, 0.0  ;;  %v5073_v18 = vmax.f32 %v3618_v26, 0.0 }
 0x23b   : > { %v2423_v58 = vmul.f32 %v2407_v12, %v2230_v37  ;;  %v2406_v32 = vsel %vm408_vm0, %v5075_v60, %v4614_v55  ;;  %v5077_v4 = vmax.f32 %v5076_v2, 0.0 }
 0x23c   : > { %v2422_v17 = vmul.f32 %v2406_v32, %v2230_v37 }
 0x241   : > { %v2359_v51 = vpop.permute.xlu0 %2358 }
 0x242   : > { %v2399_v44 = vsel %vm408_vm0, %v5063_v50, %v2359_v51 }
 0x243   : > { %v2415_v21 = vmul.f32 %v2399_v44, %v2170_v59 }
 0x245   : > { %2454 = vrot.lane.b32.xlu1 %v2415_v21, %s2696_s23  ;;  %v2363_v31 = vpop.permute.xlu2 %2362 }
 0x246   : > { %v2401_v7 = vsel %vm408_vm0, %v5064_v42, %v2363_v31 }
 0x247   : > { %v2261_v0 = vpop.permute.xlu1 %2260  ;;  %v2417_v19 = vmul.f32 %v2401_v7, %v2185_v56 }
 0x248   : > { %v2302_v3 = vsel %vm408_vm0, %v5066_v45, %v2261_v0 }
 0x249   : > { %v2318_v39 = vmul.f32 %v2302_v3, %v2170_v59  ;;  %2458 = vrot.lane.b32.xlu0 %v2417_v19, %s2696_s23 }
 0x250   : > { %v2265_v54 = vpop.permute.xlu0 %2264 }
 0x251   : > { %v2304_v41 = vsel %vm408_vm0, %v5070_v46, %v2265_v54  ;;  %2470 = vrot.lane.b32.xlu0 %v2423_v58, %s2696_s23 }
 0x252   : > { %v2320_v10 = vmul.f32 %v2304_v41, %v2185_v56 }
 0x255   : > { %v2269_v28 = vpop.permute.xlu2 %2268 }
 0x256   : > { %v2306_v59 = vsel %vm408_vm0, %v5072_v29, %v2269_v28 }
 0x257   : > { %v2322_v24 = vmul.f32 %v2306_v59, %v4611_v63 }
 0x258   : > { %v2361_v40 = vpop.permute.xlu1 %2360 }
 0x259   : > { %v2400_v8 = vsel %vm408_vm0, %v5073_v18, %v2361_v40 }
 0x25a   : > { %v2416_v25 = vmul.f32 %v2400_v8, %v2185_v56 }
 0x25c   : > { %2456 = vrot.lane.b32.xlu2 %v2416_v25, %s2696_s23 }
 0x264   : > { %v2365_v15 = vpop.permute.xlu0 %2364  ;;  %2468 = vrot.lane.b32.xlu2 %v2422_v17, %s2696_s23 }
 0x265   : > { %v2402_v43 = vsel %vm408_vm0, %v5077_v4, %v2365_v15 }
 0x266   : > { %v2418_v26 = vmul.f32 %v2402_v43, %v4611_v63 }
 0x268   : > { %2460 = vrot.lane.b32.xlu1 %v2418_v26, %s2696_s23  ;;  %v2267_v57 = vpop.permute.xlu1 %2266 }
 0x269   : > { %v2305_v51 = vsel %vm408_vm0, %v5078_v13, %v2267_v57 }
 0x26a   : > { %v2321_v38 = vmul.f32 %v2305_v51, %v2185_v56 }
 0x26c   : > { %v2441_v63 = vpop.permute.xlu0 %2440 }
 0x26d   : > { %v2488_v55 = vsel %vm1778_vm4, %v4441_v33, %v2441_v63 }
 0x26e   : > { %2505 = vst.msk [vmem:[%s4704_s26] sm:$0xff] %vm2504_vm9, %v2488_v55 }
 0x270   : > { %2466 = vrot.lane.b32.xlu1 %v4574_v36, %s2696_s23  ;;  %v2443_v14 = vpop.permute.xlu1 %2442 }
 0x271   : > { %v2489_v37 = vsel %vm1778_vm4, %v4439_v9, %v2443_v14 }
 0x272   : > { %2506 = vst.msk [vmem:[%s4704_s26 + $0x8] sm:$0xff] %vm2504_vm9, %v2489_v37 }
 0x283   : > { %v2463_v48 = vpop.permute.xlu2 %2462 }
 0x284   : > { %v2499_v50 = vsel %vm1778_vm4, %v4618_v20, %v2463_v48 }
 0x285   : > { %2516 = vst.msk [vmem:[%s4704_s26 + $0x58] sm:$0xff] %vm2504_vm9, %v2499_v50 }
 0x28b   : > { %v2445_v44 = vpop.permute.xlu2 %2444 }
 0x28c   : > { %v2465_v33 = vpop.permute.xlu0 %2464  ;;  %v2490_v21 = vsel %vm1778_vm4, %v4559_v49, %v2445_v44 }
 0x28d   : > { %v2500_v36 = vsel %vm1778_vm4, %v4547_v47, %v2465_v33  ;;  %2507 = vst.msk [vmem:[%s4704_s26 + $0x10] sm:$0xff] %vm2504_vm9, %v2490_v21 }
 0x28e   : > { %2517 = vst.msk [vmem:[%s4704_s26 + $0x60] sm:$0xff] %vm2504_vm9, %v2500_v36 }
 0x293   : > { %v2451_v5 = vpop.permute.xlu2 %2450 }
 0x294   : > { %v2447_v9 = vpop.permute.xlu0 %2446  ;;  %v2493_v52 = vsel %vm1778_vm4, %v4646_v34, %v2451_v5 }
 0x295   : > { %v2491_v20 = vsel %vm1778_vm4, %v4585_v53, %v2447_v9  ;;  %2510 = vst.msk [vmem:[%s4704_s26 + $0x28] sm:$0xff] %vm2504_vm9, %v2493_v52 }
 0x296   : > { %2508 = vst.msk [vmem:[%s4704_s26 + $0x18] sm:$0xff] %vm2504_vm9, %v2491_v20 }
 0x298   : > { %v2449_v47 = vpop.permute.xlu1 %2448 }
 0x299   : > { %v2492_v49 = vsel %vm1778_vm4, %v4598_v16, %v2449_v47 }
 0x29a   : > { %2509 = vst.msk [vmem:[%s4704_s26 + $0x20] sm:$0xff] %vm2504_vm9, %v2492_v49 }
 0x29d   : > { %v2453_v31 = vpop.permute.xlu0 %2452 }
 0x29e   : > { %v2494_v0 = vsel %vm1778_vm4, %v2318_v39, %v2453_v31 }
 0x29f   : > { %2511 = vst.msk [vmem:[%s4704_s26 + $0x30] sm:$0xff] %vm2504_vm9, %v2494_v0 }
 0x2b6   : > { %v2457_v53 = vpop.permute.xlu2 %2456 }
 0x2b7   : > { %v2496_v34 = vsel %vm1778_vm4, %v2320_v10, %v2457_v53  ;;  %v2455_v56 = vpop.permute.xlu1 %2454 }
 0x2b8   : > { %2513 = vst.msk [vmem:[%s4704_s26 + $0x40] sm:$0xff] %vm2504_vm9, %v2496_v34  ;;  %v2495_v42 = vsel %vm1778_vm4, %v4643_v62, %v2455_v56 }
 0x2b9   : > { %2512 = vst.msk [vmem:[%s4704_s26 + $0x38] sm:$0xff] %vm2504_vm9, %v2495_v42 }
 0x2bb   : > { %v2459_v16 = vpop.permute.xlu0 %2458 }
 0x2bc   : > { %v2497_v7 = vsel %vm1778_vm4, %v2321_v38, %v2459_v16 }
 0x2bd   : > { %2514 = vst.msk [vmem:[%s4704_s26 + $0x48] sm:$0xff] %vm2504_vm9, %v2497_v7 }
 0x2be   : > { %v2469_v61 = vpop.permute.xlu2 %2468 }
 0x2bf   : > { %v2502_v45 = vsel %vm1778_vm4, %v4655_v22, %v2469_v61 }
 0x2c0   : > { %2519 = vst.msk [vmem:[%s4704_s26 + $0x70] sm:$0xff] %vm2504_vm9, %v2502_v45 }
 0x2c3   : > { %v2471_v3 = vpop.permute.xlu0 %2470 }
 0x2c4   : > { %v2503_v19 = vsel %vm1778_vm4, %v4657_v23, %v2471_v3 }
 0x2c5   : > { %2520 = vst.msk [vmem:[%s4704_s26 + $0x78] sm:$0xff] %vm2504_vm9, %v2503_v19 }
 0x2da   : > { %v2461_v62 = vpop.permute.xlu1 %2460 }
 0x2db   : > { %v2498_v39 = vsel %vm1778_vm4, %v2322_v24, %v2461_v62 }
 0x2dc   : > { %2515 = vst.msk [vmem:[%s4704_s26 + $0x50] sm:$0xff] %vm2504_vm9, %v2498_v39 }
 0x2e2   : > { %v2467_v35 = vpop.permute.xlu1 %2466 }
 0x2e3   : > { %v2501_v11 = vsel %vm1778_vm4, %v4532_v27, %v2467_v35 }
 0x2e4   : > { %2518 = vst.msk [vmem:[%s4704_s26 + $0x68] sm:$0xff] %vm2504_vm9, %v2501_v11 }
 0x2e5 PF: > { %s21_s17 = sadd.s32 1, %s2691_s17  }
 0x2e6   : > { %p18_p4 = scmp.ge.s32.totalorder %s21_s17, 4  }
 0x2e8   :  { %20 = sbr.rel (!%p18_p4) target bundleno = 1 (0x1), region = 105 }

</bundles_post_ra>
